<compile_context>
chip_gen: v5e
topology: v5e:2x2
jax: 0.10.0
libtpu: 0.0.40
codegen_flags: <defaults>
</compile_context>

<pallas_src>
import jax
import jax.numpy as jnp
from jax.experimental import pallas as pl
from jax.experimental.pallas import tpu as pltpu

# ---- static network geometry (Linear(1152, 10) implies a 28x28x1 input) ----
_GROUP = 16            # row pitch of one conv3 tap group (9 real rows + 7 pad)
_ROWS = 9 * _GROUP     # 144 rows carried through conv1/conv2 per image
_OUT_PAD = 128         # bottleneck output padded to a full 128-lane register


# ---------------------------------------------------------------------------
# The fused kernel: one image per grid step, everything resident in VMEM.
# ---------------------------------------------------------------------------
def _encoder_kernel(cols1_ref, w1_ref, s1_ref, w2_ref, s2_ref,
                    w3_ref, s3_ref, wb_ref, bb_ref, out_ref):
    w1 = w1_ref[...]                    # (4, 32)   conv1 weights, BN scale folded
    s1 = s1_ref[...]                    # (1, 32)   conv1 BN shift
    s2 = s2_ref[...]                    # (1, 64)
    s3 = s3_ref[...]                    # (1, 128)

    # --- conv1 (K=4) on the VPU as broadcast-FMAs + shift + ReLU, immediately
    #     consumed by conv2's GEMM (one accumulated GEMM per 2x2 offset block).
    h2 = None
    for d in range(4):                              # conv2 kernel offsets (di, dj)
        c1 = cols1_ref[0, d]                        # (144, 4) raw-input patches
        acc = c1[:, 0:1] * w1[0:1, :]
        for q in range(1, 4):
            acc = acc + c1[:, q:q + 1] * w1[q:q + 1, :]
        blk = jnp.maximum(acc + s1, 0.0)            # (144, 32) conv1 output block
        part = jnp.dot(blk, w2_ref[d], preferred_element_type=jnp.float32)
        h2 = part if h2 is None else h2 + part
    h2 = jnp.maximum(h2 + s2, 0.0)                  # (144, 64) conv2 output

    # --- conv3: 9 tap GEMMs over 8-sublane-aligned 16-row groups, f32 accum.
    acc3 = jnp.dot(h2[0:_GROUP, :], w3_ref[0], preferred_element_type=jnp.float32)
    for t in range(1, 9):
        acc3 = acc3 + jnp.dot(h2[t * _GROUP:(t + 1) * _GROUP, :], w3_ref[t],
                              preferred_element_type=jnp.float32)
    h3 = jnp.maximum(acc3 + s3, 0.0)                # (16, 128); rows 9..15 unused

    # --- bottleneck Linear(1152 -> 10), output padded to 128 dense lanes.
    acc = bb_ref[...]                               # (1, 128) bias (padded)
    for r in range(9):                              # NHWC flatten row (h*3 + w)
        acc = acc + jnp.dot(h3[r:r + 1, :], wb_ref[r],
                            preferred_element_type=jnp.float32)
    out_ref[0] = acc.astype(out_ref.dtype)


# ---------------------------------------------------------------------------
# Host-side (trace-time) prep: input patch composition + weight folding.
# ---------------------------------------------------------------------------
def _build_cols1(x):
    """Raw NCHW input -> composed conv1 patches in the fused-net row order.

    Output (N, 4, 144, 4):
      dim1 = conv2 kernel offset d = di*2 + dj
      dim2 = 9 groups of 16 rows: group t = conv3 tap ki*3+kj,
             row p < 9 = conv3 output pixel h3*3+w3, rows 9..15 zero pad
      dim3 = conv1 kernel offset q = a*2 + b
    Entry = x[n, 0, 8*h3 + 4*ki + 2*di + a, 8*w3 + 4*kj + 2*dj + b].
    """
    n = x.shape[0]
    xs = x[:, 0]                                           # (N, 28, 28), Cin == 1
    di = jnp.arange(2).reshape(2, 1, 1, 1, 1, 1, 1, 1)
    dj = jnp.arange(2).reshape(1, 2, 1, 1, 1, 1, 1, 1)
    ki = jnp.arange(3).reshape(1, 1, 3, 1, 1, 1, 1, 1)
    kj = jnp.arange(3).reshape(1, 1, 1, 3, 1, 1, 1, 1)
    h3 = jnp.arange(3).reshape(1, 1, 1, 1, 3, 1, 1, 1)
    w3 = jnp.arange(3).reshape(1, 1, 1, 1, 1, 3, 1, 1)
    a = jnp.arange(2).reshape(1, 1, 1, 1, 1, 1, 2, 1)
    b = jnp.arange(2).reshape(1, 1, 1, 1, 1, 1, 1, 2)
    r = 8 * h3 + 4 * ki + 2 * di + a
    c = 8 * w3 + 4 * kj + 2 * dj + b
    r, c = jnp.broadcast_arrays(r, c)                      # (2,2,3,3,3,3,2,2)
    p = xs[:, r, c]                                        # (N,2,2,3,3,3,3,2,2)
    p = p.reshape(n, 4, 9, 9, 4)                           # (N, d, t, p, q)
    p = jnp.pad(p, ((0, 0), (0, 0), (0, 0), (0, _GROUP - 9), (0, 0)))
    return p.reshape(n, 4, _ROWS, 4)


def _prep_params(params, eps=1e-5):
    """Fold eval-mode BN scale into conv weights; permute & pad the bottleneck."""
    w1, g1, b1, m1, v1 = params["conv1"]
    w2, g2, b2, m2, v2 = params["conv2"]
    w3, g3, b3, m3, v3 = params["conv3"]
    wb, bb = params["bottleneck"]

    def fold(gamma, beta, mean, var):
        scale = gamma / jnp.sqrt(var + eps)
        return scale, beta - mean * scale

    sc1, sh1 = fold(g1, b1, m1, v1)
    sc2, sh2 = fold(g2, b2, m2, v2)
    sc3, sh3 = fold(g3, b3, m3, v3)

    # conv1: (32,1,2,2) -> rows ordered (a,b), cols = cout, scale folded.
    w1s = w1.reshape(32, 4).T * sc1[None, :]                         # (4, 32)
    # conv2: (64,32,2,2) -> [d=(di,dj), cin, cout], scale folded.
    w2s = w2.transpose(2, 3, 1, 0).reshape(4, 32, 64) * sc2[None, None, :]
    # conv3: (128,64,3,3) -> [t=(ki,kj), cin, cout], scale folded.
    w3s = w3.transpose(2, 3, 1, 0).reshape(9, 64, 128) * sc3[None, None, :]
    # bottleneck: torch flatten order (c,h,w) -> our (h,w,c); pad cout 10->128.
    wbt = wb.reshape(10, 128, 3, 3).transpose(2, 3, 1, 0).reshape(9, 128, 10)
    wbp = jnp.zeros((9, 128, _OUT_PAD), jnp.float32).at[:, :, :10].set(wbt)
    bbp = jnp.zeros((1, _OUT_PAD), jnp.float32).at[0, :10].set(bb)

    return (w1s, sh1[None, :], w2s, sh2[None, :], w3s, sh3[None, :], wbp, bbp)


# ---------------------------------------------------------------------------
# Encoder forward (single fused pallas_call)
# ---------------------------------------------------------------------------
def _vspec(shape, index_map):
    return pl.BlockSpec(shape, index_map, memory_space=pltpu.MemorySpace.VMEM)


def encoder_forward(x, params):
    n = x.shape[0]
    cols1 = _build_cols1(x)                                   # (N, 4, 144, 4)
    w1s, s1, w2s, s2, w3s, s3, wbp, bbp = _prep_params(params)

    macs_per_img = (4 * _ROWS * 4 * 32          # conv1 VPU FMAs
                    + 4 * _ROWS * 32 * 64       # conv2
                    + 9 * _GROUP * 64 * 128     # conv3
                    + 9 * 128 * 128)            # bottleneck (padded)
    cost = pl.CostEstimate(
        flops=int(2 * n * macs_per_img),
        transcendentals=0,
        bytes_accessed=int(4 * (cols1.size + n * _OUT_PAD + w1s.size
                                + w2s.size + w3s.size + wbp.size)),
    )

    out = pl.pallas_call(
        _encoder_kernel,
        out_shape=jax.ShapeDtypeStruct((n, 1, _OUT_PAD), jnp.float32),
        grid=(n,),
        in_specs=[
            _vspec((1, 4, _ROWS, 4), lambda i: (i, 0, 0, 0)),   # cols1 (per image)
            _vspec((4, 32), lambda i: (0, 0)),                  # w1 (scale folded)
            _vspec((1, 32), lambda i: (0, 0)),                  # bn1 shift
            _vspec((4, 32, 64), lambda i: (0, 0, 0)),           # w2
            _vspec((1, 64), lambda i: (0, 0)),                  # bn2 shift
            _vspec((9, 64, 128), lambda i: (0, 0, 0)),          # w3
            _vspec((1, 128), lambda i: (0, 0)),                 # bn3 shift
            _vspec((9, 128, _OUT_PAD), lambda i: (0, 0, 0)),    # bottleneck W
            _vspec((1, _OUT_PAD), lambda i: (0, 0)),            # bottleneck bias
        ],
        out_specs=_vspec((1, 1, _OUT_PAD), lambda i: (i, 0, 0)),
        compiler_params=pltpu.CompilerParams(
            dimension_semantics=("parallel",),
            vmem_limit_bytes=32 * 1024 * 1024,
        ),
        cost_estimate=cost,
    )(cols1, w1s, s1, w2s, s2, w3s, s3, wbp, bbp)
    return out[:, 0, :10]


# ---------------------------------------------------------------------------
# Pure-JAX reference for correctness check
# ---------------------------------------------------------------------------
def ref_forward(x, params):
    def conv(x, w, gamma, beta, mean, var, stride, eps=1e-5):
        y = jax.lax.conv_general_dilated(
            x, w, (stride, stride), "VALID",
            dimension_numbers=("NCHW", "OIHW", "NCHW"))
        s = gamma / jnp.sqrt(var + eps)
        y = y * s[None, :, None, None] + (beta - mean * s)[None, :, None, None]
        return jnp.maximum(y, 0.0)

    x = conv(x, *params["conv1"], 2)
    x = conv(x, *params["conv2"], 2)
    x = conv(x, *params["conv3"], 2)
    flat = x.reshape(x.shape[0], -1)
    wb, bb = params["bottleneck"]
    return flat @ wb.T + bb


# ---------------------------------------------------------------------------
# Deterministic parameter init (synthetic, no checkpoint)
# ---------------------------------------------------------------------------
def init_params(key):
    def conv_block(key, cout, cin, k):
        k0, k1, k2, k3, k4 = jax.random.split(key, 5)
        w = jax.random.normal(k0, (cout, cin, k, k), jnp.float32) * 0.1
        gamma = jax.random.uniform(k1, (cout,), jnp.float32, 0.5, 1.5)
        beta = jax.random.normal(k2, (cout,), jnp.float32) * 0.1
        mean = jax.random.normal(k3, (cout,), jnp.float32) * 0.1
        var = jax.random.uniform(k4, (cout,), jnp.float32, 0.5, 1.5)
        return (w, gamma, beta, mean, var)

    k1, k2, k3, k4 = jax.random.split(key, 4)
    kw, kb = jax.random.split(k4)
    return {
        "conv1": conv_block(k1, 32, 1, 2),
        "conv2": conv_block(k2, 64, 32, 2),
        "conv3": conv_block(k3, 128, 64, 3),
        "bottleneck": (
            jax.random.normal(kw, (10, 1152), jnp.float32) * (1.0 / jnp.sqrt(1152.0)),
            jax.random.normal(kb, (10,), jnp.float32) * 0.01,
        ),
    }


if __name__ == "__main__":
    key = jax.random.PRNGKey(0)
    kp, kx = jax.random.split(key)
    params = init_params(kp)
    # MNIST-like input: Linear(1152, 10) implies a 28x28 single-channel input.
    x = jax.random.normal(kx, (2, 1, 28, 28), jnp.float32)

    enc = jax.jit(encoder_forward)
    out = jax.block_until_ready(enc(x, params))
    assert out.shape == (2, 10), out.shape

    ref = jax.block_until_ready(ref_forward(x, params))
    max_err = float(jnp.max(jnp.abs(out - ref)))
    assert jnp.allclose(out, ref, atol=1e-3, rtol=1e-3), max_err
    print("KERNEL_OK")
</pallas_src>

<mosaic_0001>
module attributes {stable_mosaic.version = 11 : i64} {
  func.func @_encoder_kernel(%arg0: i32, %arg1: memref<1x4x144x4xf32, #tpu.memory_space<vmem>>, %arg2: memref<4x32xf32, #tpu.memory_space<vmem>>, %arg3: memref<1x32xf32, #tpu.memory_space<vmem>>, %arg4: memref<4x32x64xf32, #tpu.memory_space<vmem>>, %arg5: memref<1x64xf32, #tpu.memory_space<vmem>>, %arg6: memref<9x64x128xf32, #tpu.memory_space<vmem>>, %arg7: memref<1x128xf32, #tpu.memory_space<vmem>>, %arg8: memref<9x128x128xf32, #tpu.memory_space<vmem>>, %arg9: memref<1x128xf32, #tpu.memory_space<vmem>>, %arg10: memref<1x1x128xf32, #tpu.memory_space<vmem>>) attributes {dimension_semantics = [#tpu.dimension_semantics<parallel>], iteration_bounds = array<i64: 2>, scalar_prefetch = 0 : i64, scratch_operands = 0 : i64, tpu.core_type = #tpu.core_type<tc>, window_params = [{transform_indices = @transform_0, window_bounds = array<i64: 1, 4, 144, 4>}, {pipeline_mode = #tpu.pipeline_mode<synchronous>, transform_indices = @transform_1, window_bounds = array<i64: 4, 32>}, {pipeline_mode = #tpu.pipeline_mode<synchronous>, transform_indices = @transform_2, window_bounds = array<i64: 1, 32>}, {pipeline_mode = #tpu.pipeline_mode<synchronous>, transform_indices = @transform_3, window_bounds = array<i64: 4, 32, 64>}, {pipeline_mode = #tpu.pipeline_mode<synchronous>, transform_indices = @transform_4, window_bounds = array<i64: 1, 64>}, {pipeline_mode = #tpu.pipeline_mode<synchronous>, transform_indices = @transform_5, window_bounds = array<i64: 9, 64, 128>}, {pipeline_mode = #tpu.pipeline_mode<synchronous>, transform_indices = @transform_6, window_bounds = array<i64: 1, 128>}, {pipeline_mode = #tpu.pipeline_mode<synchronous>, transform_indices = @transform_7, window_bounds = array<i64: 9, 128, 128>}, {pipeline_mode = #tpu.pipeline_mode<synchronous>, transform_indices = @transform_8, window_bounds = array<i64: 1, 128>}, {transform_indices = @transform_9, window_bounds = array<i64: 1, 1, 128>}]} {
    %c0 = arith.constant 0 : index
    %c0_0 = arith.constant 0 : index
    %0 = vector.load %arg2[%c0, %c0_0] : memref<4x32xf32, #tpu.memory_space<vmem>>, vector<4x32xf32>
    %c0_1 = arith.constant 0 : index
    %c0_2 = arith.constant 0 : index
    %1 = vector.load %arg3[%c0_1, %c0_2] : memref<1x32xf32, #tpu.memory_space<vmem>>, vector<1x32xf32>
    %c0_3 = arith.constant 0 : index
    %c0_4 = arith.constant 0 : index
    %2 = vector.load %arg5[%c0_3, %c0_4] : memref<1x64xf32, #tpu.memory_space<vmem>>, vector<1x64xf32>
    %c0_5 = arith.constant 0 : index
    %c0_6 = arith.constant 0 : index
    %3 = vector.load %arg7[%c0_5, %c0_6] : memref<1x128xf32, #tpu.memory_space<vmem>>, vector<1x128xf32>
    %c0_7 = arith.constant 0 : index
    %c0_8 = arith.constant 0 : index
    %c0_9 = arith.constant 0 : index
    %c0_10 = arith.constant 0 : index
    %4 = vector.load %arg1[%c0_7, %c0_8, %c0_9, %c0_10] : memref<1x4x144x4xf32, #tpu.memory_space<vmem>>, vector<1x1x144x4xf32>
    %5 = vector.shape_cast %4 : vector<1x1x144x4xf32> to vector<144x4xf32>
    %6 = vector.extract_strided_slice %5 {offsets = [0, 0], sizes = [144, 1], strides = [1, 1]} : vector<144x4xf32> to vector<144x1xf32>
    %7 = vector.extract_strided_slice %0 {offsets = [0, 0], sizes = [1, 32], strides = [1, 1]} : vector<4x32xf32> to vector<1x32xf32>
    %8 = vector.broadcast %6 : vector<144x1xf32> to vector<144x32xf32>
    %9 = vector.broadcast %7 : vector<1x32xf32> to vector<144x32xf32>
    %10 = arith.mulf %8, %9 : vector<144x32xf32>
    %11 = vector.extract_strided_slice %5 {offsets = [0, 1], sizes = [144, 1], strides = [1, 1]} : vector<144x4xf32> to vector<144x1xf32>
    %12 = vector.extract_strided_slice %0 {offsets = [1, 0], sizes = [1, 32], strides = [1, 1]} : vector<4x32xf32> to vector<1x32xf32>
    %13 = vector.broadcast %11 : vector<144x1xf32> to vector<144x32xf32>
    %14 = vector.broadcast %12 : vector<1x32xf32> to vector<144x32xf32>
    %15 = arith.mulf %13, %14 : vector<144x32xf32>
    %16 = arith.addf %10, %15 : vector<144x32xf32>
    %17 = vector.extract_strided_slice %5 {offsets = [0, 2], sizes = [144, 1], strides = [1, 1]} : vector<144x4xf32> to vector<144x1xf32>
    %18 = vector.extract_strided_slice %0 {offsets = [2, 0], sizes = [1, 32], strides = [1, 1]} : vector<4x32xf32> to vector<1x32xf32>
    %19 = vector.broadcast %17 : vector<144x1xf32> to vector<144x32xf32>
    %20 = vector.broadcast %18 : vector<1x32xf32> to vector<144x32xf32>
    %21 = arith.mulf %19, %20 : vector<144x32xf32>
    %22 = arith.addf %16, %21 : vector<144x32xf32>
    %23 = vector.extract_strided_slice %5 {offsets = [0, 3], sizes = [144, 1], strides = [1, 1]} : vector<144x4xf32> to vector<144x1xf32>
    %24 = vector.extract_strided_slice %0 {offsets = [3, 0], sizes = [1, 32], strides = [1, 1]} : vector<4x32xf32> to vector<1x32xf32>
    %25 = vector.broadcast %23 : vector<144x1xf32> to vector<144x32xf32>
    %26 = vector.broadcast %24 : vector<1x32xf32> to vector<144x32xf32>
    %27 = arith.mulf %25, %26 : vector<144x32xf32>
    %28 = arith.addf %22, %27 : vector<144x32xf32>
    %29 = vector.broadcast %1 : vector<1x32xf32> to vector<144x32xf32>
    %30 = arith.addf %28, %29 : vector<144x32xf32>
    %cst = arith.constant 0.000000e+00 : f32
    %31 = vector.broadcast %cst : f32 to vector<144x32xf32>
    %32 = arith.maximumf %30, %31 : vector<144x32xf32>
    %c0_11 = arith.constant 0 : index
    %c0_12 = arith.constant 0 : index
    %c0_13 = arith.constant 0 : index
    %33 = vector.load %arg4[%c0_11, %c0_12, %c0_13] : memref<4x32x64xf32, #tpu.memory_space<vmem>>, vector<1x32x64xf32>
    %34 = vector.shape_cast %33 : vector<1x32x64xf32> to vector<32x64xf32>
    %cst_14 = arith.constant dense<0.000000e+00> : vector<144x64xf32>
    %35 = tpu.matmul %32, %34, %cst_14 {dimension_numbers = #tpu.dot_dimension_numbers<[1], [0], [0], [1], [0, 0, 1, 1], [], []>} : vector<144x32xf32>, vector<32x64xf32>, vector<144x64xf32> -> vector<144x64xf32>
    %c0_15 = arith.constant 0 : index
    %c1 = arith.constant 1 : index
    %c0_16 = arith.constant 0 : index
    %c0_17 = arith.constant 0 : index
    %36 = vector.load %arg1[%c0_15, %c1, %c0_16, %c0_17] : memref<1x4x144x4xf32, #tpu.memory_space<vmem>>, vector<1x1x144x4xf32>
    %37 = vector.shape_cast %36 : vector<1x1x144x4xf32> to vector<144x4xf32>
    %38 = vector.extract_strided_slice %37 {offsets = [0, 0], sizes = [144, 1], strides = [1, 1]} : vector<144x4xf32> to vector<144x1xf32>
    %39 = vector.extract_strided_slice %0 {offsets = [0, 0], sizes = [1, 32], strides = [1, 1]} : vector<4x32xf32> to vector<1x32xf32>
    %40 = vector.broadcast %38 : vector<144x1xf32> to vector<144x32xf32>
    %41 = vector.broadcast %39 : vector<1x32xf32> to vector<144x32xf32>
    %42 = arith.mulf %40, %41 : vector<144x32xf32>
    %43 = vector.extract_strided_slice %37 {offsets = [0, 1], sizes = [144, 1], strides = [1, 1]} : vector<144x4xf32> to vector<144x1xf32>
    %44 = vector.extract_strided_slice %0 {offsets = [1, 0], sizes = [1, 32], strides = [1, 1]} : vector<4x32xf32> to vector<1x32xf32>
    %45 = vector.broadcast %43 : vector<144x1xf32> to vector<144x32xf32>
    %46 = vector.broadcast %44 : vector<1x32xf32> to vector<144x32xf32>
    %47 = arith.mulf %45, %46 : vector<144x32xf32>
    %48 = arith.addf %42, %47 : vector<144x32xf32>
    %49 = vector.extract_strided_slice %37 {offsets = [0, 2], sizes = [144, 1], strides = [1, 1]} : vector<144x4xf32> to vector<144x1xf32>
    %50 = vector.extract_strided_slice %0 {offsets = [2, 0], sizes = [1, 32], strides = [1, 1]} : vector<4x32xf32> to vector<1x32xf32>
    %51 = vector.broadcast %49 : vector<144x1xf32> to vector<144x32xf32>
    %52 = vector.broadcast %50 : vector<1x32xf32> to vector<144x32xf32>
    %53 = arith.mulf %51, %52 : vector<144x32xf32>
    %54 = arith.addf %48, %53 : vector<144x32xf32>
    %55 = vector.extract_strided_slice %37 {offsets = [0, 3], sizes = [144, 1], strides = [1, 1]} : vector<144x4xf32> to vector<144x1xf32>
    %56 = vector.extract_strided_slice %0 {offsets = [3, 0], sizes = [1, 32], strides = [1, 1]} : vector<4x32xf32> to vector<1x32xf32>
    %57 = vector.broadcast %55 : vector<144x1xf32> to vector<144x32xf32>
    %58 = vector.broadcast %56 : vector<1x32xf32> to vector<144x32xf32>
    %59 = arith.mulf %57, %58 : vector<144x32xf32>
    %60 = arith.addf %54, %59 : vector<144x32xf32>
    %61 = vector.broadcast %1 : vector<1x32xf32> to vector<144x32xf32>
    %62 = arith.addf %60, %61 : vector<144x32xf32>
    %cst_18 = arith.constant 0.000000e+00 : f32
    %63 = vector.broadcast %cst_18 : f32 to vector<144x32xf32>
    %64 = arith.maximumf %62, %63 : vector<144x32xf32>
    %c1_19 = arith.constant 1 : index
    %c0_20 = arith.constant 0 : index
    %c0_21 = arith.constant 0 : index
    %65 = vector.load %arg4[%c1_19, %c0_20, %c0_21] : memref<4x32x64xf32, #tpu.memory_space<vmem>>, vector<1x32x64xf32>
    %66 = vector.shape_cast %65 : vector<1x32x64xf32> to vector<32x64xf32>
    %cst_22 = arith.constant dense<0.000000e+00> : vector<144x64xf32>
    %67 = tpu.matmul %64, %66, %cst_22 {dimension_numbers = #tpu.dot_dimension_numbers<[1], [0], [0], [1], [0, 0, 1, 1], [], []>} : vector<144x32xf32>, vector<32x64xf32>, vector<144x64xf32> -> vector<144x64xf32>
    %68 = arith.addf %35, %67 : vector<144x64xf32>
    %c0_23 = arith.constant 0 : index
    %c2 = arith.constant 2 : index
    %c0_24 = arith.constant 0 : index
    %c0_25 = arith.constant 0 : index
    %69 = vector.load %arg1[%c0_23, %c2, %c0_24, %c0_25] : memref<1x4x144x4xf32, #tpu.memory_space<vmem>>, vector<1x1x144x4xf32>
    %70 = vector.shape_cast %69 : vector<1x1x144x4xf32> to vector<144x4xf32>
    %71 = vector.extract_strided_slice %70 {offsets = [0, 0], sizes = [144, 1], strides = [1, 1]} : vector<144x4xf32> to vector<144x1xf32>
    %72 = vector.extract_strided_slice %0 {offsets = [0, 0], sizes = [1, 32], strides = [1, 1]} : vector<4x32xf32> to vector<1x32xf32>
    %73 = vector.broadcast %71 : vector<144x1xf32> to vector<144x32xf32>
    %74 = vector.broadcast %72 : vector<1x32xf32> to vector<144x32xf32>
    %75 = arith.mulf %73, %74 : vector<144x32xf32>
    %76 = vector.extract_strided_slice %70 {offsets = [0, 1], sizes = [144, 1], strides = [1, 1]} : vector<144x4xf32> to vector<144x1xf32>
    %77 = vector.extract_strided_slice %0 {offsets = [1, 0], sizes = [1, 32], strides = [1, 1]} : vector<4x32xf32> to vector<1x32xf32>
    %78 = vector.broadcast %76 : vector<144x1xf32> to vector<144x32xf32>
    %79 = vector.broadcast %77 : vector<1x32xf32> to vector<144x32xf32>
    %80 = arith.mulf %78, %79 : vector<144x32xf32>
    %81 = arith.addf %75, %80 : vector<144x32xf32>
    %82 = vector.extract_strided_slice %70 {offsets = [0, 2], sizes = [144, 1], strides = [1, 1]} : vector<144x4xf32> to vector<144x1xf32>
    %83 = vector.extract_strided_slice %0 {offsets = [2, 0], sizes = [1, 32], strides = [1, 1]} : vector<4x32xf32> to vector<1x32xf32>
    %84 = vector.broadcast %82 : vector<144x1xf32> to vector<144x32xf32>
    %85 = vector.broadcast %83 : vector<1x32xf32> to vector<144x32xf32>
    %86 = arith.mulf %84, %85 : vector<144x32xf32>
    %87 = arith.addf %81, %86 : vector<144x32xf32>
    %88 = vector.extract_strided_slice %70 {offsets = [0, 3], sizes = [144, 1], strides = [1, 1]} : vector<144x4xf32> to vector<144x1xf32>
    %89 = vector.extract_strided_slice %0 {offsets = [3, 0], sizes = [1, 32], strides = [1, 1]} : vector<4x32xf32> to vector<1x32xf32>
    %90 = vector.broadcast %88 : vector<144x1xf32> to vector<144x32xf32>
    %91 = vector.broadcast %89 : vector<1x32xf32> to vector<144x32xf32>
    %92 = arith.mulf %90, %91 : vector<144x32xf32>
    %93 = arith.addf %87, %92 : vector<144x32xf32>
    %94 = vector.broadcast %1 : vector<1x32xf32> to vector<144x32xf32>
    %95 = arith.addf %93, %94 : vector<144x32xf32>
    %cst_26 = arith.constant 0.000000e+00 : f32
    %96 = vector.broadcast %cst_26 : f32 to vector<144x32xf32>
    %97 = arith.maximumf %95, %96 : vector<144x32xf32>
    %c2_27 = arith.constant 2 : index
    %c0_28 = arith.constant 0 : index
    %c0_29 = arith.constant 0 : index
    %98 = vector.load %arg4[%c2_27, %c0_28, %c0_29] : memref<4x32x64xf32, #tpu.memory_space<vmem>>, vector<1x32x64xf32>
    %99 = vector.shape_cast %98 : vector<1x32x64xf32> to vector<32x64xf32>
    %cst_30 = arith.constant dense<0.000000e+00> : vector<144x64xf32>
    %100 = tpu.matmul %97, %99, %cst_30 {dimension_numbers = #tpu.dot_dimension_numbers<[1], [0], [0], [1], [0, 0, 1, 1], [], []>} : vector<144x32xf32>, vector<32x64xf32>, vector<144x64xf32> -> vector<144x64xf32>
    %101 = arith.addf %68, %100 : vector<144x64xf32>
    %c0_31 = arith.constant 0 : index
    %c3 = arith.constant 3 : index
    %c0_32 = arith.constant 0 : index
    %c0_33 = arith.constant 0 : index
    %102 = vector.load %arg1[%c0_31, %c3, %c0_32, %c0_33] : memref<1x4x144x4xf32, #tpu.memory_space<vmem>>, vector<1x1x144x4xf32>
    %103 = vector.shape_cast %102 : vector<1x1x144x4xf32> to vector<144x4xf32>
    %104 = vector.extract_strided_slice %103 {offsets = [0, 0], sizes = [144, 1], strides = [1, 1]} : vector<144x4xf32> to vector<144x1xf32>
    %105 = vector.extract_strided_slice %0 {offsets = [0, 0], sizes = [1, 32], strides = [1, 1]} : vector<4x32xf32> to vector<1x32xf32>
    %106 = vector.broadcast %104 : vector<144x1xf32> to vector<144x32xf32>
    %107 = vector.broadcast %105 : vector<1x32xf32> to vector<144x32xf32>
    %108 = arith.mulf %106, %107 : vector<144x32xf32>
    %109 = vector.extract_strided_slice %103 {offsets = [0, 1], sizes = [144, 1], strides = [1, 1]} : vector<144x4xf32> to vector<144x1xf32>
    %110 = vector.extract_strided_slice %0 {offsets = [1, 0], sizes = [1, 32], strides = [1, 1]} : vector<4x32xf32> to vector<1x32xf32>
    %111 = vector.broadcast %109 : vector<144x1xf32> to vector<144x32xf32>
    %112 = vector.broadcast %110 : vector<1x32xf32> to vector<144x32xf32>
    %113 = arith.mulf %111, %112 : vector<144x32xf32>
    %114 = arith.addf %108, %113 : vector<144x32xf32>
    %115 = vector.extract_strided_slice %103 {offsets = [0, 2], sizes = [144, 1], strides = [1, 1]} : vector<144x4xf32> to vector<144x1xf32>
    %116 = vector.extract_strided_slice %0 {offsets = [2, 0], sizes = [1, 32], strides = [1, 1]} : vector<4x32xf32> to vector<1x32xf32>
    %117 = vector.broadcast %115 : vector<144x1xf32> to vector<144x32xf32>
    %118 = vector.broadcast %116 : vector<1x32xf32> to vector<144x32xf32>
    %119 = arith.mulf %117, %118 : vector<144x32xf32>
    %120 = arith.addf %114, %119 : vector<144x32xf32>
    %121 = vector.extract_strided_slice %103 {offsets = [0, 3], sizes = [144, 1], strides = [1, 1]} : vector<144x4xf32> to vector<144x1xf32>
    %122 = vector.extract_strided_slice %0 {offsets = [3, 0], sizes = [1, 32], strides = [1, 1]} : vector<4x32xf32> to vector<1x32xf32>
    %123 = vector.broadcast %121 : vector<144x1xf32> to vector<144x32xf32>
    %124 = vector.broadcast %122 : vector<1x32xf32> to vector<144x32xf32>
    %125 = arith.mulf %123, %124 : vector<144x32xf32>
    %126 = arith.addf %120, %125 : vector<144x32xf32>
    %127 = vector.broadcast %1 : vector<1x32xf32> to vector<144x32xf32>
    %128 = arith.addf %126, %127 : vector<144x32xf32>
    %cst_34 = arith.constant 0.000000e+00 : f32
    %129 = vector.broadcast %cst_34 : f32 to vector<144x32xf32>
    %130 = arith.maximumf %128, %129 : vector<144x32xf32>
    %c3_35 = arith.constant 3 : index
    %c0_36 = arith.constant 0 : index
    %c0_37 = arith.constant 0 : index
    %131 = vector.load %arg4[%c3_35, %c0_36, %c0_37] : memref<4x32x64xf32, #tpu.memory_space<vmem>>, vector<1x32x64xf32>
    %132 = vector.shape_cast %131 : vector<1x32x64xf32> to vector<32x64xf32>
    %cst_38 = arith.constant dense<0.000000e+00> : vector<144x64xf32>
    %133 = tpu.matmul %130, %132, %cst_38 {dimension_numbers = #tpu.dot_dimension_numbers<[1], [0], [0], [1], [0, 0, 1, 1], [], []>} : vector<144x32xf32>, vector<32x64xf32>, vector<144x64xf32> -> vector<144x64xf32>
    %134 = arith.addf %101, %133 : vector<144x64xf32>
    %135 = vector.broadcast %2 : vector<1x64xf32> to vector<144x64xf32>
    %136 = arith.addf %134, %135 : vector<144x64xf32>
    %cst_39 = arith.constant 0.000000e+00 : f32
    %137 = vector.broadcast %cst_39 : f32 to vector<144x64xf32>
    %138 = arith.maximumf %136, %137 : vector<144x64xf32>
    %139 = vector.extract_strided_slice %138 {offsets = [0, 0], sizes = [16, 64], strides = [1, 1]} : vector<144x64xf32> to vector<16x64xf32>
    %c0_40 = arith.constant 0 : index
    %c0_41 = arith.constant 0 : index
    %c0_42 = arith.constant 0 : index
    %140 = vector.load %arg6[%c0_40, %c0_41, %c0_42] : memref<9x64x128xf32, #tpu.memory_space<vmem>>, vector<1x64x128xf32>
    %141 = vector.shape_cast %140 : vector<1x64x128xf32> to vector<64x128xf32>
    %cst_43 = arith.constant dense<0.000000e+00> : vector<16x128xf32>
    %142 = tpu.matmul %139, %141, %cst_43 {dimension_numbers = #tpu.dot_dimension_numbers<[1], [0], [0], [1], [0, 0, 1, 1], [], []>} : vector<16x64xf32>, vector<64x128xf32>, vector<16x128xf32> -> vector<16x128xf32>
    %143 = vector.extract_strided_slice %138 {offsets = [16, 0], sizes = [16, 64], strides = [1, 1]} : vector<144x64xf32> to vector<16x64xf32>
    %c1_44 = arith.constant 1 : index
    %c0_45 = arith.constant 0 : index
    %c0_46 = arith.constant 0 : index
    %144 = vector.load %arg6[%c1_44, %c0_45, %c0_46] : memref<9x64x128xf32, #tpu.memory_space<vmem>>, vector<1x64x128xf32>
    %145 = vector.shape_cast %144 : vector<1x64x128xf32> to vector<64x128xf32>
    %cst_47 = arith.constant dense<0.000000e+00> : vector<16x128xf32>
    %146 = tpu.matmul %143, %145, %cst_47 {dimension_numbers = #tpu.dot_dimension_numbers<[1], [0], [0], [1], [0, 0, 1, 1], [], []>} : vector<16x64xf32>, vector<64x128xf32>, vector<16x128xf32> -> vector<16x128xf32>
    %147 = arith.addf %142, %146 : vector<16x128xf32>
    %148 = vector.extract_strided_slice %138 {offsets = [32, 0], sizes = [16, 64], strides = [1, 1]} : vector<144x64xf32> to vector<16x64xf32>
    %c2_48 = arith.constant 2 : index
    %c0_49 = arith.constant 0 : index
    %c0_50 = arith.constant 0 : index
    %149 = vector.load %arg6[%c2_48, %c0_49, %c0_50] : memref<9x64x128xf32, #tpu.memory_space<vmem>>, vector<1x64x128xf32>
    %150 = vector.shape_cast %149 : vector<1x64x128xf32> to vector<64x128xf32>
    %cst_51 = arith.constant dense<0.000000e+00> : vector<16x128xf32>
    %151 = tpu.matmul %148, %150, %cst_51 {dimension_numbers = #tpu.dot_dimension_numbers<[1], [0], [0], [1], [0, 0, 1, 1], [], []>} : vector<16x64xf32>, vector<64x128xf32>, vector<16x128xf32> -> vector<16x128xf32>
    %152 = arith.addf %147, %151 : vector<16x128xf32>
    %153 = vector.extract_strided_slice %138 {offsets = [48, 0], sizes = [16, 64], strides = [1, 1]} : vector<144x64xf32> to vector<16x64xf32>
    %c3_52 = arith.constant 3 : index
    %c0_53 = arith.constant 0 : index
    %c0_54 = arith.constant 0 : index
    %154 = vector.load %arg6[%c3_52, %c0_53, %c0_54] : memref<9x64x128xf32, #tpu.memory_space<vmem>>, vector<1x64x128xf32>
    %155 = vector.shape_cast %154 : vector<1x64x128xf32> to vector<64x128xf32>
    %cst_55 = arith.constant dense<0.000000e+00> : vector<16x128xf32>
    %156 = tpu.matmul %153, %155, %cst_55 {dimension_numbers = #tpu.dot_dimension_numbers<[1], [0], [0], [1], [0, 0, 1, 1], [], []>} : vector<16x64xf32>, vector<64x128xf32>, vector<16x128xf32> -> vector<16x128xf32>
    %157 = arith.addf %152, %156 : vector<16x128xf32>
    %158 = vector.extract_strided_slice %138 {offsets = [64, 0], sizes = [16, 64], strides = [1, 1]} : vector<144x64xf32> to vector<16x64xf32>
    %c4 = arith.constant 4 : index
    %c0_56 = arith.constant 0 : index
    %c0_57 = arith.constant 0 : index
    %159 = vector.load %arg6[%c4, %c0_56, %c0_57] : memref<9x64x128xf32, #tpu.memory_space<vmem>>, vector<1x64x128xf32>
    %160 = vector.shape_cast %159 : vector<1x64x128xf32> to vector<64x128xf32>
    %cst_58 = arith.constant dense<0.000000e+00> : vector<16x128xf32>
    %161 = tpu.matmul %158, %160, %cst_58 {dimension_numbers = #tpu.dot_dimension_numbers<[1], [0], [0], [1], [0, 0, 1, 1], [], []>} : vector<16x64xf32>, vector<64x128xf32>, vector<16x128xf32> -> vector<16x128xf32>
    %162 = arith.addf %157, %161 : vector<16x128xf32>
    %163 = vector.extract_strided_slice %138 {offsets = [80, 0], sizes = [16, 64], strides = [1, 1]} : vector<144x64xf32> to vector<16x64xf32>
    %c5 = arith.constant 5 : index
    %c0_59 = arith.constant 0 : index
    %c0_60 = arith.constant 0 : index
    %164 = vector.load %arg6[%c5, %c0_59, %c0_60] : memref<9x64x128xf32, #tpu.memory_space<vmem>>, vector<1x64x128xf32>
    %165 = vector.shape_cast %164 : vector<1x64x128xf32> to vector<64x128xf32>
    %cst_61 = arith.constant dense<0.000000e+00> : vector<16x128xf32>
    %166 = tpu.matmul %163, %165, %cst_61 {dimension_numbers = #tpu.dot_dimension_numbers<[1], [0], [0], [1], [0, 0, 1, 1], [], []>} : vector<16x64xf32>, vector<64x128xf32>, vector<16x128xf32> -> vector<16x128xf32>
    %167 = arith.addf %162, %166 : vector<16x128xf32>
    %168 = vector.extract_strided_slice %138 {offsets = [96, 0], sizes = [16, 64], strides = [1, 1]} : vector<144x64xf32> to vector<16x64xf32>
    %c6 = arith.constant 6 : index
    %c0_62 = arith.constant 0 : index
    %c0_63 = arith.constant 0 : index
    %169 = vector.load %arg6[%c6, %c0_62, %c0_63] : memref<9x64x128xf32, #tpu.memory_space<vmem>>, vector<1x64x128xf32>
    %170 = vector.shape_cast %169 : vector<1x64x128xf32> to vector<64x128xf32>
    %cst_64 = arith.constant dense<0.000000e+00> : vector<16x128xf32>
    %171 = tpu.matmul %168, %170, %cst_64 {dimension_numbers = #tpu.dot_dimension_numbers<[1], [0], [0], [1], [0, 0, 1, 1], [], []>} : vector<16x64xf32>, vector<64x128xf32>, vector<16x128xf32> -> vector<16x128xf32>
    %172 = arith.addf %167, %171 : vector<16x128xf32>
    %173 = vector.extract_strided_slice %138 {offsets = [112, 0], sizes = [16, 64], strides = [1, 1]} : vector<144x64xf32> to vector<16x64xf32>
    %c7 = arith.constant 7 : index
    %c0_65 = arith.constant 0 : index
    %c0_66 = arith.constant 0 : index
    %174 = vector.load %arg6[%c7, %c0_65, %c0_66] : memref<9x64x128xf32, #tpu.memory_space<vmem>>, vector<1x64x128xf32>
    %175 = vector.shape_cast %174 : vector<1x64x128xf32> to vector<64x128xf32>
    %cst_67 = arith.constant dense<0.000000e+00> : vector<16x128xf32>
    %176 = tpu.matmul %173, %175, %cst_67 {dimension_numbers = #tpu.dot_dimension_numbers<[1], [0], [0], [1], [0, 0, 1, 1], [], []>} : vector<16x64xf32>, vector<64x128xf32>, vector<16x128xf32> -> vector<16x128xf32>
    %177 = arith.addf %172, %176 : vector<16x128xf32>
    %178 = vector.extract_strided_slice %138 {offsets = [128, 0], sizes = [16, 64], strides = [1, 1]} : vector<144x64xf32> to vector<16x64xf32>
    %c8 = arith.constant 8 : index
    %c0_68 = arith.constant 0 : index
    %c0_69 = arith.constant 0 : index
    %179 = vector.load %arg6[%c8, %c0_68, %c0_69] : memref<9x64x128xf32, #tpu.memory_space<vmem>>, vector<1x64x128xf32>
    %180 = vector.shape_cast %179 : vector<1x64x128xf32> to vector<64x128xf32>
    %cst_70 = arith.constant dense<0.000000e+00> : vector<16x128xf32>
    %181 = tpu.matmul %178, %180, %cst_70 {dimension_numbers = #tpu.dot_dimension_numbers<[1], [0], [0], [1], [0, 0, 1, 1], [], []>} : vector<16x64xf32>, vector<64x128xf32>, vector<16x128xf32> -> vector<16x128xf32>
    %182 = arith.addf %177, %181 : vector<16x128xf32>
    %183 = vector.broadcast %3 : vector<1x128xf32> to vector<16x128xf32>
    %184 = arith.addf %182, %183 : vector<16x128xf32>
    %cst_71 = arith.constant 0.000000e+00 : f32
    %185 = vector.broadcast %cst_71 : f32 to vector<16x128xf32>
    %186 = arith.maximumf %184, %185 : vector<16x128xf32>
    %c0_72 = arith.constant 0 : index
    %c0_73 = arith.constant 0 : index
    %187 = vector.load %arg9[%c0_72, %c0_73] : memref<1x128xf32, #tpu.memory_space<vmem>>, vector<1x128xf32>
    %188 = vector.extract_strided_slice %186 {offsets = [0, 0], sizes = [1, 128], strides = [1, 1]} : vector<16x128xf32> to vector<1x128xf32>
    %c0_74 = arith.constant 0 : index
    %c0_75 = arith.constant 0 : index
    %c0_76 = arith.constant 0 : index
    %189 = vector.load %arg8[%c0_74, %c0_75, %c0_76] : memref<9x128x128xf32, #tpu.memory_space<vmem>>, vector<1x128x128xf32>
    %190 = vector.shape_cast %189 : vector<1x128x128xf32> to vector<128x128xf32>
    %cst_77 = arith.constant dense<0.000000e+00> : vector<1x128xf32>
    %191 = tpu.matmul %188, %190, %cst_77 {dimension_numbers = #tpu.dot_dimension_numbers<[1], [0], [0], [1], [0, 0, 1, 1], [], []>} : vector<1x128xf32>, vector<128x128xf32>, vector<1x128xf32> -> vector<1x128xf32>
    %192 = arith.addf %187, %191 : vector<1x128xf32>
    %193 = vector.extract_strided_slice %186 {offsets = [1, 0], sizes = [1, 128], strides = [1, 1]} : vector<16x128xf32> to vector<1x128xf32>
    %c1_78 = arith.constant 1 : index
    %c0_79 = arith.constant 0 : index
    %c0_80 = arith.constant 0 : index
    %194 = vector.load %arg8[%c1_78, %c0_79, %c0_80] : memref<9x128x128xf32, #tpu.memory_space<vmem>>, vector<1x128x128xf32>
    %195 = vector.shape_cast %194 : vector<1x128x128xf32> to vector<128x128xf32>
    %cst_81 = arith.constant dense<0.000000e+00> : vector<1x128xf32>
    %196 = tpu.matmul %193, %195, %cst_81 {dimension_numbers = #tpu.dot_dimension_numbers<[1], [0], [0], [1], [0, 0, 1, 1], [], []>} : vector<1x128xf32>, vector<128x128xf32>, vector<1x128xf32> -> vector<1x128xf32>
    %197 = arith.addf %192, %196 : vector<1x128xf32>
    %198 = vector.extract_strided_slice %186 {offsets = [2, 0], sizes = [1, 128], strides = [1, 1]} : vector<16x128xf32> to vector<1x128xf32>
    %c2_82 = arith.constant 2 : index
    %c0_83 = arith.constant 0 : index
    %c0_84 = arith.constant 0 : index
    %199 = vector.load %arg8[%c2_82, %c0_83, %c0_84] : memref<9x128x128xf32, #tpu.memory_space<vmem>>, vector<1x128x128xf32>
    %200 = vector.shape_cast %199 : vector<1x128x128xf32> to vector<128x128xf32>
    %cst_85 = arith.constant dense<0.000000e+00> : vector<1x128xf32>
    %201 = tpu.matmul %198, %200, %cst_85 {dimension_numbers = #tpu.dot_dimension_numbers<[1], [0], [0], [1], [0, 0, 1, 1], [], []>} : vector<1x128xf32>, vector<128x128xf32>, vector<1x128xf32> -> vector<1x128xf32>
    %202 = arith.addf %197, %201 : vector<1x128xf32>
    %203 = vector.extract_strided_slice %186 {offsets = [3, 0], sizes = [1, 128], strides = [1, 1]} : vector<16x128xf32> to vector<1x128xf32>
    %c3_86 = arith.constant 3 : index
    %c0_87 = arith.constant 0 : index
    %c0_88 = arith.constant 0 : index
    %204 = vector.load %arg8[%c3_86, %c0_87, %c0_88] : memref<9x128x128xf32, #tpu.memory_space<vmem>>, vector<1x128x128xf32>
    %205 = vector.shape_cast %204 : vector<1x128x128xf32> to vector<128x128xf32>
    %cst_89 = arith.constant dense<0.000000e+00> : vector<1x128xf32>
    %206 = tpu.matmul %203, %205, %cst_89 {dimension_numbers = #tpu.dot_dimension_numbers<[1], [0], [0], [1], [0, 0, 1, 1], [], []>} : vector<1x128xf32>, vector<128x128xf32>, vector<1x128xf32> -> vector<1x128xf32>
    %207 = arith.addf %202, %206 : vector<1x128xf32>
    %208 = vector.extract_strided_slice %186 {offsets = [4, 0], sizes = [1, 128], strides = [1, 1]} : vector<16x128xf32> to vector<1x128xf32>
    %c4_90 = arith.constant 4 : index
    %c0_91 = arith.constant 0 : index
    %c0_92 = arith.constant 0 : index
    %209 = vector.load %arg8[%c4_90, %c0_91, %c0_92] : memref<9x128x128xf32, #tpu.memory_space<vmem>>, vector<1x128x128xf32>
    %210 = vector.shape_cast %209 : vector<1x128x128xf32> to vector<128x128xf32>
    %cst_93 = arith.constant dense<0.000000e+00> : vector<1x128xf32>
    %211 = tpu.matmul %208, %210, %cst_93 {dimension_numbers = #tpu.dot_dimension_numbers<[1], [0], [0], [1], [0, 0, 1, 1], [], []>} : vector<1x128xf32>, vector<128x128xf32>, vector<1x128xf32> -> vector<1x128xf32>
    %212 = arith.addf %207, %211 : vector<1x128xf32>
    %213 = vector.extract_strided_slice %186 {offsets = [5, 0], sizes = [1, 128], strides = [1, 1]} : vector<16x128xf32> to vector<1x128xf32>
    %c5_94 = arith.constant 5 : index
    %c0_95 = arith.constant 0 : index
    %c0_96 = arith.constant 0 : index
    %214 = vector.load %arg8[%c5_94, %c0_95, %c0_96] : memref<9x128x128xf32, #tpu.memory_space<vmem>>, vector<1x128x128xf32>
    %215 = vector.shape_cast %214 : vector<1x128x128xf32> to vector<128x128xf32>
    %cst_97 = arith.constant dense<0.000000e+00> : vector<1x128xf32>
    %216 = tpu.matmul %213, %215, %cst_97 {dimension_numbers = #tpu.dot_dimension_numbers<[1], [0], [0], [1], [0, 0, 1, 1], [], []>} : vector<1x128xf32>, vector<128x128xf32>, vector<1x128xf32> -> vector<1x128xf32>
    %217 = arith.addf %212, %216 : vector<1x128xf32>
    %218 = vector.extract_strided_slice %186 {offsets = [6, 0], sizes = [1, 128], strides = [1, 1]} : vector<16x128xf32> to vector<1x128xf32>
    %c6_98 = arith.constant 6 : index
    %c0_99 = arith.constant 0 : index
    %c0_100 = arith.constant 0 : index
    %219 = vector.load %arg8[%c6_98, %c0_99, %c0_100] : memref<9x128x128xf32, #tpu.memory_space<vmem>>, vector<1x128x128xf32>
    %220 = vector.shape_cast %219 : vector<1x128x128xf32> to vector<128x128xf32>
    %cst_101 = arith.constant dense<0.000000e+00> : vector<1x128xf32>
    %221 = tpu.matmul %218, %220, %cst_101 {dimension_numbers = #tpu.dot_dimension_numbers<[1], [0], [0], [1], [0, 0, 1, 1], [], []>} : vector<1x128xf32>, vector<128x128xf32>, vector<1x128xf32> -> vector<1x128xf32>
    %222 = arith.addf %217, %221 : vector<1x128xf32>
    %223 = vector.extract_strided_slice %186 {offsets = [7, 0], sizes = [1, 128], strides = [1, 1]} : vector<16x128xf32> to vector<1x128xf32>
    %c7_102 = arith.constant 7 : index
    %c0_103 = arith.constant 0 : index
    %c0_104 = arith.constant 0 : index
    %224 = vector.load %arg8[%c7_102, %c0_103, %c0_104] : memref<9x128x128xf32, #tpu.memory_space<vmem>>, vector<1x128x128xf32>
    %225 = vector.shape_cast %224 : vector<1x128x128xf32> to vector<128x128xf32>
    %cst_105 = arith.constant dense<0.000000e+00> : vector<1x128xf32>
    %226 = tpu.matmul %223, %225, %cst_105 {dimension_numbers = #tpu.dot_dimension_numbers<[1], [0], [0], [1], [0, 0, 1, 1], [], []>} : vector<1x128xf32>, vector<128x128xf32>, vector<1x128xf32> -> vector<1x128xf32>
    %227 = arith.addf %222, %226 : vector<1x128xf32>
    %228 = vector.extract_strided_slice %186 {offsets = [8, 0], sizes = [1, 128], strides = [1, 1]} : vector<16x128xf32> to vector<1x128xf32>
    %c8_106 = arith.constant 8 : index
    %c0_107 = arith.constant 0 : index
    %c0_108 = arith.constant 0 : index
    %229 = vector.load %arg8[%c8_106, %c0_107, %c0_108] : memref<9x128x128xf32, #tpu.memory_space<vmem>>, vector<1x128x128xf32>
    %230 = vector.shape_cast %229 : vector<1x128x128xf32> to vector<128x128xf32>
    %cst_109 = arith.constant dense<0.000000e+00> : vector<1x128xf32>
    %231 = tpu.matmul %228, %230, %cst_109 {dimension_numbers = #tpu.dot_dimension_numbers<[1], [0], [0], [1], [0, 0, 1, 1], [], []>} : vector<1x128xf32>, vector<128x128xf32>, vector<1x128xf32> -> vector<1x128xf32>
    %232 = arith.addf %227, %231 : vector<1x128xf32>
    %c0_110 = arith.constant 0 : index
    %c0_111 = arith.constant 0 : index
    %c0_112 = arith.constant 0 : index
    %233 = vector.load %arg10[%c0_110, %c0_111, %c0_112] : memref<1x1x128xf32, #tpu.memory_space<vmem>>, vector<1x1x128xf32>
    %234 = vector.shape_cast %233 : vector<1x1x128xf32> to vector<1x128xf32>
    %235 = vector.shape_cast %232 : vector<1x128xf32> to vector<1x1x128xf32>
    tpu.vector_store %arg10[%c0_110, %c0_111, %c0_112], %235 {strides = array<i32>} : memref<1x1x128xf32, #tpu.memory_space<vmem>>, vector<1x1x128xf32>,
    return
  }
  func.func @transform_0(%arg0: i32) -> (i32, i32, i32, i32) {
    %c0_i32 = arith.constant 0 : i32
    %c0_i32_0 = arith.constant 0 : i32
    %c0_i32_1 = arith.constant 0 : i32
    %c0_i32_2 = arith.constant 0 : i32
    return %arg0, %c0_i32, %c0_i32_0, %c0_i32_1 : i32, i32, i32, i32
  }
  func.func @transform_1(%arg0: i32) -> (i32, i32) {
    %c0_i32 = arith.constant 0 : i32
    %c0_i32_0 = arith.constant 0 : i32
    %c0_i32_1 = arith.constant 0 : i32
    return %c0_i32, %c0_i32_0 : i32, i32
  }
  func.func @transform_2(%arg0: i32) -> (i32, i32) {
    %c0_i32 = arith.constant 0 : i32
    %c0_i32_0 = arith.constant 0 : i32
    %c0_i32_1 = arith.constant 0 : i32
    return %c0_i32, %c0_i32_0 : i32, i32
  }
  func.func @transform_3(%arg0: i32) -> (i32, i32, i32) {
    %c0_i32 = arith.constant 0 : i32
    %c0_i32_0 = arith.constant 0 : i32
    %c0_i32_1 = arith.constant 0 : i32
    %c0_i32_2 = arith.constant 0 : i32
    return %c0_i32, %c0_i32_0, %c0_i32_1 : i32, i32, i32
  }
  func.func @transform_4(%arg0: i32) -> (i32, i32) {
    %c0_i32 = arith.constant 0 : i32
    %c0_i32_0 = arith.constant 0 : i32
    %c0_i32_1 = arith.constant 0 : i32
    return %c0_i32, %c0_i32_0 : i32, i32
  }
  func.func @transform_5(%arg0: i32) -> (i32, i32, i32) {
    %c0_i32 = arith.constant 0 : i32
    %c0_i32_0 = arith.constant 0 : i32
    %c0_i32_1 = arith.constant 0 : i32
    %c0_i32_2 = arith.constant 0 : i32
    return %c0_i32, %c0_i32_0, %c0_i32_1 : i32, i32, i32
  }
  func.func @transform_6(%arg0: i32) -> (i32, i32) {
    %c0_i32 = arith.constant 0 : i32
    %c0_i32_0 = arith.constant 0 : i32
    %c0_i32_1 = arith.constant 0 : i32
    return %c0_i32, %c0_i32_0 : i32, i32
  }
  func.func @transform_7(%arg0: i32) -> (i32, i32, i32) {
    %c0_i32 = arith.constant 0 : i32
    %c0_i32_0 = arith.constant 0 : i32
    %c0_i32_1 = arith.constant 0 : i32
    %c0_i32_2 = arith.constant 0 : i32
    return %c0_i32, %c0_i32_0, %c0_i32_1 : i32, i32, i32
  }
  func.func @transform_8(%arg0: i32) -> (i32, i32) {
    %c0_i32 = arith.constant 0 : i32
    %c0_i32_0 = arith.constant 0 : i32
    %c0_i32_1 = arith.constant 0 : i32
    return %c0_i32, %c0_i32_0 : i32, i32
  }
  func.func @transform_9(%arg0: i32) -> (i32, i32, i32) {
    %c0_i32 = arith.constant 0 : i32
    %c0_i32_0 = arith.constant 0 : i32
    %c0_i32_1 = arith.constant 0 : i32
    return %arg0, %c0_i32, %c0_i32_0 : i32, i32, i32
  }
}

</mosaic_0001>

<bundles_post_ra>
// kernel: encoder_forward.1
= control target key start
LH: loop header
LB: loop body
LE: loop exit
PB: predicated region body
PF: predicated region fallthrough
CT: control target
= control target key end

     0   :  { %14 = vsyncpa [#allocation3], 0  ;;  %s6814_s0 = inlined_call_operand.vmem [shape: f32[2,4,144,4], index: 0, kind: input, shape index: {}]   ;;  %s6815_s1 = inlined_call_operand.vmem [shape: f32[4,32], index: 1, kind: input, shape index: {}]   ;;  %s6816_s2 = inlined_call_operand.vmem [shape: f32[1,32], index: 2, kind: input, shape index: {}]   ;;  %s6817_s3 = inlined_call_operand.vmem [shape: f32[4,32,64], index: 3, kind: input, shape index: {}]   ;;  %s6818_s4 = inlined_call_operand.vmem [shape: f32[1,64], index: 4, kind: input, shape index: {}]   ;;  %s6819_s5 = inlined_call_operand.vmem [shape: f32[9,64,128], index: 5, kind: input, shape index: {}]   ;;  %s6820_s6 = inlined_call_operand.vmem [shape: f32[1,128], index: 6, kind: input, shape index: {}]   ;;  %s6821_s7 = inlined_call_operand.vmem [shape: f32[9,128,128], index: 7, kind: input, shape index: {}]   ;;  %s6822_s8 = inlined_call_operand.vmem [shape: f32[1,128], index: 8, kind: input, shape index: {}]   ;;  %s6823_s9 = inlined_call_operand.hbm [shape: f32[2,1,128], index: 9, kind: output, shape index: {}]  }
   0x1   :  { %16 = vsyncpa [#allocation3 + $0x1], 0  ;;  %s4312_s30 = smov 0   ;;  %s4314_s10 = smov 0  }
   0x2   :  { %s4316_s11 = smov 0   ;;  %s4318_s12 = smov 0  }
   0x3 LB: > { %s4333_s13 = sadd.s32 4294967295, %s4256_s12   ;;  %s3672_s14 = sadd.s32 4294967294, %s4256_s12   ;;  %s4256_s12 = sphi %s4318_s12, %s7084_s12   ;;  %s4252_s11 = sphi %s4316_s11, %s7083_s11   ;;  %s4248_s10 = sphi %s4314_s10, %s7082_s10   ;;  %s4244_s30 = sphi %s4312_s30, %s7081_s30  }
   0x4   : > { %s4337_s15 = sadd.s32 1, %s4256_s12   ;;  %s223_s16 = sadd.s32 1, %s4252_s11 }
   0x5   : > { %s220_s17 = ssub.s32 %s4256_s12, %s4337_s15  ;;  %p233_p0 = scmp.ne.s32.totalorder %s4252_s11, %s4248_s10 }
   0x6   : > { %p221_p1 = scmp.eq.s32.totalorder %s220_s17, 0  ;;  %p234_p2 = scmp.eq.s32.totalorder %s4333_s13, 1 }
   0x7   : > { %p239_p3 = scmp.ne.s32.totalorder %s4248_s10, %s4244_s30  ;;  %p240_p4 = scmp.eq.s32.totalorder %s3672_s14, 1 }
   0x8   : > { %s4348_s18 = scalar_select %p221_p1, %s4252_s11, %s223_s16  }
   0x9   : > { %p4350_p5 = por %p234_p2, %p233_p0  ;;  %p4354_p6 = por %p240_p4, %p239_p3 }
   0xa   : > { %p3675_p7 = scmp.ge.s32.totalorder %s4256_s12, 1  ;;  %p290_p8 = scmp.lt.s32.totalorder %s4256_s12, 3 }
   0xc   : > { %p291_p9 = pnand %p3675_p7, %p290_p8 }
   0xe   : > { %294 = sbr.rel (%p291_p9) target bundleno = 1442 (0x5a2), region = 56 }
  0x13   : > { %p325_p10 = scmp.lt.s32.totalorder %s4333_s13, 1  ;;  %v6826_v0 = vmov 2   ;;  %v6830_v1 = vmov 0   ;;  %v6828_v17 = vmov 1   ;;  %v6824_v33 = vmov 3   ;;  %s323_s17 = sand.u32 1, %s4248_s10  }
  0x14   : > { %4081 = vset.pattern.permute.xlu0 %v6826_v0  ;;  %4076 = vset.pattern.permute.xlu2 %v6830_v1  ;;  %vm1323_vm0 = vcmask 261120   ;;  %vm2900_vm1 = vcmask 523264   ;;  %s324_s23 = scalar_lea.vmem [#allocation2], %s323_s17  ;;  %s3605_s27 = scalar_lea.sflag [#allocation3], %s323_s17 }
  0x15   : > { %4075 = vset.pattern.permute.xlu1 %v6830_v1  ;;  %s326_s21 = scalar_select %p325_p10, %s4333_s13, 1 }
  0x16   : > { %s3615_s24 = sshll.u32 %s324_s23, 4  ;;  %s4214_s16 = scalar_lea.hbm %s6823_s9, 2  ;;  %s3616_s24 = int_to_ptr.vmem [resolvable:$true] %s3615_s24 }
  0x17   : > { %s4031_s22 = smul.u32 576, %s326_s21 }
  0x19   : > { %s4368_s25 = scalar_lea.vmem %s6814_s0, %s4031_s22  ;;  %s3613_s22 = scalar_lea.hbm %s6823_s9, %s4333_s13 }
  0x1a   : > { %v4371_v2 = vld [vmem:[%s4368_s25 + $0x20] sm:$0xff]  ;;  %v4374_v3 = vld [vmem:[%s4368_s25 + $0x10] sm:$0xff]  ;;  %v4380_v4 = vld [vmem:[%s4368_s25 + $0x28] sm:$0xff]  ;;  %s3617_s26 = sshll.u32 %s3613_s22, 4  ;;  %s3618_s26 = int_to_ptr.hbm [resolvable:$true] %s3617_s26 }
  0x1b   : > { %374 = vperm.xlu2 %4076, %v4371_v2   ;;  %579 = vperm.xlu0 %4081, %v4374_v3   ;;  %v4383_v5 = vld [vmem:[%s4368_s25 + $0x38] sm:$0xff]  ;;  %v4392_v7 = vld [vmem:[%s4368_s25 + $0x40] sm:$0xff]  ;;  %v4395_v8 = vld [vmem:[%s4368_s25 + $0x50] sm:$0xff]  ;;  %s4208_s28 = sshra.s32 %s3618_s26, 4  ;;  %s4209_s28 = int_to_ptr.hbm [resolvable:$true] %s4208_s28 }
  0x1c   : > { %364 = vperm.xlu1 %4075, %v4374_v3   ;;  %v4386_v6 = vld [vmem:[%s4368_s25 + $0x18] sm:$0xff]  ;;  %v4404_v10 = vld [vmem:[%s4368_s25 + $0x68] sm:$0xff]  ;;  %v4410_v11 = vld [vmem:[%s4368_s25 + $0x70] sm:$0xff]  ;;  %s4210_s29 = scalar_lea.hbm %s4209_s28, 1  ;;  %p4215_p0 = scmp.lt.s32.totalorder %s4209_s28, %s6823_s9 }
  0x1d   : > { %v4401_v9 = vld [vmem:[%s4368_s25 + $0x58] sm:$0xff]  ;;  %v4413_v12 = vld [vmem:[%s4368_s25 + $0x80] sm:$0xff]  ;;  %v4419_v13 = vld [vmem:[%s4368_s25 + $0x88] sm:$0xff]  ;;  %p4211_p11 = scmp.ne.s32.totalorder %s4209_s28, %s4210_s29  ;;  %p4216_p1 = scmp.lt.s32.totalorder %s4214_s16, %s4210_s29 }
  0x1e   : > { %v4422_v14 = vld [vmem:[%s4368_s25 + $0x98] sm:$0xff]  ;;  %v4428_v15 = vld [vmem:[%s4368_s25 + $0xc0] sm:$0xff]  ;;  %v4431_v16 = vld [vmem:[%s4368_s25 + $0x8] sm:$0xff] }
  0x1f   : > { %v4439_v18 = vld [vmem:[%s4368_s25 + $0xd8] sm:$0xff]  ;;  %v4445_v19 = vld [vmem:[%s4368_s25 + $0xf0] sm:$0xff]  ;;  %v4454_v21 = vld [vmem:[%s4368_s25 + $0x108] sm:$0xff]  ;;  %p4212_p12 = pnand %p4211_p11, %p4350_p5  ;;  %p4217_p2 = por %p4216_p1, %p4215_p0 }
  0x20   : > { %v4448_v20 = vld [vmem:[%s4368_s25 + $0x30] sm:$0xff]  ;;  %v4457_v22 = vld [vmem:[%s4368_s25 + $0x48] sm:$0xff]  ;;  %v4463_v23 = vld [vmem:[%s4368_s25 + $0x120] sm:$0xff] }
  0x21   : > { %v4466_v24 = vld [vmem:[%s4368_s25 + $0x60] sm:$0xff]  ;;  %v4472_v25 = vld [vmem:[%s4368_s25 + $0x148] sm:$0xff]  ;;  %v4475_v26 = vld [vmem:[%s4368_s25 + $0x78] sm:$0xff]  ;;  %p4213_p13 = pneg %p4212_p12 }
  0x22   : > { %v4483_v28 = vld [vmem:[%s4368_s25 + $0x1d8] sm:$0xff]  ;;  %v4487_v29 = vld [vmem:[%s4368_s25] sm:$0xff]  ;;  %v4548_v49 = vld [vmem:[%s4368_s25 + $0x90] sm:$0xff] }
  0x23   : > { %379 = vperm.xlu2 %4076, %v4380_v4   ;;  %599 = vperm.xlu0 %4081, %v4383_v5   ;;  %6841 = vst [vmem:[#allocation6_spill] sm:$0xff] %v4483_v28  ;;  %v3781_v31 = vld [vmem:[%s4368_s25 + $0x1e0] sm:$0xff]  ;;  %v4561_v53 = vld [vmem:[%s4368_s25 + $0xb8] sm:$0xff]  ;;  %v4573_v57 = vld [vmem:[%s4368_s25 + $0xd0] sm:$0xff]  ;;  %p4218_p3 = pnand %p4217_p2, %p4213_p13 }
  0x24   : > { %369 = vperm.xlu1 %4075, %v4386_v6   ;;  %v4585_v61 = vld [vmem:[%s4368_s25 + $0xe8] sm:$0xff]  ;;  %v4625_v1 = vld [vmem:[%s4368_s25 + $0xa0] sm:$0xff] }
  0x2b   : > { %394 = vperm.xlu2 %4076, %v4392_v7   ;;  %611 = vperm.xlu0 %4081, %v4395_v8  }
  0x2c   : > { %389 = vperm.xlu1 %4075, %v4383_v5  }
  0x33   : > { %409 = vperm.xlu2 %4076, %v4401_v9   ;;  %623 = vperm.xlu0 %4081, %v4404_v10  }
  0x34   : > { %404 = vperm.xlu1 %4075, %v4395_v8  }
  0x3b   : > { %424 = vperm.xlu2 %4076, %v4410_v11   ;;  %635 = vperm.xlu0 %4081, %v4413_v12  }
  0x3c   : > { %419 = vperm.xlu1 %4075, %v4404_v10  }
  0x43   : > { %439 = vperm.xlu2 %4076, %v4419_v13   ;;  %1071 = vperm.xlu0 %4081, %v4422_v14  }
  0x44   : > { %434 = vperm.xlu1 %4075, %v4413_v12  }
  0x4b   : > { %4078 = vset.pattern.permute.xlu2 %v6828_v17  ;;  %1091 = vperm.xlu0 %4081, %v4428_v15  }
  0x4c   : > { %4077 = vset.pattern.permute.xlu1 %v6828_v17  ;;  %470 = vperm.xlu2 %4078, %v4374_v3  }
  0x4d   : > { %466 = vperm.xlu1 %4077, %v4431_v16  }
  0x53   : > { %1103 = vperm.xlu0 %4081, %v4439_v18  }
  0x54   : > { %478 = vperm.xlu2 %4078, %v4371_v2  }
  0x55   : > { %474 = vperm.xlu1 %4077, %v4386_v6  }
  0x5b   : > { %1115 = vperm.xlu0 %4081, %v4445_v19  }
  0x5c   : > { %490 = vperm.xlu2 %4078, %v4383_v5  }
  0x5d   : > { %486 = vperm.xlu1 %4077, %v4448_v20  }
  0x63   : > { %1127 = vperm.xlu0 %4081, %v4454_v21  }
  0x64   : > { %502 = vperm.xlu2 %4078, %v4395_v8  }
  0x65   : > { %498 = vperm.xlu1 %4077, %v4457_v22  }
  0x6b   : > { %1810 = vperm.xlu0 %4081, %v4463_v23  }
  0x6c   : > { %514 = vperm.xlu2 %4078, %v4404_v10  }
  0x6d   : > { %510 = vperm.xlu1 %4077, %v4466_v24  }
  0x73   : > { %1830 = vperm.xlu0 %4081, %v4472_v25  }
  0x74   : > { %526 = vperm.xlu2 %4078, %v4413_v12  }
  0x75   : > { %522 = vperm.xlu1 %4077, %v4475_v26   ;;  %v4480_v27 = vpop.permute.xlu2 %374 }
  0x76   : > { %6840 = vst [vmem:[#allocation5_spill] sm:$0xff] %v4480_v27 }
  0x7b   : > { %2465 = vperm.xlu0 %4081, %v4483_v28  }
  0x7c   : > { %4080 = vset.pattern.permute.xlu2 %v6826_v0 }
  0x7d   : > { %4079 = vset.pattern.permute.xlu1 %v6826_v0  ;;  %v4491_v30 = vpop.permute.xlu2 %379  ;;  %575 = vperm.xlu2 %4080, %v4431_v16  }
  0x7e   : > { %6842 = vst [vmem:[#allocation7_spill] sm:$0xff] %v4491_v30  ;;  %571 = vperm.xlu1 %4079, %v4487_v29  }
  0x83   : > { %2469 = vperm.xlu0 %4081, %v3781_v31  }
  0x85   : > { %v4496_v32 = vpop.permute.xlu2 %394  ;;  %587 = vperm.xlu2 %4080, %v4371_v2  }
  0x86   : > { %6843 = vst [vmem:[#allocation8_spill] sm:$0xff] %v4496_v32  ;;  %583 = vperm.xlu1 %4079, %v4386_v6  }
  0x8b   : > { %4118 = vset.pattern.permute.xlu0 %v6824_v33 }
  0x8c   : > { %684 = vperm.xlu0 %4118, %v4431_v16  }
  0x8d   : > { %v4502_v34 = vpop.permute.xlu2 %409  ;;  %595 = vperm.xlu2 %4080, %v4448_v20   ;;  %v4505_v35 = vpop.permute.xlu0 %579 }
  0x8e   : > { %6844 = vst [vmem:[#allocation9_spill] sm:$0xff] %v4502_v34  ;;  %v4507_v36 = vpop.permute.xlu1 %364  ;;  %591 = vperm.xlu1 %4079, %v4380_v4  }
  0x94   : > { %704 = vperm.xlu0 %4118, %v4448_v20  }
  0x95   : > { %v4511_v37 = vpop.permute.xlu2 %424  ;;  %607 = vperm.xlu2 %4080, %v4457_v22   ;;  %v4514_v38 = vpop.permute.xlu0 %599 }
  0x96   : > { %6845 = vst [vmem:[#allocation10_spill] sm:$0xff] %v4511_v37  ;;  %v4516_v39 = vpop.permute.xlu1 %369  ;;  %603 = vperm.xlu1 %4079, %v4392_v7  }
  0x97   : > { %6846 = vst [vmem:[#allocation11_spill] sm:$0xff] %v4514_v38 }
  0x9c   : > { %716 = vperm.xlu0 %4118, %v4457_v22  }
  0x9d   : > { %v4520_v40 = vpop.permute.xlu2 %439  ;;  %619 = vperm.xlu2 %4080, %v4466_v24   ;;  %v4523_v41 = vpop.permute.xlu0 %611 }
  0x9e   : > { %6847 = vst [vmem:[#allocation12_spill] sm:$0xff] %v4523_v41  ;;  %v4525_v42 = vpop.permute.xlu1 %389  ;;  %615 = vperm.xlu1 %4079, %v4401_v9   ;;  %v3783_v41 = vld [vmem:[%s4368_s25 + $0x1f0] sm:$0xff] }
  0x9f   : > { %6848 = vst [vmem:[#allocation13_spill] sm:$0xff] %v4525_v42 }
  0xa4   : > { %728 = vperm.xlu0 %4118, %v4466_v24  }
  0xa5   : > { %631 = vperm.xlu2 %4080, %v4475_v26   ;;  %v4530_v43 = vpop.permute.xlu0 %623 }
  0xa6   : > { %6849 = vst [vmem:[#allocation14_spill] sm:$0xff] %v4530_v43  ;;  %v4532_v44 = vpop.permute.xlu1 %404  ;;  %627 = vperm.xlu1 %4079, %v4410_v11   ;;  %v4535_v45 = vpop.permute.xlu2 %470  ;;  %v4656_v43 = vld [vmem:[%s4368_s25 + $0x138] sm:$0xff] }
  0xa7   : > { %6850 = vst [vmem:[#allocation15_spill] sm:$0xff] %v4532_v44  ;;  %v4672_v44 = vld [vmem:[%s4368_s25 + $0xe0] sm:$0xff] }
  0xac   : > { %740 = vperm.xlu0 %4118, %v4475_v26  }
  0xad   : > { %4082 = vset.pattern.permute.xlu2 %v6824_v33  ;;  %v4539_v46 = vpop.permute.xlu0 %635 }
  0xae   : > { %v4541_v47 = vpop.permute.xlu1 %419  ;;  %639 = vperm.xlu1 %4079, %v4419_v13   ;;  %v4544_v48 = vpop.permute.xlu2 %478  ;;  %680 = vperm.xlu2 %4082, %v4487_v29  }
  0xaf   : > { %6851 = vst [vmem:[#allocation16_spill] sm:$0xff] %v4541_v47 }
  0xb0   : > { %6852 = vst [vmem:[#allocation17_spill] sm:$0xff] %v4544_v48 }
  0xb4   : > { %1175 = vperm.xlu0 %4118, %v4548_v49  }
  0xb5   : > { %v4551_v50 = vpop.permute.xlu0 %1071 }
  0xb6   : > { %6853 = vst [vmem:[#allocation18_spill] sm:$0xff] %v4551_v50  ;;  %v4553_v51 = vpop.permute.xlu1 %434  ;;  %4083 = vset.pattern.permute.xlu1 %v6824_v33  ;;  %v4556_v52 = vpop.permute.xlu2 %490  ;;  %692 = vperm.xlu2 %4082, %v4386_v6   ;;  %v4609_v33 = vld [vmem:[%s4368_s25 + $0x118] sm:$0xff]  ;;  %v4699_v50 = vld [vmem:[%s4368_s25 + $0x110] sm:$0xff] }
  0xb7   : > { %6854 = vst [vmem:[#allocation19_spill] sm:$0xff] %v4556_v52  ;;  %688 = vperm.xlu1 %4083, %v4374_v3   ;;  %v4597_v3 = vld [vmem:[%s4368_s25 + $0x100] sm:$0xff] }
  0xbc   : > { %1195 = vperm.xlu0 %4118, %v4561_v53  }
  0xbd   : > { %v4564_v54 = vpop.permute.xlu0 %1091 }
  0xbe   : > { %6855 = vst [vmem:[#allocation20_spill] sm:$0xff] %v4564_v54  ;;  %v4566_v55 = vpop.permute.xlu2 %502  ;;  %700 = vperm.xlu2 %4082, %v4380_v4   ;;  %v4660_v54 = vld [vmem:[%s4368_s25 + $0xc8] sm:$0xff] }
  0xbf   : > { %6856 = vst [vmem:[#allocation21_spill] sm:$0xff] %v4566_v55  ;;  %v4569_v56 = vpop.permute.xlu1 %466  ;;  %696 = vperm.xlu1 %4083, %v4371_v2  }
  0xc4   : > { %1207 = vperm.xlu0 %4118, %v4573_v57  }
  0xc5   : > { %v4576_v58 = vpop.permute.xlu0 %1103 }
  0xc6   : > { %6857 = vst [vmem:[#allocation22_spill] sm:$0xff] %v4576_v58  ;;  %v4578_v59 = vpop.permute.xlu2 %514  ;;  %712 = vperm.xlu2 %4082, %v4392_v7   ;;  %v4638_v58 = vld [vmem:[%s4368_s25 + $0x1c0] sm:$0xff] }
  0xc7   : > { %6858 = vst [vmem:[#allocation23_spill] sm:$0xff] %v4578_v59  ;;  %v4581_v60 = vpop.permute.xlu1 %474  ;;  %708 = vperm.xlu1 %4083, %v4383_v5  }
  0xc8   : > { %6870 = vst [vmem:[#allocation34_spill] sm:$0xff] %v4638_v58 }
  0xcc   : > { %1219 = vperm.xlu0 %4118, %v4585_v61  }
  0xcd   : > { %v4588_v62 = vpop.permute.xlu0 %1115 }
  0xce   : > { %6859 = vst [vmem:[#allocation24_spill] sm:$0xff] %v4588_v62  ;;  %v4590_v63 = vpop.permute.xlu2 %526  ;;  %724 = vperm.xlu2 %4082, %v4401_v9   ;;  %v6867_v62 = vmov 0  }
  0xcf   : > { %v4593_v2 = vpop.permute.xlu1 %486  ;;  %720 = vperm.xlu1 %4083, %v4395_v8  }
  0xd0   : > { %6860 = vst [vmem:[#allocation25_spill] sm:$0xff] %v4593_v2  ;;  %v6898_v2 = vmov 2  }
  0xd4   : > { %1231 = vperm.xlu0 %4118, %v4597_v3  }
  0xd5   : > { %v4600_v5 = vpop.permute.xlu0 %1127 }
  0xd6   : > { %6861 = vst [vmem:[#allocation26_spill] sm:$0xff] %v4600_v5  ;;  %736 = vperm.xlu2 %4082, %v4410_v11  }
  0xd7   : > { %v4603_v6 = vpop.permute.xlu1 %498  ;;  %732 = vperm.xlu1 %4083, %v4404_v10   ;;  %v4606_v31 = vpop.permute.xlu2 %575  ;;  %v4621_v10 = vld [vmem:[%s4368_s25 + $0x1b8] sm:$0xff] }
  0xd8   : > { %6862 = vst [vmem:[#allocation27_spill] sm:$0xff] %v4603_v6  ;;  %v4687_v6 = vld [vmem:[%s4368_s25 + $0xf8] sm:$0xff] }
  0xdc   : > { %1243 = vperm.xlu0 %4118, %v4609_v33  }
  0xdd   : > { %v4612_v8 = vpop.permute.xlu0 %1810 }
  0xde   : > { %6863 = vst [vmem:[#allocation28_spill] sm:$0xff] %v4612_v8  ;;  %748 = vperm.xlu2 %4082, %v4419_v13  }
  0xdf   : > { %v4615_v0 = vpop.permute.xlu1 %510  ;;  %744 = vperm.xlu1 %4083, %v4413_v12   ;;  %v4618_v17 = vpop.permute.xlu2 %587 }
  0xe0   : > { %6864 = vst [vmem:[#allocation29_spill] sm:$0xff] %v4615_v0 }
  0xe1   : > { %6865 = vst [vmem:[#allocation30_spill] sm:$0xff] %v4618_v17 }
  0xe4   : > { %2557 = vperm.xlu0 %4118, %v4621_v10  }
  0xe5   : > { %v4627_v5 = vpop.permute.xlu0 %1830 }
  0xe6   : > { %6866 = vst [vmem:[#allocation31_spill] sm:$0xff] %v4627_v5  ;;  %4085 = vset.pattern.permute.xlu2 %v6867_v62  ;;  %v4642_v5 = vld [vmem:[%s4368_s25 + $0xb0] sm:$0xff] }
  0xe7   : > { %v4630_v8 = vpop.permute.xlu1 %522  ;;  %4084 = vset.pattern.permute.xlu1 %v6867_v62  ;;  %v4633_v12 = vpop.permute.xlu2 %595  ;;  %862 = vperm.xlu2 %4085, %v4625_v1  }
  0xe8   : > { %6868 = vst [vmem:[#allocation32_spill] sm:$0xff] %v4630_v8  ;;  %857 = vperm.xlu1 %4084, %v4422_v14   ;;  %v4647_v8 = vld [vmem:[%s4368_s25 + $0xa8] sm:$0xff] }
  0xe9   : > { %6869 = vst [vmem:[#allocation33_spill] sm:$0xff] %v4633_v12 }
  0xec   : > { %2561 = vperm.xlu0 %4118, %v4638_v58   ;;  %v6879_v58 = vmov 1  }
  0xed   : > { %v4644_v37 = vpop.permute.xlu0 %2465 }
  0xee   : > { %6871 = vst [vmem:[#allocation35_spill] sm:$0xff] %v4644_v37 }
  0xef   : > { %v4649_v47 = vpop.permute.xlu2 %607  ;;  %872 = vperm.xlu2 %4085, %v4642_v5  }
  0xf0   : > { %6872 = vst [vmem:[#allocation36_spill] sm:$0xff] %v4649_v47  ;;  %867 = vperm.xlu1 %4084, %v4647_v8   ;;  %v4653_v59 = vpop.permute.xlu1 %571 }
  0xf4   : > { %1930 = vperm.xlu0 %4118, %v4656_v43  }
  0xf5   : > { %v4662_v37 = vpop.permute.xlu0 %2469 }
  0xf6   : > { %6873 = vst [vmem:[#allocation37_spill] sm:$0xff] %v4662_v37 }
  0xf7   : > { %v4664_v0 = vpop.permute.xlu2 %619  ;;  %887 = vperm.xlu2 %4085, %v4660_v54  }
  0xf8   : > { %6874 = vst [vmem:[#allocation38_spill] sm:$0xff] %v4664_v0  ;;  %882 = vperm.xlu1 %4084, %v4428_v15   ;;  %v4668_v34 = vpop.permute.xlu1 %583  ;;  %v4683_v0 = vld [vmem:[%s4368_s25 + $0x170] sm:$0xff] }
  0xfc   : > { %2585 = vperm.xlu0 %4118, %v3783_v41  }
  0xfe   : > { %v4674_v55 = vpop.permute.xlu0 %684 }
  0xff   : > { %v4676_v47 = vpop.permute.xlu2 %631  ;;  %902 = vperm.xlu2 %4085, %v4672_v44  }
 0x100   : > { %6875 = vst [vmem:[#allocation39_spill] sm:$0xff] %v4676_v47  ;;  %897 = vperm.xlu1 %4084, %v4439_v18   ;;  %v4680_v37 = vpop.permute.xlu1 %591 }
 0x101   : > { %6876 = vst [vmem:[#allocation40_spill] sm:$0xff] %v4680_v37 }
 0x104   : > { %1958 = vperm.xlu0 %4118, %v4683_v0  }
 0x106   : > { %v4689_v41 = vpop.permute.xlu0 %704 }
 0x107   : > { %6877 = vst [vmem:[#allocation41_spill] sm:$0xff] %v4689_v41  ;;  %917 = vperm.xlu2 %4085, %v4687_v6  }
 0x108   : > { %912 = vperm.xlu1 %4084, %v4445_v19   ;;  %v4693_v32 = vpop.permute.xlu1 %603  ;;  %v4695_v47 = vpop.permute.xlu2 %680 }
 0x109   : > { %6878 = vst [vmem:[#allocation42_spill] sm:$0xff] %v4693_v32 }
 0x10c   : > { %4136 = vset.pattern.permute.xlu0 %v6879_v58 }
 0x10d   : > { %462 = vperm.xlu0 %4136, %v4487_v29  }
 0x10e   : > { %v4702_v38 = vpop.permute.xlu0 %716 }
 0x10f   : > { %6880 = vst [vmem:[#allocation43_spill] sm:$0xff] %v4702_v38  ;;  %932 = vperm.xlu2 %4085, %v4699_v50  }
 0x110   : > { %927 = vperm.xlu1 %4084, %v4454_v21   ;;  %v4706_v42 = vpop.permute.xlu1 %615  ;;  %v4708_v41 = vpop.permute.xlu2 %692 }
 0x111   : > { %6881 = vst [vmem:[#allocation44_spill] sm:$0xff] %v4706_v42 }
 0x115   : > { %482 = vperm.xlu0 %4136, %v4380_v4  }
 0x116   : > { %v4711_v32 = vpop.permute.xlu0 %728 }
 0x117   : > { %6882 = vst [vmem:[#allocation45_spill] sm:$0xff] %v4711_v32  ;;  %4087 = vset.pattern.permute.xlu2 %v6879_v58 }
 0x118   : > { %4086 = vset.pattern.permute.xlu1 %v6879_v58  ;;  %v4715_v52 = vpop.permute.xlu1 %627  ;;  %963 = vperm.xlu2 %4087, %v4422_v14   ;;  %v4718_v38 = vpop.permute.xlu2 %700 }
 0x119   : > { %6883 = vst [vmem:[#allocation46_spill] sm:$0xff] %v4715_v52  ;;  %959 = vperm.xlu1 %4086, %v4548_v49  }
 0x11a   : > { %6884 = vst [vmem:[#allocation47_spill] sm:$0xff] %v4718_v38 }
 0x11d   : > { %494 = vperm.xlu0 %4136, %v4392_v7  }
 0x11e   : > { %v4722_v42 = vpop.permute.xlu0 %740 }
 0x11f   : > { %6885 = vst [vmem:[#allocation48_spill] sm:$0xff] %v4722_v42 }
 0x120   : > { %v4724_v12 = vpop.permute.xlu1 %639  ;;  %975 = vperm.xlu2 %4087, %v4642_v5   ;;  %v4727_v4 = vpop.permute.xlu2 %712 }
 0x121   : > { %6886 = vst [vmem:[#allocation49_spill] sm:$0xff] %v4727_v4  ;;  %971 = vperm.xlu1 %4086, %v4647_v8  }
 0x125   : > { %506 = vperm.xlu0 %4136, %v4401_v9  }
 0x126   : > { %v4731_v52 = vpop.permute.xlu0 %1175 }
 0x127   : > { %6887 = vst [vmem:[#allocation50_spill] sm:$0xff] %v4731_v52  ;;  %v827_v52 = vld [vmem:[%s6817_s3] sm:$0xff] }
 0x128   : > { %983 = vperm.xlu2 %4087, %v4428_v15   ;;  %v4734_v32 = vpop.permute.xlu2 %724 }
 0x129   : > { %6888 = vst [vmem:[#allocation51_spill] sm:$0xff] %v4734_v32  ;;  %979 = vperm.xlu1 %4086, %v4561_v53   ;;  %v4737_v7 = vpop.permute.xlu1 %688  ;;  %v830_v32 = vld [vmem:[%s6817_s3 + $0x18] sm:$0xff] }
 0x12a   : > { %4027 = vmatpush.msra.mxu2 %v830_v32  ;;  %1515 = vmatpush.msra.mxu1 %v830_v32 }
 0x12d   : > { %518 = vperm.xlu0 %4136, %v4410_v11   ;;  %v829_v11 = vld [vmem:[%s6817_s3 + $0x10] sm:$0xff] }
 0x12e   : > { %v4740_v42 = vpop.permute.xlu0 %1195  ;;  %4028 = vmatpush.msra.mxu2 %v829_v11  ;;  %1516 = vmatpush.msra.mxu1 %v829_v11 }
 0x12f   : > { %6889 = vst [vmem:[#allocation52_spill] sm:$0xff] %v4740_v42 }
 0x130   : > { %995 = vperm.xlu2 %4087, %v4439_v18   ;;  %v4743_v4 = vpop.permute.xlu2 %736 }
 0x131   : > { %6890 = vst [vmem:[#allocation53_spill] sm:$0xff] %v4743_v4  ;;  %991 = vperm.xlu1 %4086, %v4573_v57   ;;  %v4746_v9 = vpop.permute.xlu1 %696  ;;  %v828_v4 = vld [vmem:[%s6817_s3 + $0x8] sm:$0xff] }
 0x132   : > { %6891 = vst [vmem:[#allocation54_spill] sm:$0xff] %v4746_v9  ;;  %4029 = vmatpush.msra.mxu2 %v828_v4  ;;  %1517 = vmatpush.msra.mxu1 %v828_v4 }
 0x134   : > { %4030 = vmatpush.msra.mxu2 %v827_v52  ;;  %1518 = vmatpush.msra.mxu1 %v827_v52  ;;  %v330_v52 = vld [vmem:[%s6815_s1] sm:$0xf] }
 0x135   : > { %530 = vperm.xlu0 %4136, %v4419_v13   ;;  %v4797_v37 = vperm.slane %v330_v52, 2  ;;  %v4806_v17 = vperm.slane %v330_v52, 3 }
 0x136   : > { %v4758_v42 = vpop.permute.xlu0 %1207 }
 0x137   : > { %6892 = vst [vmem:[#allocation55_spill] sm:$0xff] %v4758_v42  ;;  %v659_v9 = vmul.f32 %v4797_v37, %v4539_v46 }
 0x138   : > { %1007 = vperm.xlu2 %4087, %v4445_v19   ;;  %v4764_v32 = vpop.permute.xlu2 %748 }
 0x139   : > { %1003 = vperm.xlu1 %4086, %v4585_v61   ;;  %v4767_v13 = vpop.permute.xlu1 %708 }
 0x13a   : > { %6893 = vst [vmem:[#allocation56_spill] sm:$0xff] %v4767_v13  ;;  %v4784_v13 = vperm.slane %v330_v52, 1 }
 0x13d   : > { %967 = vperm.xlu0 %4136, %v4625_v1  }
 0x13e   : > { %v4770_v42 = vpop.permute.xlu0 %1219 }
 0x13f   : > { %6894 = vst [vmem:[#allocation57_spill] sm:$0xff] %v4770_v42 }
 0x140   : > { %1019 = vperm.xlu2 %4087, %v4454_v21  }
 0x141   : > { %1015 = vperm.xlu1 %4086, %v4597_v3   ;;  %v4774_v11 = vpop.permute.xlu1 %720  ;;  %v4776_v38 = vpop.permute.xlu2 %862 }
 0x142   : > { %6895 = vst [vmem:[#allocation58_spill] sm:$0xff] %v4774_v11 }
 0x143   : > { %6896 = vst [vmem:[#allocation59_spill] sm:$0xff] %v4776_v38  ;;  %v4793_v38 = vperm.slane %v330_v52, 0 }
 0x145   : > { %987 = vperm.xlu0 %4136, %v4660_v54   ;;  %v459_v30 = vmul.f32 %v4793_v38, %v4553_v51 }
 0x146   : > { %v4779_v4 = vpop.permute.xlu0 %1231 }
 0x147   : > { %6897 = vst [vmem:[#allocation60_spill] sm:$0xff] %v4779_v4  ;;  %v550_v4 = vmul.f32 %v4784_v13, %v4590_v63 }
 0x148   : > { %4088 = vset.pattern.permute.xlu2 %v6898_v2 }
 0x149   : > { %1027 = vperm.xlu1 %4086, %v4609_v33   ;;  %v4788_v42 = vpop.permute.xlu1 %732  ;;  %1067 = vperm.xlu2 %4088, %v4548_v49   ;;  %v4791_v11 = vpop.permute.xlu2 %872 }
 0x14a   : > { %6899 = vst [vmem:[#allocation61_spill] sm:$0xff] %v4788_v42  ;;  %v568_v42 = vadd.f32 %v550_v4, %v459_v30  ;;  %v4817_v30 = vld [vmem:[%s6816_s2] ss:$0 sm:$0xff] }
 0x14b   : > { %6900 = vst [vmem:[#allocation62_spill] sm:$0xff] %v4791_v11 }
 0x14c   : > { %v677_v27 = vadd.f32 %v659_v9, %v568_v42 }
 0x14d   : > { %999 = vperm.xlu0 %4136, %v4672_v44  }
 0x14e   : > { %v4804_v28 = vpop.permute.xlu0 %1243 }
 0x14f   : > { %6901 = vst [vmem:[#allocation63_spill] sm:$0xff] %v4804_v28 }
 0x151   : > { %4089 = vset.pattern.permute.xlu1 %v6898_v2  ;;  %v745_v11 = vpop.permute.xlu1 %744  ;;  %1079 = vperm.xlu2 %4088, %v4647_v8   ;;  %v4810_v63 = vpop.permute.xlu2 %887 }
 0x152   : > { %6902 = vst [vmem:[#allocation64_spill] sm:$0xff] %v4810_v63  ;;  %v768_v51 = vmul.f32 %v4806_v17, %v745_v11  ;;  %1075 = vperm.xlu1 %4089, %v4625_v1  }
 0x154   : > { %v786_v48 = vadd.f32 %v768_v51, %v677_v27  ;;  %v4840_v51 = vld [vmem:[%s4368_s25 + $0x128] sm:$0xff] }
 0x155   : > { %1011 = vperm.xlu0 %4136, %v4687_v6  }
 0x156   : > { %v4820_v46 = vpop.permute.xlu0 %2557  ;;  %v807_v4 = vadd.f32 %v4817_v30, %v786_v48 }
 0x157   : > { %6903 = vst [vmem:[#allocation65_spill] sm:$0xff] %v4820_v46 }
 0x158   : > { %v825_v52 = vmax.f32 %v807_v4, 0.0 }
 0x159   : > { %1087 = vperm.xlu2 %4088, %v4561_v53   ;;  %v4824_v42 = vpop.permute.xlu2 %902 }
 0x15a   : > { %6904 = vst [vmem:[#allocation66_spill] sm:$0xff] %v4824_v42  ;;  %1083 = vperm.xlu1 %4089, %v4642_v5   ;;  %3733 = vmatmul.msk.f32.vlgmr.msra.gmra.mxu2 %vm1323_vm0, %v825_v52  ;;  %v4828_v27 = vpop.permute.xlu1 %857 }
 0x15b   : > { %6905 = vst [vmem:[#allocation67_spill] sm:$0xff] %v4828_v27 }
 0x15d   : > { %1023 = vperm.xlu0 %4136, %v4699_v50  }
 0x15e   : > { %v4831_v9 = vpop.permute.xlu0 %2561 }
 0x15f   : > { %6906 = vst [vmem:[#allocation68_spill] sm:$0xff] %v4831_v9  ;;  %v4852_v9 = vld [vmem:[%s4368_s25 + $0x150] sm:$0xff] }
 0x161   : > { %1099 = vperm.xlu2 %4088, %v4573_v57   ;;  %v4834_v48 = vpop.permute.xlu2 %917 }
 0x162   : > { %6907 = vst [vmem:[#allocation69_spill] sm:$0xff] %v4834_v48  ;;  %1095 = vperm.xlu1 %4089, %v4660_v54   ;;  %v4837_v11 = vpop.permute.xlu1 %867 }
 0x163   : > { %6908 = vst [vmem:[#allocation70_spill] sm:$0xff] %v4837_v11  ;;  %v6918_v11 = vmov 3  }
 0x165   : > { %1706 = vperm.xlu0 %4136, %v4840_v51  }
 0x166   : > { %v4843_v4 = vpop.permute.xlu0 %1930 }
 0x167   : > { %6909 = vst [vmem:[#allocation71_spill] sm:$0xff] %v4843_v4 }
 0x169   : > { %1111 = vperm.xlu2 %4088, %v4585_v61   ;;  %v4846_v52 = vpop.permute.xlu2 %932 }
 0x16a   : > { %6910 = vst [vmem:[#allocation72_spill] sm:$0xff] %v4846_v52  ;;  %1107 = vperm.xlu1 %4089, %v4672_v44   ;;  %v4849_v28 = vpop.permute.xlu1 %882  ;;  %v4864_v52 = vld [vmem:[%s4368_s25 + $0x168] sm:$0xff] }
 0x16b   : > { %6911 = vst [vmem:[#allocation73_spill] sm:$0xff] %v4849_v28  ;;  %v4876_v28 = vld [vmem:[%s4368_s25 + $0x180] sm:$0xff] }
 0x16d   : > { %1726 = vperm.xlu0 %4136, %v4852_v9  }
 0x16e   : > { %v4855_v46 = vpop.permute.xlu0 %2585 }
 0x16f   : > { %6912 = vst [vmem:[#allocation74_spill] sm:$0xff] %v4855_v46 }
 0x171   : > { %1123 = vperm.xlu2 %4088, %v4597_v3  }
 0x172   : > { %1119 = vperm.xlu1 %4089, %v4687_v6   ;;  %v4859_v4 = vpop.permute.xlu1 %897  ;;  %v4861_v48 = vpop.permute.xlu2 %963 }
 0x173   : > { %6913 = vst [vmem:[#allocation75_spill] sm:$0xff] %v4859_v4 }
 0x174   : > { %6914 = vst [vmem:[#allocation76_spill] sm:$0xff] %v4861_v48 }
 0x175   : > { %1738 = vperm.xlu0 %4136, %v4864_v52  }
 0x176   : > { %v4867_v42 = vpop.permute.xlu0 %1958 }
 0x177   : > { %6915 = vst [vmem:[#allocation77_spill] sm:$0xff] %v4867_v42 }
 0x179   : > { %1135 = vperm.xlu2 %4088, %v4609_v33  }
 0x17a   : > { %1131 = vperm.xlu1 %4089, %v4699_v50   ;;  %v4871_v46 = vpop.permute.xlu1 %912  ;;  %v4873_v63 = vpop.permute.xlu2 %975 }
 0x17b   : > { %6916 = vst [vmem:[#allocation78_spill] sm:$0xff] %v4871_v46  ;;  %v4889_v46 = vld [vmem:[%s4368_s25 + $0x198] sm:$0xff] }
 0x17c   : > { %6917 = vst [vmem:[#allocation79_spill] sm:$0xff] %v4873_v63 }
 0x17d   : > { %1750 = vperm.xlu0 %4136, %v4876_v28  }
 0x17f   : > { %v4879_v4 = vpop.permute.xlu0 %462 }
 0x181   : > { %4091 = vset.pattern.permute.xlu2 %v6918_v11 }
 0x182   : > { %4090 = vset.pattern.permute.xlu1 %v6918_v11  ;;  %v4883_v42 = vpop.permute.xlu1 %927  ;;  %1183 = vperm.xlu2 %4091, %v4625_v1   ;;  %v4886_v27 = vpop.permute.xlu2 %983  ;;  %v4899_v11 = vld [vmem:[%s4368_s25 + $0x1b0] sm:$0xff] }
 0x183   : > { %6919 = vst [vmem:[#allocation80_spill] sm:$0xff] %v4883_v42  ;;  %1179 = vperm.xlu1 %4090, %v4422_v14  }
 0x184   : > { %6920 = vst [vmem:[#allocation81_spill] sm:$0xff] %v4886_v27 }
 0x185   : > { %1762 = vperm.xlu0 %4136, %v4889_v46  }
 0x187   : > { %v4893_v63 = vpop.permute.xlu0 %482 }
 0x18a   : > { %1191 = vperm.xlu2 %4091, %v4642_v5   ;;  %v4896_v48 = vpop.permute.xlu2 %995 }
 0x18b   : > { %6921 = vst [vmem:[#allocation82_spill] sm:$0xff] %v4896_v48  ;;  %1187 = vperm.xlu1 %4090, %v4647_v8   ;;  %v4902_v1 = vpop.permute.xlu1 %959  ;;  %v3786_v48 = vld [vmem:[%s4368_s25 + $0x208] sm:$0xff] }
 0x18d   : > { %2337 = vperm.xlu0 %4136, %v4899_v11  }
 0x18f   : > { %v4905_v42 = vpop.permute.xlu0 %494 }
 0x190   : > { %6922 = vst [vmem:[#allocation83_spill] sm:$0xff] %v4905_v42 }
 0x192   : > { %1203 = vperm.xlu2 %4091, %v4660_v54   ;;  %v4908_v14 = vpop.permute.xlu2 %1007 }
 0x193   : > { %6923 = vst [vmem:[#allocation84_spill] sm:$0xff] %v4908_v14  ;;  %1199 = vperm.xlu1 %4090, %v4428_v15   ;;  %v4911_v27 = vpop.permute.xlu1 %971 }
 0x195   : > { %2341 = vperm.xlu0 %4136, %v4621_v10  }
 0x197   : > { %v4914_v5 = vpop.permute.xlu0 %506 }
 0x19a   : > { %1215 = vperm.xlu2 %4091, %v4672_v44   ;;  %v4917_v8 = vpop.permute.xlu2 %1019 }
 0x19b   : > { %6924 = vst [vmem:[#allocation85_spill] sm:$0xff] %v4917_v8  ;;  %1211 = vperm.xlu1 %4090, %v4439_v18   ;;  %v4921_v42 = vpop.permute.xlu1 %979  ;;  %v460_v18 = vmul.f32 %v4793_v38, %v4520_v40  ;;  %v660_v8 = vmul.f32 %v4797_v37, %v4724_v12 }
 0x19d   : > { %2381 = vperm.xlu0 %4136, %v3786_v48  }
 0x19f   : > { %v4923_v54 = vpop.permute.xlu0 %518 }
 0x1a0   : > { %6925 = vst [vmem:[#allocation86_spill] sm:$0xff] %v4923_v54 }
 0x1a2   : > { %1227 = vperm.xlu2 %4091, %v4687_v6  }
 0x1a3   : > { %1223 = vperm.xlu1 %4090, %v4445_v19   ;;  %v4927_v15 = vpop.permute.xlu1 %991  ;;  %v4929_v14 = vpop.permute.xlu2 %1067 }
 0x1a4   : > { %6926 = vst [vmem:[#allocation87_spill] sm:$0xff] %v4927_v15 }
 0x1a5   : > { %4140 = vset.pattern.permute.xlu0 %v6867_v62 }
 0x1a6   : > { %354 = vperm.xlu0 %4140, %v4487_v29   ;;  %v769_v29 = vmul.f32 %v4806_v17, %v4764_v32  ;;  %v4963_v32 = vld [vmem:[%s4368_s25 + $0x140] sm:$0xff] }
 0x1a7   : > { %v531_v44 = vpop.permute.xlu0 %530 }
 0x1a8   : > { %v551_v48 = vmul.f32 %v4784_v13, %v531_v44 }
 0x1aa   : > { %v569_v6 = vadd.f32 %v551_v48, %v460_v18  ;;  %1239 = vperm.xlu2 %4091, %v4699_v50  }
 0x1ab   : > { %1235 = vperm.xlu1 %4090, %v4454_v21   ;;  %v4940_v19 = vpop.permute.xlu1 %1003  ;;  %v4942_v15 = vpop.permute.xlu2 %1079 }
 0x1ac   : > { %6927 = vst [vmem:[#allocation88_spill] sm:$0xff] %v4940_v19  ;;  %v678_v54 = vadd.f32 %v660_v8, %v569_v6 }
 0x1ae   : > { %359 = vperm.xlu0 %4140, %v4431_v16   ;;  %v787_v40 = vadd.f32 %v769_v29, %v678_v54 }
 0x1af   : > { %v4947_v44 = vpop.permute.xlu0 %967 }
 0x1b0   : > { %v808_v12 = vadd.f32 %v4817_v30, %v787_v40  ;;  %v4984_v40 = vld [vmem:[%s4368_s25 + $0x160] sm:$0xff] }
 0x1b2   : > { %4093 = vset.pattern.permute.xlu2 %v6867_v62  ;;  %v826_v50 = vmax.f32 %v808_v12, 0.0 }
 0x1b3   : > { %4092 = vset.pattern.permute.xlu1 %v6867_v62  ;;  %v4952_v21 = vpop.permute.xlu1 %1015  ;;  %1600 = vperm.xlu2 %4093, %v4840_v51   ;;  %v4955_v18 = vpop.permute.xlu2 %1087 }
 0x1b4   : > { %6928 = vst [vmem:[#allocation89_spill] sm:$0xff] %v4952_v21  ;;  %1595 = vperm.xlu1 %4092, %v4463_v23   ;;  %3734 = vmatmul.msk.f32.gmra.mxu2 %vm1323_vm0, %v826_v50 }
 0x1b6   : > { %384 = vperm.xlu0 %4140, %v4448_v20  }
 0x1b7   : > { %v4960_v16 = vpop.permute.xlu0 %987 }
 0x1bb   : > { %v4965_v8 = vpop.permute.xlu1 %1027  ;;  %1615 = vperm.xlu2 %4093, %v4963_v32   ;;  %v4968_v54 = vpop.permute.xlu2 %1099 }
 0x1bc   : > { %6929 = vst [vmem:[#allocation90_spill] sm:$0xff] %v4965_v8  ;;  %1610 = vperm.xlu1 %4092, %v4656_v43   ;;  %v3746_v8 = vld [vmem:[%s4368_s25 + $0x178] sm:$0xff] }
 0x1be   : > { %399 = vperm.xlu0 %4140, %v4457_v22  }
 0x1bf   : > { %v4972_v48 = vpop.permute.xlu0 %999 }
 0x1c0   : > { %6930 = vst [vmem:[#allocation91_spill] sm:$0xff] %v4972_v48 }
 0x1c3   : > { %1625 = vperm.xlu2 %4093, %v4852_v9   ;;  %v4975_v20 = vpop.permute.xlu2 %1111 }
 0x1c4   : > { %6931 = vst [vmem:[#allocation92_spill] sm:$0xff] %v4975_v20  ;;  %1620 = vperm.xlu1 %4092, %v4472_v25   ;;  %v4978_v6 = vpop.permute.xlu1 %1075  ;;  %v5046_v20 = vld [vmem:[%s4368_s25 + $0x158] sm:$0xff] }
 0x1c5   : > { %6945 = vst [vmem:[#allocation106_spill] sm:$0xff] %v5046_v20 }
 0x1c6   : > { %414 = vperm.xlu0 %4140, %v4466_v24  }
 0x1c7   : > { %v4981_v29 = vpop.permute.xlu0 %1011 }
 0x1c8   : > { %6932 = vst [vmem:[#allocation93_spill] sm:$0xff] %v4981_v29  ;;  %v5024_v29 = vld [vmem:[%s4368_s25 + $0x130] sm:$0xff] }
 0x1cb   : > { %1640 = vperm.xlu2 %4093, %v4864_v52   ;;  %v4987_v22 = vpop.permute.xlu2 %1123 }
 0x1cc   : > { %6933 = vst [vmem:[#allocation94_spill] sm:$0xff] %v4987_v22  ;;  %1635 = vperm.xlu1 %4092, %v4984_v40   ;;  %v4990_v12 = vpop.permute.xlu1 %1083  ;;  %v3749_v22 = vld [vmem:[%s4368_s25 + $0x190] sm:$0xff] }
 0x1ce   : > { %429 = vperm.xlu0 %4140, %v4475_v26  }
 0x1cf   : > { %v4993_v50 = vpop.permute.xlu0 %1023 }
 0x1d0   : > { %6934 = vst [vmem:[#allocation95_spill] sm:$0xff] %v4993_v50 }
 0x1d3   : > { %1655 = vperm.xlu2 %4093, %v4876_v28   ;;  %v4997_v24 = vpop.permute.xlu2 %1135 }
 0x1d4   : > { %6935 = vst [vmem:[#allocation96_spill] sm:$0xff] %v4997_v24  ;;  %1650 = vperm.xlu1 %4092, %v3746_v8   ;;  %v4999_v21 = vpop.permute.xlu1 %1095  ;;  %v3752_v24 = vld [vmem:[%s4368_s25 + $0x1a8] sm:$0xff] }
 0x1d6   : > { %852 = vperm.xlu0 %4140, %v4548_v49  }
 0x1d7   : > { %v5002_v52 = vpop.permute.xlu0 %1706 }
 0x1d8   : > { %6936 = vst [vmem:[#allocation97_spill] sm:$0xff] %v5002_v52 }
 0x1db   : > { %1670 = vperm.xlu2 %4093, %v4889_v46  }
 0x1dc   : > { %1665 = vperm.xlu1 %4092, %v3749_v22   ;;  %v5006_v26 = vpop.permute.xlu1 %1107  ;;  %v5008_v50 = vpop.permute.xlu2 %1183 }
 0x1dd   : > { %6937 = vst [vmem:[#allocation98_spill] sm:$0xff] %v5006_v26 }
 0x1de   : > { %877 = vperm.xlu0 %4140, %v4561_v53  }
 0x1df   : > { %v5011_v28 = vpop.permute.xlu0 %1726 }
 0x1e0   : > { %6938 = vst [vmem:[#allocation99_spill] sm:$0xff] %v5011_v28 }
 0x1e3   : > { %4094 = vset.pattern.permute.xlu2 %v6879_v58 }
 0x1e4   : > { %1680 = vperm.xlu1 %4092, %v3752_v24   ;;  %v5015_v49 = vpop.permute.xlu1 %1119  ;;  %1702 = vperm.xlu2 %4094, %v4463_v23   ;;  %v5018_v52 = vpop.permute.xlu2 %1191 }
 0x1e5   : > { %6939 = vst [vmem:[#allocation100_spill] sm:$0xff] %v5015_v49 }
 0x1e6   : > { %892 = vperm.xlu0 %4140, %v4573_v57  }
 0x1e7   : > { %v5021_v46 = vpop.permute.xlu0 %1738 }
 0x1e8   : > { %6940 = vst [vmem:[#allocation101_spill] sm:$0xff] %v5021_v46 }
 0x1ec   : > { %4095 = vset.pattern.permute.xlu1 %v6879_v58  ;;  %v5027_v53 = vpop.permute.xlu1 %1131  ;;  %1714 = vperm.xlu2 %4094, %v4656_v43   ;;  %v5030_v28 = vpop.permute.xlu2 %1203 }
 0x1ed   : > { %6941 = vst [vmem:[#allocation102_spill] sm:$0xff] %v5027_v53  ;;  %1710 = vperm.xlu1 %4095, %v5024_v29  }
 0x1ee   : > { %907 = vperm.xlu0 %4140, %v4585_v61  }
 0x1ef   : > { %v5034_v49 = vpop.permute.xlu0 %1750 }
 0x1f0   : > { %6942 = vst [vmem:[#allocation103_spill] sm:$0xff] %v5034_v49 }
 0x1f4   : > { %1722 = vperm.xlu2 %4094, %v4472_v25   ;;  %v5037_v57 = vpop.permute.xlu2 %1215 }
 0x1f5   : > { %6943 = vst [vmem:[#allocation104_spill] sm:$0xff] %v5037_v57  ;;  %1718 = vperm.xlu1 %4095, %v4963_v32   ;;  %v5040_v46 = vpop.permute.xlu1 %1179 }
 0x1f6   : > { %922 = vperm.xlu0 %4140, %v4597_v3  }
 0x1f7   : > { %v5043_v53 = vpop.permute.xlu0 %1762 }
 0x1f8   : > { %6944 = vst [vmem:[#allocation105_spill] sm:$0xff] %v5043_v53 }
 0x1fc   : > { %1734 = vperm.xlu2 %4094, %v4984_v40   ;;  %v5049_v61 = vpop.permute.xlu2 %1227 }
 0x1fd   : > { %6946 = vst [vmem:[#allocation107_spill] sm:$0xff] %v5049_v61  ;;  %1730 = vperm.xlu1 %4095, %v5046_v20   ;;  %v5052_v25 = vpop.permute.xlu1 %1187  ;;  %v5066_v61 = vld [vmem:[%s4368_s25 + $0x188] sm:$0xff] }
 0x1fe   : > { %937 = vperm.xlu0 %4140, %v4609_v33  }
 0x1ff   : > { %v5055_v49 = vpop.permute.xlu0 %2337 }
 0x200   : > { %6947 = vst [vmem:[#allocation108_spill] sm:$0xff] %v5055_v49 }
 0x204   : > { %1746 = vperm.xlu2 %4094, %v3746_v8   ;;  %v5057_v19 = vpop.permute.xlu2 %1239 }
 0x205   : > { %6948 = vst [vmem:[#allocation109_spill] sm:$0xff] %v5057_v19  ;;  %1742 = vperm.xlu1 %4095, %v4683_v0   ;;  %v5060_v3 = vpop.permute.xlu1 %1199  ;;  %v3751_v19 = vld [vmem:[%s4368_s25 + $0x1a0] sm:$0xff] }
 0x206   : > { %1605 = vperm.xlu0 %4140, %v5024_v29  }
 0x207   : > { %v5063_v53 = vpop.permute.xlu0 %2341 }
 0x208   : > { %6949 = vst [vmem:[#allocation110_spill] sm:$0xff] %v5063_v53 }
 0x20c   : > { %1758 = vperm.xlu2 %4094, %v3749_v22   ;;  %v534_v22 = vmul.f32 %v4784_v13, %v4879_v4 }
 0x20d   : > { %1754 = vperm.xlu1 %4095, %v5066_v61   ;;  %v5069_v57 = vpop.permute.xlu1 %1211  ;;  %v5071_v33 = vpop.permute.xlu2 %1600 }
 0x20e   : > { %6950 = vst [vmem:[#allocation111_spill] sm:$0xff] %v5071_v33  ;;  %1630 = vperm.xlu0 %4140, %v5046_v20   ;;  %v643_v33 = vmul.f32 %v4797_v37, %v4653_v59 }
 0x20f   : > { %v5074_v8 = vpop.permute.xlu0 %2381 }
 0x210   : > { %6951 = vst [vmem:[#allocation112_spill] sm:$0xff] %v5074_v8 }
 0x214   : > { %1770 = vperm.xlu2 %4094, %v3752_v24   ;;  %v752_v24 = vmul.f32 %v4806_v17, %v4695_v47  ;;  %v535_v47 = vmul.f32 %v4784_v13, %v4569_v56 }
 0x215   : > { %1766 = vperm.xlu1 %4095, %v3751_v19   ;;  %v5077_v49 = vpop.permute.xlu1 %1223  ;;  %v5079_v26 = vpop.permute.xlu2 %1615 }
 0x216   : > { %6952 = vst [vmem:[#allocation113_spill] sm:$0xff] %v5077_v49  ;;  %1645 = vperm.xlu0 %4140, %v4683_v0  }
 0x218   : > { %v355_v53 = vpop.permute.xlu0 %354 }
 0x219   : > { %v443_v48 = vmul.f32 %v4793_v38, %v355_v53 }
 0x21b   : > { %v552_v20 = vadd.f32 %v534_v22, %v443_v48  ;;  %v536_v48 = vmul.f32 %v4784_v13, %v4535_v45  ;;  %v644_v22 = vmul.f32 %v4797_v37, %v4606_v31  ;;  %v753_v45 = vmul.f32 %v4806_v17, %v4674_v55 }
 0x21c   : > { %4097 = vset.pattern.permute.xlu2 %v6898_v2 }
 0x21d   : > { %v661_v8 = vadd.f32 %v643_v33, %v552_v20  ;;  %4096 = vset.pattern.permute.xlu1 %v6898_v2  ;;  %v5091_v49 = vpop.permute.xlu1 %1235  ;;  %1818 = vperm.xlu2 %4097, %v5024_v29   ;;  %v5094_v0 = vpop.permute.xlu2 %1625  ;;  %v445_v33 = vmul.f32 %v4793_v38, %v4507_v36 }
 0x21e   : > { %6953 = vst [vmem:[#allocation114_spill] sm:$0xff] %v5091_v49  ;;  %1814 = vperm.xlu1 %4096, %v4840_v51   ;;  %1660 = vperm.xlu0 %4140, %v5066_v61  }
 0x21f   : > { %6954 = vst [vmem:[#allocation115_spill] sm:$0xff] %v5094_v0  ;;  %v770_v59 = vadd.f32 %v752_v24, %v661_v8  ;;  %v645_v8 = vmul.f32 %v4797_v37, %v4505_v35  ;;  %v554_v24 = vadd.f32 %v536_v48, %v445_v33  ;;  %v754_v35 = vmul.f32 %v4806_v17, %v4737_v7 }
 0x220   : > { %v360_v4 = vpop.permute.xlu0 %359 }
 0x221   : > { %v444_v20 = vmul.f32 %v4793_v38, %v360_v4  ;;  %v791_v53 = vadd.f32 %v4817_v30, %v770_v59  ;;  %v663_v48 = vadd.f32 %v645_v8, %v554_v24  ;;  %v6958_v24 = vld [vmem:[#allocation17_spill] sm:$0xff] }
 0x223   : > { %v553_v49 = vadd.f32 %v535_v47, %v444_v20  ;;  %v809_v0 = vmax.f32 %v791_v53, 0.0  ;;  %v772_v47 = vadd.f32 %v754_v35, %v663_v48  ;;  %v5125_v53 = vld [vmem:[%s4368_s25 + $0x1d0] sm:$0xff] }
 0x225   : > { %v662_v56 = vadd.f32 %v644_v22, %v553_v49  ;;  %1826 = vperm.xlu2 %4097, %v4963_v32   ;;  %v5113_v59 = vpop.permute.xlu2 %1640  ;;  %3717 = vmatmul.msk.f32.vlgmr.msra.gmra.mxu1 %vm1323_vm0, %v809_v0  ;;  %v537_v49 = vmul.f32 %v4784_v13, %v4581_v60  ;;  %v3698_v60 = vld [vmem:[%s6817_s3 + $0x38] sm:$0xff]  ;;  %v793_v33 = vadd.f32 %v4817_v30, %v772_v47 }
 0x226   : > { %6955 = vst [vmem:[#allocation116_spill] sm:$0xff] %v5113_v59  ;;  %1822 = vperm.xlu1 %4096, %v4656_v43   ;;  %v5117_v36 = vpop.permute.xlu1 %1595  ;;  %1675 = vperm.xlu0 %4140, %v3751_v19   ;;  %v446_v43 = vmul.f32 %v4793_v38, %v4516_v39  ;;  %v646_v19 = vmul.f32 %v4797_v37, %v4668_v34  ;;  %v6979_v59 = vld [vmem:[#allocation50_spill] sm:$0xff] }
 0x227   : > { %v771_v31 = vadd.f32 %v753_v45, %v662_v56  ;;  %v755_v34 = vmul.f32 %v4806_v17, %v4708_v41  ;;  %1390 = vmatpush.msra.mxu0 %v3698_v60  ;;  %v538_v45 = vmul.f32 %v4784_v13, %v6958_v24  ;;  %v3696_v41 = vld [vmem:[%s6817_s3 + $0x28] sm:$0xff]  ;;  %v811_v35 = vmax.f32 %v793_v33, 0.0 }
 0x228   : > { %v385_v4 = vpop.permute.xlu0 %384  ;;  %v555_v39 = vadd.f32 %v537_v49, %v446_v43  ;;  %v6960_v49 = vld [vmem:[#allocation30_spill] sm:$0xff] }
 0x229   : > { %v792_v55 = vadd.f32 %v4817_v30, %v771_v31  ;;  %v6959_v31 = vld [vmem:[#allocation5_spill] sm:$0xff]  ;;  %v647_v47 = vmul.f32 %v4797_v37, %v6960_v49 }
 0x22a   : > { %v664_v8 = vadd.f32 %v646_v19, %v555_v39  ;;  %v447_v48 = vmul.f32 %v4793_v38, %v6959_v31  ;;  %v6962_v19 = vmov 3   ;;  %v6964_v39 = vld [vmem:[#allocation6_spill] sm:$0xff] }
 0x22b   : > { %v810_v20 = vmax.f32 %v792_v55, 0.0  ;;  %v3695_v55 = vld [vmem:[%s6817_s3 + $0x20] sm:$0xff]  ;;  %v5183_v49 = vld [vmem:[%s4368_s25 + $0x1e8] sm:$0xff] }
 0x22c   : > { %v773_v56 = vadd.f32 %v755_v34, %v664_v8  ;;  %v556_v43 = vadd.f32 %v538_v45, %v447_v48  ;;  %v6965_v34 = vld [vmem:[#allocation54_spill] sm:$0xff]  ;;  %v6966_v45 = vld [vmem:[#allocation7_spill] sm:$0xff] }
 0x22d   : > { %4098 = vset.pattern.permute.xlu2 %v6867_v62  ;;  %v5132_v7 = vpop.permute.xlu2 %1655  ;;  %3718 = vmatmul.msk.f32.gmra.mxu1 %vm1323_vm0, %v810_v20  ;;  %v756_v33 = vmul.f32 %v4806_v17, %v6965_v34 }
 0x22e   : > { %6956 = vst [vmem:[#allocation117_spill] sm:$0xff] %v5132_v7  ;;  %1834 = vperm.xlu1 %4096, %v4852_v9   ;;  %v5136_v0 = vpop.permute.xlu1 %1610  ;;  %2250 = vperm.xlu0 %4140, %v5125_v53   ;;  %v3697_v9 = vld [vmem:[%s6817_s3 + $0x30] sm:$0xff]  ;;  %v794_v8 = vadd.f32 %v4817_v30, %v773_v56 }
 0x22f   : > { %6957 = vst [vmem:[#allocation118_spill] sm:$0xff] %v5136_v0  ;;  %2230 = vperm.xlu2 %4098, %v4899_v11   ;;  %1391 = vmatpush.msra.mxu0 %v3697_v9  ;;  %v539_v9 = vmul.f32 %v4784_v13, %v4893_v63  ;;  %v6967_v63 = vld [vmem:[#allocation40_spill] sm:$0xff] }
 0x230   : > { %v5146_v22 = vpop.permute.xlu0 %399  ;;  %v6981_v0 = vld [vmem:[#allocation56_spill] sm:$0xff] }
 0x231   : > { %1392 = vmatpush.msra.mxu0 %v3696_v41  ;;  %v448_v41 = vmul.f32 %v4793_v38, %v6966_v45  ;;  %v6970_v45 = vld [vmem:[#allocation47_spill] sm:$0xff] }
 0x233   : > { %1393 = vmatpush.msra.mxu0 %v3695_v55  ;;  %v557_v48 = vadd.f32 %v539_v9, %v448_v41  ;;  %v812_v55 = vmax.f32 %v794_v8, 0.0  ;;  %v6969_v9 = vld [vmem:[#allocation25_spill] sm:$0xff]  ;;  %v757_v41 = vmul.f32 %v4806_v17, %v6970_v45 }
 0x234   : > { %v540_v8 = vmul.f32 %v4784_v13, %v6969_v9 }
 0x235   : > { %v5163_v20 = vpop.permute.xlu2 %1670  ;;  %3719 = vmatmul.msk.f32.gmra.mxu1 %vm1323_vm0, %v811_v35  ;;  %v665_v35 = vadd.f32 %v647_v47, %v556_v43  ;;  %v449_v47 = vmul.f32 %v4793_v38, %v385_v4 }
 0x236   : > { %6961 = vst [vmem:[#allocation17_spill] sm:$0xff] %v5163_v20  ;;  %4099 = vset.pattern.permute.xlu1 %v6962_v19  ;;  %v5167_v60 = vpop.permute.xlu1 %1620  ;;  %2255 = vperm.xlu0 %4140, %v6964_v39   ;;  %v648_v39 = vmul.f32 %v4797_v37, %v6967_v63  ;;  %v6971_v63 = vld [vmem:[#allocation33_spill] sm:$0xff]  ;;  %v6973_v20 = vld [vmem:[#allocation19_spill] sm:$0xff] }
 0x237   : > { %6963 = vst [vmem:[#allocation5_spill] sm:$0xff] %v5167_v60  ;;  %4100 = vset.pattern.permute.xlu2 %v6898_v2  ;;  %1918 = vperm.xlu1 %4099, %v4463_v23   ;;  %v774_v31 = vadd.f32 %v756_v33, %v665_v35  ;;  %v558_v35 = vadd.f32 %v540_v8, %v449_v47 }
 0x238   : > { %2445 = vperm.xlu2 %4100, %v4899_v11   ;;  %v5178_v24 = vpop.permute.xlu0 %414  ;;  %v666_v34 = vadd.f32 %v648_v39, %v557_v48  ;;  %v541_v47 = vmul.f32 %v4784_v13, %v6973_v20 }
 0x239   : > { %v795_v43 = vadd.f32 %v4817_v30, %v774_v31 }
 0x23a   : > { %v775_v4 = vadd.f32 %v757_v41, %v666_v34  ;;  %v6974_v34 = vld [vmem:[#allocation41_spill] sm:$0xff]  ;;  %v6975_v41 = vld [vmem:[#allocation76_spill] sm:$0xff] }
 0x23b   : > { %v813_v48 = vmax.f32 %v795_v43, 0.0  ;;  %v758_v8 = vmul.f32 %v4806_v17, %v6974_v34 }
 0x23c   : > { %v796_v45 = vadd.f32 %v4817_v30, %v775_v4  ;;  %v6977_v4 = vld [vmem:[#allocation67_spill] sm:$0xff] }
 0x23d   : > { %3720 = vmatmul.msk.f32.gmra.mxu1 %vm1323_vm0, %v812_v55  ;;  %v3787_v55 = vld [vmem:[%s4368_s25 + $0x210] sm:$0xff]  ;;  %v941_v20 = vmul.f32 %v6977_v4, %v4793_v38 }
 0x23e   : > { %v5188_v23 = vpop.permute.xlu1 %1635  ;;  %2265 = vperm.xlu0 %4140, %v5183_v49   ;;  %v5191_v56 = vpop.permute.xlu2 %1702  ;;  %v6980_v4 = vld [vmem:[#allocation18_spill] sm:$0xff] }
 0x23f   : > { %6968 = vst [vmem:[#allocation30_spill] sm:$0xff] %v5188_v23  ;;  %2553 = vperm.xlu1 %4099, %v4899_v11   ;;  %v649_v11 = vmul.f32 %v4797_v37, %v6971_v63  ;;  %v1246_v23 = vmul.f32 %v6979_v59, %v4806_v17 }
 0x240   : > { %4101 = vset.pattern.permute.xlu2 %v6867_v62  ;;  %v5197_v33 = vpop.permute.xlu0 %429 }
 0x241   : > { %2235 = vperm.xlu2 %4101, %v4621_v10   ;;  %v667_v9 = vadd.f32 %v649_v11, %v558_v35  ;;  %v1138_v11 = vmul.f32 %v4929_v14, %v4797_v37  ;;  %v759_v14 = vmul.f32 %v4806_v17, %v6981_v0 }
 0x243   : > { %v776_v7 = vadd.f32 %v758_v8, %v667_v9  ;;  %v6982_v8 = vld [vmem:[#allocation83_spill] sm:$0xff] }
 0x244   : > { %v542_v0 = vmul.f32 %v4784_v13, %v6982_v8 }
 0x245   : > { %3721 = vmatmul.msk.f32.gmra.mxu1 %vm1323_vm0, %v813_v48  ;;  %v1031_v48 = vmul.f32 %v6975_v41, %v4784_v13  ;;  %v814_v41 = vmax.f32 %v796_v45, 0.0  ;;  %v797_v45 = vadd.f32 %v4817_v30, %v776_v7 }
 0x246   : > { %v5208_v31 = vpop.permute.xlu1 %1650  ;;  %2290 = vperm.xlu0 %4140, %v3787_v55   ;;  %v5210_v39 = vpop.permute.xlu2 %1714  ;;  %v1030_v55 = vmul.f32 %v4902_v1, %v4784_v13 }
 0x247   : > { %6972 = vst [vmem:[#allocation6_spill] sm:$0xff] %v5208_v31  ;;  %1922 = vperm.xlu1 %4099, %v4840_v51   ;;  %v6976_v51 = vld [vmem:[#allocation13_spill] sm:$0xff]  ;;  %v6978_v31 = vld [vmem:[#allocation11_spill] sm:$0xff]  ;;  %v1049_v60 = vadd.f32 %v1031_v48, %v941_v20  ;;  %v6983_v48 = vld [vmem:[#allocation34_spill] sm:$0xff] }
 0x248   : > { %v853_v43 = vpop.permute.xlu0 %852  ;;  %v450_v35 = vmul.f32 %v4793_v38, %v6976_v51  ;;  %v650_v1 = vmul.f32 %v4797_v37, %v6978_v31  ;;  %v1247_v31 = vmul.f32 %v5040_v46, %v4806_v17  ;;  %v6984_v46 = vld [vmem:[#allocation8_spill] sm:$0xff] }
 0x249   : > { %v940_v63 = vmul.f32 %v853_v43, %v4793_v38  ;;  %4102 = vset.pattern.permute.xlu2 %v6898_v2 }
 0x24a   : > { %2449 = vperm.xlu2 %4102, %v4621_v10   ;;  %v559_v43 = vadd.f32 %v541_v47, %v450_v35  ;;  %v1139_v10 = vmul.f32 %v6980_v4, %v4797_v37  ;;  %v1140_v4 = vmul.f32 %v4978_v6, %v4797_v37 }
 0x24b   : > { %v1048_v34 = vadd.f32 %v1030_v55, %v940_v63 }
 0x24c   : > { %v668_v47 = vadd.f32 %v650_v1, %v559_v43  ;;  %v1157_v35 = vadd.f32 %v1139_v10, %v1049_v60  ;;  %v5263_v43 = vld [vmem:[%s4368_s25 + $0x1f8] sm:$0xff]  ;;  %v6986_v10 = vld [vmem:[#allocation42_spill] sm:$0xff] }
 0x24d   : > { %v1156_v51 = vadd.f32 %v1138_v11, %v1048_v34  ;;  %3722 = vmatmul.msk.f32.gmra.mxu1 %vm1323_vm0, %v814_v41  ;;  %v451_v11 = vmul.f32 %v4793_v38, %v6984_v46  ;;  %v815_v41 = vmax.f32 %v797_v45, 0.0  ;;  %v6985_v60 = vld [vmem:[#allocation59_spill] sm:$0xff]  ;;  %v1248_v45 = vmul.f32 %v5008_v50, %v4806_v17 }
 0x24e   : > { %v5240_v55 = vpop.permute.xlu1 %1665  ;;  %4143 = vset.pattern.permute.xlu0 %v6898_v2  ;;  %v5243_v9 = vpop.permute.xlu2 %1722  ;;  %v777_v34 = vadd.f32 %v759_v14, %v668_v47  ;;  %v1265_v7 = vadd.f32 %v1247_v31, %v1157_v35  ;;  %v6987_v46 = vld [vmem:[#allocation27_spill] sm:$0xff] }
 0x24f   : > { %4103 = vset.pattern.permute.xlu1 %v6867_v62  ;;  %1842 = vperm.xlu0 %4143, %v4984_v40   ;;  %v1264_v59 = vadd.f32 %v1246_v23, %v1156_v51  ;;  %v1032_v40 = vmul.f32 %v4947_v44, %v4784_v13  ;;  %v560_v1 = vadd.f32 %v542_v0, %v451_v11  ;;  %v6988_v11 = vld [vmem:[#allocation49_spill] sm:$0xff] }
 0x250   : > { %2240 = vperm.xlu1 %4103, %v6983_v48   ;;  %v5253_v63 = vpop.permute.xlu0 %877  ;;  %v942_v51 = vmul.f32 %v6985_v60, %v4793_v38  ;;  %v651_v44 = vmul.f32 %v4797_v37, %v6986_v10  ;;  %v1283_v47 = vadd.f32 %v4817_v30, %v1265_v7  ;;  %v798_v6 = vadd.f32 %v4817_v30, %v777_v34 }
 0x251   : > { %v1282_v20 = vadd.f32 %v4817_v30, %v1264_v59  ;;  %v452_v0 = vmul.f32 %v4793_v38, %v5146_v22  ;;  %v543_v50 = vmul.f32 %v4784_v13, %v6987_v46  ;;  %v1033_v34 = vmul.f32 %v4911_v27, %v4784_v13  ;;  %v6990_v27 = vld [vmem:[#allocation36_spill] sm:$0xff] }
 0x252   : > { %4104 = vset.pattern.permute.xlu2 %v6879_v58  ;;  %v1050_v59 = vadd.f32 %v1032_v40, %v942_v51  ;;  %v669_v8 = vadd.f32 %v651_v44, %v560_v1  ;;  %v760_v40 = vmul.f32 %v4806_v17, %v6988_v11  ;;  %v1301_v22 = vmax.f32 %v1283_v47, 0.0 }
 0x253   : > { %2345 = vperm.xlu2 %4104, %v6983_v48   ;;  %v1300_v23 = vmax.f32 %v1282_v20, 0.0  ;;  %v1141_v51 = vmul.f32 %v4942_v15, %v4797_v37 }
 0x254   : > { %v1158_v20 = vadd.f32 %v1140_v4, %v1050_v59  ;;  %v778_v1 = vadd.f32 %v760_v40, %v669_v8  ;;  %v652_v4 = vmul.f32 %v4797_v37, %v6990_v27 }
 0x255   : > { %3699 = vmatmul.msk.f32.vlgmr.msra.gmra.mxu0 %vm1323_vm0, %v1300_v23  ;;  %3723 = vmatmul.msk.f32.gmra.mxu1 %vm1323_vm0, %v815_v41  ;;  %v816_v23 = vmax.f32 %v798_v6, 0.0  ;;  %v561_v41 = vadd.f32 %v543_v50, %v452_v0  ;;  %v6992_v50 = vld [vmem:[#allocation43_spill] sm:$0xff] }
 0x256   : > { %v5273_v14 = vpop.permute.xlu1 %1680  ;;  %v5275_v31 = vpop.permute.xlu2 %1734  ;;  %v1266_v7 = vadd.f32 %v1248_v45, %v1158_v20  ;;  %v3778_v45 = vld [vmem:[%s4368_s25 + $0x1c8] sm:$0xff]  ;;  %v799_v8 = vadd.f32 %v4817_v30, %v778_v1 }
 0x257   : > { %2481 = vperm.xlu0 %4143, %v5263_v43   ;;  %v670_v47 = vadd.f32 %v652_v4, %v561_v41  ;;  %v6991_v20 = vld [vmem:[#allocation21_spill] sm:$0xff]  ;;  %v6995_v1 = vld [vmem:[#allocation62_spill] sm:$0xff] }
 0x258   : > { %4105 = vset.pattern.permute.xlu1 %v6962_v19  ;;  %v5285_v35 = vpop.permute.xlu0 %892  ;;  %v1284_v15 = vadd.f32 %v4817_v30, %v1266_v7  ;;  %v544_v46 = vmul.f32 %v4784_v13, %v6991_v20  ;;  %v6994_v7 = vld [vmem:[#allocation15_spill] sm:$0xff] }
 0x259   : > { %1926 = vperm.xlu1 %4105, %v5024_v29   ;;  %v6989_v29 = vld [vmem:[#allocation70_spill] sm:$0xff] }
 0x25a   : > { %v943_v60 = vmul.f32 %v6989_v29, %v4793_v38  ;;  %v944_v29 = vmul.f32 %v6995_v1, %v4793_v38 }
 0x25b   : > { %4106 = vset.pattern.permute.xlu2 %v6898_v2 }
 0x25c   : > { %2453 = vperm.xlu2 %4106, %v6983_v48   ;;  %v1051_v44 = vadd.f32 %v1033_v34, %v943_v60  ;;  %v1249_v48 = vmul.f32 %v5052_v25, %v4806_v17  ;;  %v761_v25 = vmul.f32 %v4806_v17, %v6992_v50  ;;  %v1302_v34 = vmax.f32 %v1284_v15, 0.0 }
 0x25d   : > { %3700 = vmatmul.msk.f32.gmra.mxu0 %vm1323_vm0, %v1301_v22  ;;  %3724 = vmatmul.msk.f32.gmra.mxu1 %vm1323_vm0, %v816_v23  ;;  %v453_v22 = vmul.f32 %v4793_v38, %v6994_v7  ;;  %v817_v23 = vmax.f32 %v799_v8, 0.0  ;;  %v1142_v60 = vmul.f32 %v4990_v12, %v4797_v37  ;;  %v1250_v15 = vmul.f32 %v5018_v52, %v4806_v17 }
 0x25e   : > { %v5304_v10 = vpop.permute.xlu2 %1746  ;;  %v1159_v0 = vadd.f32 %v1141_v51, %v1051_v44  ;;  %v779_v41 = vadd.f32 %v761_v25, %v670_v47  ;;  %v6996_v51 = vld [vmem:[#allocation12_spill] sm:$0xff]  ;;  %v945_v47 = vmul.f32 %v5253_v63, %v4793_v38  ;;  %v1035_v52 = vmul.f32 %v4921_v42, %v4784_v13 }
 0x25f   : > { %v5308_v59 = vpop.permute.xlu1 %1710  ;;  %1862 = vperm.xlu0 %4143, %v5066_v61   ;;  %v6993_v61 = vld [vmem:[#allocation79_spill] sm:$0xff]  ;;  %v653_v27 = vmul.f32 %v4797_v37, %v6996_v51  ;;  %v562_v4 = vadd.f32 %v544_v46, %v453_v22  ;;  %v545_v46 = vmul.f32 %v4784_v13, %v4914_v5  ;;  %v6999_v42 = vld [vmem:[#allocation44_spill] sm:$0xff] }
 0x260   : > { %v5313_v6 = vpop.permute.xlu0 %907  ;;  %v1034_v11 = vmul.f32 %v6993_v61, %v4784_v13  ;;  %v1267_v40 = vadd.f32 %v1249_v48, %v1159_v0  ;;  %v6997_v0 = vld [vmem:[#allocation58_spill] sm:$0xff]  ;;  %v800_v25 = vadd.f32 %v4817_v30, %v779_v41  ;;  %v1053_v7 = vadd.f32 %v1035_v52, %v945_v47  ;;  %v7002_v52 = vld [vmem:[#allocation29_spill] sm:$0xff] }
 0x261   : > { %4107 = vset.pattern.permute.xlu1 %v6867_v62  ;;  %v762_v20 = vmul.f32 %v4806_v17, %v6997_v0  ;;  %v1143_v41 = vmul.f32 %v4955_v18, %v4797_v37  ;;  %v455_v47 = vmul.f32 %v4793_v38, %v5178_v24  ;;  %v7000_v0 = vld [vmem:[#allocation52_spill] sm:$0xff]  ;;  %v7004_v24 = vld [vmem:[#allocation73_spill] sm:$0xff] }
 0x262   : > { %2245 = vperm.xlu1 %4107, %v3778_v45   ;;  %v1052_v48 = vadd.f32 %v1034_v11, %v944_v29  ;;  %v1285_v12 = vadd.f32 %v4817_v30, %v1267_v40  ;;  %v6998_v11 = vld [vmem:[#allocation9_spill] sm:$0xff]  ;;  %v818_v1 = vmax.f32 %v800_v25, 0.0  ;;  %v654_v29 = vmul.f32 %v4797_v37, %v6999_v42 }
 0x263   : > { %v454_v63 = vmul.f32 %v4793_v38, %v6998_v11  ;;  %v1161_v51 = vadd.f32 %v1143_v41, %v1053_v7  ;;  %v7003_v11 = vld [vmem:[#allocation51_spill] sm:$0xff]  ;;  %v7005_v41 = vld [vmem:[#allocation38_spill] sm:$0xff] }
 0x264   : > { %4108 = vset.pattern.permute.xlu2 %v6879_v58  ;;  %v1160_v61 = vadd.f32 %v1142_v60, %v1052_v48  ;;  %v1303_v22 = vmax.f32 %v1285_v12, 0.0  ;;  %v655_v42 = vmul.f32 %v4797_v37, %v7005_v41  ;;  %v7011_v41 = vld [vmem:[#allocation64_spill] sm:$0xff] }
 0x265   : > { %2349 = vperm.xlu2 %4108, %v3778_v45   ;;  %3701 = vmatmul.msk.f32.gmra.mxu0 %vm1323_vm0, %v1302_v34  ;;  %v671_v34 = vadd.f32 %v653_v27, %v562_v4  ;;  %v563_v5 = vadd.f32 %v545_v46, %v454_v63  ;;  %v1700_v27 = vmul.f32 %v5273_v14, %v4793_v38  ;;  %v7001_v46 = vld [vmem:[#allocation81_spill] sm:$0xff] }
 0x266   : > { %3725 = vmatmul.msk.f32.gmra.mxu1 %vm1323_vm0, %v817_v23  ;;  %v5334_v44 = vpop.permute.xlu2 %1758  ;;  %v1268_v40 = vadd.f32 %v1250_v15, %v1160_v61  ;;  %v1036_v14 = vmul.f32 %v7001_v46, %v4784_v13  ;;  %v546_v61 = vmul.f32 %v4784_v13, %v7002_v52  ;;  %v763_v63 = vmul.f32 %v4806_v17, %v7003_v11  ;;  %v7008_v52 = vld [vmem:[#allocation23_spill] sm:$0xff]  ;;  %v7009_v11 = vld [vmem:[#allocation45_spill] sm:$0xff] }
 0x267   : > { %v5340_v8 = vpop.permute.xlu1 %1718  ;;  %v780_v23 = vadd.f32 %v762_v20, %v671_v34  ;;  %v672_v15 = vadd.f32 %v654_v29, %v563_v5  ;;  %v1251_v20 = vmul.f32 %v7000_v0, %v4806_v17  ;;  %v946_v34 = vmul.f32 %v7004_v24, %v4793_v38  ;;  %v7006_v29 = vld [vmem:[#allocation20_spill] sm:$0xff] }
 0x268   : > { %v5347_v50 = vpop.permute.xlu0 %922  ;;  %v1286_v18 = vadd.f32 %v4817_v30, %v1268_v40  ;;  %v1037_v24 = vmul.f32 %v4960_v16, %v4784_v13 }
 0x269   : > { %v1269_v7 = vadd.f32 %v1251_v20, %v1161_v51  ;;  %v781_v5 = vadd.f32 %v763_v63, %v672_v15  ;;  %v1252_v51 = vmul.f32 %v5060_v3, %v4806_v17  ;;  %v764_v63 = vmul.f32 %v4806_v17, %v7009_v11 }
 0x26a   : > { %4109 = vset.pattern.permute.xlu1 %v6898_v2  ;;  %v1304_v40 = vmax.f32 %v1286_v18, 0.0 }
 0x26b   : > { %2457 = vperm.xlu1 %4109, %v3778_v45   ;;  %v1287_v18 = vadd.f32 %v4817_v30, %v1269_v7 }
 0x26d   : > { %4110 = vset.pattern.permute.xlu2 %v6962_v19  ;;  %3702 = vmatmul.msk.f32.gmra.mxu0 %vm1323_vm0, %v1303_v22  ;;  %v564_v22 = vadd.f32 %v546_v61, %v455_v47  ;;  %v547_v61 = vmul.f32 %v4784_v13, %v7008_v52  ;;  %v1305_v7 = vmax.f32 %v1287_v18, 0.0 }
 0x26e   : > { %2565 = vperm.xlu2 %4110, %v3778_v45   ;;  %3726 = vmatmul.msk.f32.gmra.mxu1 %vm1323_vm0, %v818_v1  ;;  %v1771_v60 = vpop.permute.xlu2 %1770  ;;  %v801_v45 = vadd.f32 %v4817_v30, %v780_v23  ;;  %v1054_v1 = vadd.f32 %v1036_v14, %v946_v34  ;;  %v7007_v14 = vld [vmem:[#allocation14_spill] sm:$0xff] }
 0x26f   : > { %v1790_v4 = vmul.f32 %v1771_v60, %v4784_v13  ;;  %v5365_v48 = vpop.permute.xlu1 %1730  ;;  %v1144_v60 = vmul.f32 %v7006_v29, %v4797_v37  ;;  %v673_v15 = vadd.f32 %v655_v42, %v564_v22  ;;  %v656_v3 = vmul.f32 %v4797_v37, %v7007_v14 }
 0x270   : > { %v5370_v12 = vpop.permute.xlu0 %937  ;;  %v819_v23 = vmax.f32 %v801_v45, 0.0  ;;  %v802_v45 = vadd.f32 %v4817_v30, %v781_v5  ;;  %v947_v42 = vmul.f32 %v7011_v41, %v4793_v38  ;;  %v1145_v29 = vmul.f32 %v4999_v21, %v4797_v37 }
 0x271   : > { %v5377_v25 = vadd.f32 %v1790_v4, %v1700_v27  ;;  %v1162_v0 = vadd.f32 %v1144_v60, %v1054_v1  ;;  %v782_v1 = vadd.f32 %v764_v63, %v673_v15  ;;  %v1253_v21 = vmul.f32 %v5030_v28, %v4806_v17  ;;  %v7014_v28 = vld [vmem:[#allocation87_spill] sm:$0xff] }
 0x272   : > { %v820_v5 = vmax.f32 %v802_v45, 0.0  ;;  %v1055_v18 = vadd.f32 %v1037_v24, %v947_v42  ;;  %v948_v15 = vmul.f32 %v5285_v35, %v4793_v38  ;;  %v1038_v52 = vmul.f32 %v7014_v28, %v4784_v13  ;;  %v4175_v42 = vld [vmem:[%s4368_s25 + $0x1d8] sm:$0xff] }
 0x273   : > { %4111 = vset.pattern.permute.xlu1 %v6879_v58  ;;  %v1270_v34 = vadd.f32 %v1252_v51, %v1162_v0  ;;  %v7012_v51 = vld [vmem:[#allocation61_spill] sm:$0xff]  ;;  %v803_v14 = vadd.f32 %v4817_v30, %v782_v1 }
 0x274   : > { %2353 = vperm.xlu1 %4111, %v5125_v53   ;;  %v1163_v35 = vadd.f32 %v1145_v29, %v1055_v18 }
 0x275   : > { %3703 = vmatmul.msk.f32.gmra.mxu0 %vm1323_vm0, %v1304_v40  ;;  %v1288_v0 = vadd.f32 %v4817_v30, %v1270_v34  ;;  %v1146_v30 = vmul.f32 %v4968_v54, %v4797_v37  ;;  %v5464_v54 = vld [vmem:[%s6816_s2] ss:$0 sm:$0xff] }
 0x276   : > { %1934 = vperm.xlu2 %4110, %v4963_v32   ;;  %3727 = vmatmul.msk.f32.gmra.mxu1 %vm1323_vm0, %v819_v23  ;;  %v1775_v32 = vmul.f32 %v5308_v59, %v4784_v13  ;;  %v7010_v59 = vld [vmem:[#allocation16_spill] sm:$0xff]  ;;  %v1777_v23 = vmul.f32 %v5340_v8, %v4784_v13  ;;  %v765_v8 = vmul.f32 %v4806_v17, %v7012_v51 }
 0x277   : > { %v5396_v27 = vpop.permute.xlu1 %1742  ;;  %v1819_v4 = vpop.permute.xlu2 %1818  ;;  %v456_v22 = vmul.f32 %v4793_v38, %v7010_v59  ;;  %v1271_v34 = vadd.f32 %v1253_v21, %v1163_v35  ;;  %v7017_v21 = vld [vmem:[#allocation55_spill] sm:$0xff] }
 0x278   : > { %v1606_v47 = vpop.permute.xlu0 %1605  ;;  %v1883_v20 = vmul.f32 %v1819_v4, %v4797_v37  ;;  %v1687_v4 = vmul.f32 %v5079_v26, %v4793_v38 }
 0x279   : > { %v1685_v46 = vmul.f32 %v1606_v47, %v4793_v38  ;;  %v565_v60 = vadd.f32 %v547_v61, %v456_v22  ;;  %v7015_v61 = vld [vmem:[#allocation10_spill] sm:$0xff] }
 0x27a   : > { %v1795_v26 = vadd.f32 %v1777_v23, %v1687_v4  ;;  %v457_v11 = vmul.f32 %v4793_v38, %v7015_v61  ;;  %v821_v23 = vmax.f32 %v803_v14, 0.0 }
 0x27b   : > { %v1793_v40 = vadd.f32 %v1775_v32, %v1685_v46  ;;  %v7013_v32 = vld [vmem:[#allocation86_spill] sm:$0xff]  ;;  %v674_v63 = vadd.f32 %v656_v3, %v565_v60  ;;  %v1289_v60 = vadd.f32 %v5464_v54, %v1271_v34 }
 0x27c   : > { %4112 = vset.pattern.permute.xlu1 %v6898_v2  ;;  %v4174_v3 = vld [vmem:[%s4368_s25 + $0x148] sm:$0xff] }
 0x27d   : > { %2461 = vperm.xlu1 %4112, %v5125_v53   ;;  %3704 = vmatmul.msk.f32.gmra.mxu0 %vm1323_vm0, %v1305_v7  ;;  %v5423_v16 = vadd.f32 %v1883_v20, %v1793_v40  ;;  %v548_v20 = vmul.f32 %v4784_v13, %v7013_v32  ;;  %v1056_v40 = vadd.f32 %v1038_v52, %v948_v15  ;;  %v1306_v7 = vmax.f32 %v1288_v0, 0.0  ;;  %v7021_v52 = vld [vmem:[#allocation75_spill] sm:$0xff] }
 0x27e   : > { %2569 = vperm.xlu2 %4110, %v5125_v53   ;;  %3728 = vmatmul.msk.f32.gmra.mxu1 %vm1323_vm0, %v820_v5  ;;  %v783_v59 = vadd.f32 %v765_v8, %v674_v63  ;;  %v7016_v5 = vld [vmem:[#allocation46_spill] sm:$0xff]  ;;  %v458_v8 = vmul.f32 %v4793_v38, %v5197_v33  ;;  %v1254_v15 = vmul.f32 %v7017_v21, %v4806_v17  ;;  %v7020_v33 = vld [vmem:[#allocation53_spill] sm:$0xff] }
 0x27f   : > { %v5435_v47 = vpop.permute.xlu1 %1754  ;;  %v1827_v45 = vpop.permute.xlu2 %1826  ;;  %v566_v22 = vadd.f32 %v548_v20, %v457_v11  ;;  %v657_v1 = vmul.f32 %v4797_v37, %v7016_v5  ;;  %v1164_v41 = vadd.f32 %v1146_v30, %v1056_v40  ;;  %v1783_v32 = vmul.f32 %v5396_v27, %v4784_v13  ;;  %v3756_v27 = vld [vmem:[%s6817_s3 + $0x58] sm:$0xff]  ;;  %v7023_v5 = vld [vmem:[#allocation22_spill] sm:$0xff] }
 0x280   : > { %v1885_v53 = vmul.f32 %v1827_v45, %v4797_v37  ;;  %v5441_v46 = vpop.permute.xlu0 %1630  ;;  %v804_v18 = vadd.f32 %v5464_v54, %v783_v59  ;;  %v7018_v45 = vld [vmem:[#allocation82_spill] sm:$0xff]  ;;  %v766_v28 = vmul.f32 %v4806_v17, %v7020_v33  ;;  %v949_v35 = vmul.f32 %v7021_v52, %v4793_v38  ;;  %2132 = vmatpush.msrb.mxu2 %v3756_v27 }
 0x281   : > { %v675_v51 = vadd.f32 %v657_v1, %v566_v22  ;;  %v1039_v0 = vmul.f32 %v7018_v45, %v4784_v13  ;;  %v1307_v11 = vmax.f32 %v1289_v60, 0.0  ;;  %v1272_v63 = vadd.f32 %v1254_v15, %v1164_v41  ;;  %v3755_v22 = vld [vmem:[%s6817_s3 + $0x50] sm:$0xff]  ;;  %v5504_v41 = vld [vmem:[%s4368_s25 + $0x1e0] sm:$0xff] }
 0x282   : > { %v5448_v24 = vadd.f32 %v1885_v53, %v1795_v26  ;;  %v7019_v53 = vld [vmem:[#allocation32_spill] sm:$0xff]  ;;  %v822_v40 = vmax.f32 %v804_v18, 0.0  ;;  %v1147_v1 = vmul.f32 %v7023_v5, %v4797_v37  ;;  %2133 = vmatpush.msrb.mxu2 %v3755_v22  ;;  %v1786_v15 = vmul.f32 %v5435_v47, %v4784_v13  ;;  %v7026_v27 = vld [vmem:[#allocation66_spill] sm:$0xff] }
 0x283   : > { %v549_v14 = vmul.f32 %v4784_v13, %v7019_v53  ;;  %v1057_v59 = vadd.f32 %v1039_v0, %v949_v35  ;;  %v1290_v60 = vadd.f32 %v5464_v54, %v1272_v63  ;;  %v3753_v0 = vld [vmem:[%s6817_s3 + $0x40] sm:$0xff]  ;;  %v7025_v53 = vld [vmem:[#allocation91_spill] sm:$0xff]  ;;  %v951_v5 = vmul.f32 %v5313_v6, %v4793_v38 }
 0x284   : > { %v3796_v47 = vld [vmem:[%s6817_s3 + $0x78] sm:$0xff]  ;;  %v3795_v63 = vld [vmem:[%s6817_s3 + $0x70] sm:$0xff]  ;;  %v3793_v6 = vld [vmem:[%s6817_s3 + $0x60] sm:$0xff] }
 0x285   : > { %4113 = vset.pattern.permute.xlu1 %v6879_v58  ;;  %3705 = vmatmul.msk.f32.gmra.mxu0 %vm1323_vm0, %v1306_v7  ;;  %v567_v34 = vadd.f32 %v549_v14, %v458_v8  ;;  %v784_v7 = vadd.f32 %v766_v28, %v675_v51  ;;  %v3754_v51 = vld [vmem:[%s6817_s3 + $0x48] sm:$0xff]  ;;  %v1040_v14 = vmul.f32 %v7025_v53, %v4784_v13  ;;  %v1308_v52 = vmax.f32 %v1290_v60, 0.0 }
 0x286   : > { %1938 = vperm.xlu2 %4110, %v4174_v3   ;;  %3729 = vmatmul.msk.f32.gmra.mxu1 %vm1323_vm0, %v821_v23  ;;  %v7022_v23 = vld [vmem:[#allocation39_spill] sm:$0xff]  ;;  %v1255_v3 = vmul.f32 %v5069_v57, %v4806_v17  ;;  %v1165_v57 = vadd.f32 %v1147_v1, %v1057_v59  ;;  %v3794_v59 = vld [vmem:[%s6817_s3 + $0x68] sm:$0xff] }
 0x287   : > { %2357 = vperm.xlu1 %4113, %v4175_v42   ;;  %v5459_v29 = vpop.permute.xlu1 %1766  ;;  %v658_v30 = vmul.f32 %v4797_v37, %v7022_v23  ;;  %v805_v21 = vadd.f32 %v5464_v54, %v784_v7  ;;  %2134 = vmatpush.msrb.mxu2 %v3754_v51  ;;  %v7028_v23 = vld [vmem:[#allocation104_spill] sm:$0xff]  ;;  %v4178_v51 = vld [vmem:[%s4368_s25 + $0x150] sm:$0xff] }
 0x288   : > { %v1646_v4 = vpop.permute.xlu0 %1645  ;;  %v1273_v33 = vadd.f32 %v1255_v3, %v1165_v57  ;;  %2767 = vmatpush.msra.mxu3 %v3796_v47  ;;  %v7029_v3 = vld [vmem:[#allocation88_spill] sm:$0xff] }
 0x289   : > { %v1693_v20 = vmul.f32 %v1646_v4, %v4793_v38  ;;  %v5477_v26 = vpop.permute.xlu2 %2230  ;;  %v676_v8 = vadd.f32 %v658_v30, %v567_v34  ;;  %v823_v35 = vmax.f32 %v805_v21, 0.0  ;;  %2135 = vmatpush.msrb.mxu2 %v3753_v0  ;;  %v950_v34 = vmul.f32 %v7026_v27, %v4793_v38 }
 0x28a   : > { %2768 = vmatpush.msra.mxu3 %v3795_v63  ;;  %v1256_v30 = vmul.f32 %v7028_v23, %v4806_v17  ;;  %v1291_v1 = vadd.f32 %v5464_v54, %v1273_v33  ;;  %v1041_v60 = vmul.f32 %v7029_v3, %v4784_v13  ;;  %v1773_v3 = vmul.f32 %v5191_v56, %v4784_v13 }
 0x28b   : > { %v5485_v61 = vadd.f32 %v1783_v32, %v1693_v20  ;;  %v7024_v32 = vld [vmem:[#allocation48_spill] sm:$0xff]  ;;  %v1058_v22 = vadd.f32 %v1040_v14, %v950_v34 }
 0x28c   : > { %v767_v20 = vmul.f32 %v4806_v17, %v7024_v32  ;;  %2769 = vmatpush.msra.mxu3 %v3794_v59  ;;  %v1059_v32 = vadd.f32 %v1041_v60, %v951_v5  ;;  %v1309_v14 = vmax.f32 %v1291_v1, 0.0  ;;  %v7035_v1 = vld [vmem:[#allocation106_spill] sm:$0xff] }
 0x28d   : > { %3706 = vmatmul.msk.f32.gmra.mxu0 %vm1323_vm0, %v1307_v11  ;;  %v7036_v60 = vld [vmem:[#allocation78_spill] sm:$0xff] }
 0x28e   : > { %4115 = vset.pattern.permute.xlu2 %v6867_v62  ;;  %3730 = vmatmul.msk.f32.gmra.mxu1 %vm1323_vm0, %v822_v40  ;;  %v785_v11 = vadd.f32 %v767_v20, %v676_v8  ;;  %v7027_v40 = vld [vmem:[#allocation98_spill] sm:$0xff] }
 0x28f   : > { %4114 = vset.pattern.permute.xlu1 %v6962_v19  ;;  %2260 = vperm.xlu2 %4115, %v5504_v41   ;;  %v1148_v7 = vmul.f32 %v7027_v40, %v4797_v37  ;;  %v7033_v40 = vld [vmem:[#allocation57_spill] sm:$0xff] }
 0x290   : > { %2573 = vperm.xlu1 %4114, %v4175_v42   ;;  %v5511_v4 = vpop.permute.xlu1 %1814  ;;  %v1661_v18 = vpop.permute.xlu0 %1660  ;;  %v806_v21 = vadd.f32 %v5464_v54, %v785_v11  ;;  %2770 = vmatpush.msra.mxu3 %v3793_v6 }
 0x291   : > { %v1696_v45 = vmul.f32 %v1661_v18, %v4793_v38  ;;  %v1166_v57 = vadd.f32 %v1148_v7, %v1058_v22  ;;  %v1257_v7 = vmul.f32 %v7033_v40, %v4806_v17  ;;  %v7034_v22 = vld [vmem:[#allocation84_spill] sm:$0xff] }
 0x292   : > { %v5522_v42 = vpop.permute.xlu2 %2445  ;;  %v824_v33 = vmax.f32 %v806_v21, 0.0  ;;  %v1042_v23 = vmul.f32 %v7034_v22, %v4784_v13  ;;  %v7041_v22 = vld [vmem:[#allocation69_spill] sm:$0xff] }
 0x293   : > { %v5526_v28 = vadd.f32 %v1786_v15, %v1696_v45  ;;  %v1789_v15 = vmul.f32 %v5459_v29, %v4784_v13  ;;  %v1274_v0 = vadd.f32 %v1256_v30, %v1166_v57  ;;  %v7032_v29 = vld [vmem:[#allocation115_spill] sm:$0xff]  ;;  %v1683_v57 = vmul.f32 %v5117_v36, %v4793_v38 }
 0x294   : > { %v1689_v63 = vmul.f32 %v7032_v29, %v4793_v38 }
 0x295   : > { %3707 = vmatmul.msk.f32.gmra.mxu0 %vm1323_vm0, %v1308_v52  ;;  %v7030_v52 = vld [vmem:[#allocation92_spill] sm:$0xff]  ;;  %v1292_v34 = vadd.f32 %v5464_v54, %v1274_v0  ;;  %v1791_v0 = vadd.f32 %v1773_v3, %v1683_v57  ;;  %v7044_v57 = vld [vmem:[#allocation107_spill] sm:$0xff] }
 0x296   : > { %3731 = vmatmul.msk.f32.gmra.mxu1 %vm1323_vm0, %v823_v35  ;;  %v1149_v47 = vmul.f32 %v7030_v52, %v4797_v37  ;;  %v7031_v35 = vld [vmem:[#allocation99_spill] sm:$0xff]  ;;  %v7039_v52 = vld [vmem:[#allocation28_spill] sm:$0xff] }
 0x297   : > { %4117 = vset.pattern.permute.xlu2 %v6962_v19  ;;  %v1779_v11 = vmul.f32 %v7031_v35, %v4784_v13  ;;  %v1310_v21 = vmax.f32 %v1292_v34, 0.0  ;;  %v7043_v3 = vld [vmem:[#allocation108_spill] sm:$0xff] }
 0x298   : > { %4116 = vset.pattern.permute.xlu1 %v6879_v58  ;;  %1942 = vperm.xlu2 %4117, %v4178_v51   ;;  %v5553_v8 = vpop.permute.xlu1 %1822  ;;  %v1676_v18 = vpop.permute.xlu0 %1675  ;;  %v1167_v27 = vadd.f32 %v1149_v47, %v1059_v32  ;;  %v952_v51 = vmul.f32 %v7036_v60, %v4793_v38  ;;  %v7037_v32 = vld [vmem:[#allocation24_spill] sm:$0xff]  ;;  %v1881_v47 = vmul.f32 %v7039_v52, %v4797_v37 }
 0x299   : > { %2361 = vperm.xlu1 %4116, %v5504_v41   ;;  %v1699_v45 = vmul.f32 %v1676_v18, %v4793_v38  ;;  %v1797_v30 = vadd.f32 %v1779_v11, %v1689_v63  ;;  %v1150_v56 = vmul.f32 %v7037_v32, %v4797_v37  ;;  %v7040_v63 = vld [vmem:[#allocation93_spill] sm:$0xff]  ;;  %v2408_v60 = vmul.f32 %v7043_v3, %v4784_v13 }
 0x29a   : > { %v1275_v6 = vadd.f32 %v1257_v7, %v1167_v27  ;;  %v1899_v11 = vadd.f32 %v1881_v47, %v1791_v0  ;;  %v1043_v27 = vmul.f32 %v7040_v63, %v4784_v13  ;;  %v2318_v7 = vmul.f32 %v5477_v26, %v4793_v38 }
 0x29b   : > { %v5563_v20 = vadd.f32 %v1789_v15, %v1699_v45  ;;  %v2236_v53 = vpop.permute.xlu2 %2235  ;;  %v1060_v15 = vadd.f32 %v1042_v23, %v952_v51  ;;  %v953_v23 = vmul.f32 %v7041_v22, %v4793_v38  ;;  %v2516_v51 = vmul.f32 %v5522_v42, %v4797_v37 }
 0x29c   : > { %v954_v0 = vmul.f32 %v5347_v50, %v4793_v38 }
 0x29d   : > { %3708 = vmatmul.msk.f32.gmra.mxu0 %vm1323_vm0, %v1309_v14  ;;  %v1168_v35 = vadd.f32 %v1150_v56, %v1060_v15  ;;  %v1259_v15 = vmul.f32 %v7044_v57, %v4806_v17  ;;  %v7045_v56 = vld [vmem:[#allocation110_spill] sm:$0xff] }
 0x29e   : > { %3732 = vmatmul.msk.f32.gmra.mxu1 %vm1323_vm0, %v824_v33  ;;  %v1293_v33 = vadd.f32 %v5464_v54, %v1275_v6  ;;  %v1061_v6 = vadd.f32 %v1043_v27, %v953_v23  ;;  %v7049_v23 = vld [vmem:[#allocation94_spill] sm:$0xff] }
 0x2a0   : > { %4120 = vset.pattern.permute.xlu2 %v6898_v2  ;;  %v1835_v59 = vpop.permute.xlu1 %1834  ;;  %v1311_v40 = vmax.f32 %v1293_v33, 0.0 }
 0x2a1   : > { %4119 = vset.pattern.permute.xlu1 %v6962_v19  ;;  %v1887_v5 = vmul.f32 %v1835_v59, %v4797_v37  ;;  %1838 = vperm.xlu2 %4120, %v7035_v1  }
 0x2a2   : > { %2577 = vperm.xlu1 %4119, %v5504_v41   ;;  %v7038_v41 = vld [vmem:[#allocation113_spill] sm:$0xff] }
 0x2a3   : > { %v5587_v18 = vadd.f32 %v1887_v5, %v1797_v30  ;;  %v1258_v14 = vmul.f32 %v7038_v41, %v4806_v17  ;;  %v7042_v30 = vld [vmem:[#allocation100_spill] sm:$0xff]  ;;  %v2409_v41 = vmul.f32 %v7045_v56, %v4784_v13  ;;  %v7052_v56 = vld [vmem:[#allocation85_spill] sm:$0xff] }
 0x2a4   : > { %v2450_v45 = vpop.permute.xlu2 %2449  ;;  %v1151_v5 = vmul.f32 %v7042_v30, %v4797_v37  ;;  %v1152_v30 = vmul.f32 %v7049_v23, %v4797_v37 }
 0x2a5   : > { %3709 = vmatmul.msk.f32.gmra.mxu0 %vm1323_vm0, %v1310_v21  ;;  %v1276_v34 = vadd.f32 %v1258_v14, %v1168_v35  ;;  %v2319_v21 = vmul.f32 %v2236_v53, %v4793_v38  ;;  %v2426_v14 = vadd.f32 %v2408_v60, %v2318_v7  ;;  %v2517_v33 = vmul.f32 %v2450_v45, %v4797_v37  ;;  %v7046_v53 = vld [vmem:[#allocation89_spill] sm:$0xff] }
 0x2a6   : > { %v1044_v52 = vmul.f32 %v7046_v53, %v4784_v13  ;;  %v1169_v47 = vadd.f32 %v1151_v5, %v1061_v6  ;;  %v7047_v45 = vld [vmem:[#allocation97_spill] sm:$0xff]  ;;  %v1882_v60 = vmul.f32 %v5511_v4, %v4797_v37 }
 0x2a7   : > { %v1294_v32 = vadd.f32 %v5464_v54, %v1276_v34  ;;  %v1774_v34 = vmul.f32 %v7047_v45, %v4784_v13  ;;  %v7050_v5 = vld [vmem:[#allocation65_spill] sm:$0xff]  ;;  %v7055_v45 = vld [vmem:[#allocation114_spill] sm:$0xff] }
 0x2a8   : > { %v1277_v50 = vadd.f32 %v1259_v15, %v1169_v47  ;;  %v1062_v63 = vadd.f32 %v1044_v52, %v954_v0  ;;  %v2625_v3 = vmul.f32 %v7050_v5, %v4806_v17  ;;  %v7051_v0 = vld [vmem:[#allocation60_spill] sm:$0xff]  ;;  %v4179_v52 = vld [vmem:[%s4368_s25 + $0x1f0] sm:$0xff] }
 0x2a9   : > { %4122 = vset.pattern.permute.xlu2 %v6962_v19  ;;  %v1919_v36 = vpop.permute.xlu1 %1918  ;;  %v1312_v27 = vmax.f32 %v1294_v32, 0.0  ;;  %v1260_v32 = vmul.f32 %v7051_v0, %v4806_v17  ;;  %v7056_v5 = vld [vmem:[#allocation95_spill] sm:$0xff]  ;;  %v7058_v0 = vld [vmem:[#allocation102_spill] sm:$0xff] }
 0x2aa   : > { %4121 = vset.pattern.permute.xlu1 %v6879_v58  ;;  %v1989_v29 = vmul.f32 %v1919_v36, %v4806_v17  ;;  %1946 = vperm.xlu2 %4122, %v7035_v1   ;;  %v2534_v36 = vadd.f32 %v2516_v51, %v2426_v14  ;;  %v1295_v6 = vadd.f32 %v5464_v54, %v1277_v50 }
 0x2ab   : > { %2365 = vperm.xlu1 %4121, %v5183_v49  }
 0x2ac   : > { %v2007_v59 = vadd.f32 %v1989_v29, %v1899_v11  ;;  %v2427_v11 = vadd.f32 %v2409_v41, %v2319_v21  ;;  %v1045_v41 = vmul.f32 %v7052_v56, %v4784_v13  ;;  %v1313_v47 = vmax.f32 %v1295_v6, 0.0 }
 0x2ad   : > { %3710 = vmatmul.msk.f32.gmra.mxu0 %vm1323_vm0, %v1311_v40  ;;  %v5613_v1 = vpop.permute.xlu2 %2345  ;;  %v7048_v40 = vld [vmem:[#allocation111_spill] sm:$0xff] }
 0x2ae   : > { %v2025_v26 = vadd.f32 %v5464_v54, %v2007_v59  ;;  %v1684_v7 = vmul.f32 %v7048_v40, %v4793_v38  ;;  %v2535_v59 = vadd.f32 %v2517_v33, %v2427_v11 }
 0x2b0   : > { %v2043_v42 = vmax.f32 %v2025_v26, 0.0  ;;  %v1170_v26 = vadd.f32 %v1152_v30, %v1062_v63  ;;  %v1792_v57 = vadd.f32 %v1774_v34, %v1684_v7  ;;  %v7054_v63 = vld [vmem:[#allocation26_spill] sm:$0xff]  ;;  %v1261_v34 = vmul.f32 %v7055_v45, %v4806_v17 }
 0x2b1   : > { %v2554_v35 = vpop.permute.xlu1 %2553  ;;  %v2410_v30 = vmul.f32 %v5613_v1, %v4784_v13 }
 0x2b2   : > { %v2624_v29 = vmul.f32 %v2554_v35, %v4806_v17  ;;  %2581 = vperm.xlu2 %4122, %v5183_v49   ;;  %3757 = vmatmul.msk.f32.vlgmr.msrb.gmra.mxu2 %vm1323_vm0, %v2043_v42  ;;  %v1900_v33 = vadd.f32 %v1882_v60, %v1792_v57  ;;  %v7053_v42 = vld [vmem:[#allocation80_spill] sm:$0xff]  ;;  %v1278_v35 = vadd.f32 %v1260_v32, %v1170_v26 }
 0x2b3   : > { %4123 = vset.pattern.permute.xlu1 %v6898_v2  ;;  %v955_v53 = vmul.f32 %v7053_v42, %v4793_v38  ;;  %v1154_v32 = vmul.f32 %v7058_v0, %v4797_v37 }
 0x2b4   : > { %v2642_v22 = vadd.f32 %v2624_v29, %v2534_v36  ;;  %2473 = vperm.xlu1 %4123, %v5183_v49   ;;  %v2643_v49 = vadd.f32 %v2625_v3, %v2535_v59  ;;  %v1296_v7 = vadd.f32 %v5464_v54, %v1278_v35  ;;  %v1046_v3 = vmul.f32 %v7056_v5, %v4784_v13  ;;  %v7063_v5 = vld [vmem:[#allocation96_spill] sm:$0xff] }
 0x2b5   : > { %3711 = vmatmul.msk.f32.gmra.mxu0 %vm1323_vm0, %v1312_v27  ;;  %v1063_v29 = vadd.f32 %v1045_v41, %v955_v53  ;;  %v1153_v27 = vmul.f32 %v7054_v63, %v4797_v37  ;;  %v957_v53 = vmul.f32 %v5370_v12, %v4793_v38  ;;  %v1776_v35 = vmul.f32 %v5210_v39, %v4784_v13 }
 0x2b6   : > { %v2454_v51 = vpop.permute.xlu2 %2453  ;;  %v2660_v21 = vadd.f32 %v5464_v54, %v2642_v22  ;;  %v2661_v11 = vadd.f32 %v5464_v54, %v2643_v49  ;;  %v1314_v57 = vmax.f32 %v1296_v7, 0.0  ;;  %v7057_v49 = vld [vmem:[#allocation72_spill] sm:$0xff] }
 0x2b7   : > { %v1171_v23 = vadd.f32 %v1153_v27, %v1063_v29  ;;  %v2518_v26 = vmul.f32 %v2454_v51, %v4797_v37  ;;  %v956_v1 = vmul.f32 %v7057_v49, %v4793_v38  ;;  %v7059_v51 = vld [vmem:[#allocation68_spill] sm:$0xff]  ;;  %v7062_v27 = vld [vmem:[#allocation118_spill] sm:$0xff] }
 0x2b8   : > { %v2678_v15 = vmax.f32 %v2660_v21, 0.0  ;;  %v2679_v22 = vmax.f32 %v2661_v11, 0.0  ;;  %v2626_v41 = vmul.f32 %v7059_v51, %v4806_v17  ;;  %v7061_v11 = vld [vmem:[#allocation90_spill] sm:$0xff]  ;;  %v1686_v45 = vmul.f32 %v7062_v27, %v4793_v38  ;;  %v7065_v51 = vld [vmem:[#allocation63_spill] sm:$0xff] }
 0x2b9   : > { %v1923_v14 = vpop.permute.xlu1 %1922  ;;  %v1279_v21 = vadd.f32 %v1261_v34, %v1171_v23  ;;  %v1047_v29 = vmul.f32 %v7061_v11, %v4784_v13  ;;  %v1884_v34 = vmul.f32 %v5553_v8, %v4797_v37 }
 0x2ba   : > { %v1990_v4 = vmul.f32 %v1923_v14, %v4806_v17  ;;  %4125 = vset.pattern.permute.xlu2 %v6879_v58  ;;  %3797 = vmatmul.msk.f32.vlgmr.msra.gmra.mxu3 %vm1323_vm0, %v2678_v15  ;;  %v5681_v15 = vpop.f32.mrf.mxu1  ;;  %v1064_v14 = vadd.f32 %v1046_v3, %v956_v1  ;;  %v1794_v39 = vadd.f32 %v1776_v35, %v1686_v45  ;;  %v7064_v1 = vld [vmem:[#allocation71_spill] sm:$0xff] }
 0x2bb   : > { %2369 = vperm.xlu2 %4125, %v4179_v52   ;;  %v1065_v12 = vadd.f32 %v1047_v29, %v957_v53  ;;  %v1155_v3 = vmul.f32 %v7063_v5, %v4797_v37  ;;  %v1992_v0 = vmul.f32 %v7064_v1, %v4806_v17  ;;  %v7067_v5 = vld [vmem:[#allocation31_spill] sm:$0xff] }
 0x2bc   : > { %v2008_v36 = vadd.f32 %v1990_v4, %v1900_v33  ;;  %4124 = vset.pattern.permute.xlu1 %v6867_v62  ;;  %v4180_v33 = vld [vmem:[%s4368_s25 + $0x160] sm:$0xff] }
 0x2bd   : > { %2270 = vperm.xlu1 %4124, %v4179_v52   ;;  %3712 = vmatmul.msk.f32.gmra.mxu0 %vm1323_vm0, %v1313_v47  ;;  %v7060_v4 = vld [vmem:[#allocation109_spill] sm:$0xff]  ;;  %v1297_v47 = vadd.f32 %v5464_v54, %v1279_v21 }
 0x2be   : > { %v2026_v50 = vadd.f32 %v5464_v54, %v2008_v36  ;;  %v1262_v42 = vmul.f32 %v7060_v4, %v4806_v17 }
 0x2bf   : > { %v5667_v40 = vpop.permute.xlu2 %2349 }
 0x2c0   : > { %v2044_v59 = vmax.f32 %v2026_v50, 0.0  ;;  %v1172_v50 = vadd.f32 %v1154_v32, %v1064_v14 }
 0x2c2   : > { %3758 = vmatmul.msk.f32.gmra.mxu2 %vm1323_vm0, %v2044_v59  ;;  %3798 = vmatmul.msk.f32.gmra.mxu3 %vm1323_vm0, %v2679_v22  ;;  %v2241_v60 = vpop.permute.xlu1 %2240  ;;  %v1280_v7 = vadd.f32 %v1262_v42, %v1172_v50  ;;  %v1315_v22 = vmax.f32 %v1297_v47, 0.0  ;;  %v5710_v21 = vpop.f32.mrf.mxu1  ;;  %v1778_v50 = vmul.f32 %v5243_v9, %v4784_v13 }
 0x2c3   : > { %v2320_v6 = vmul.f32 %v2241_v60, %v4793_v38  ;;  %4127 = vset.pattern.permute.xlu2 %v6898_v2  ;;  %v1902_v60 = vadd.f32 %v1884_v34, %v1794_v39 }
 0x2c4   : > { %2477 = vperm.xlu2 %4127, %v4179_v52   ;;  %v1298_v49 = vadd.f32 %v5464_v54, %v1280_v7 }
 0x2c5   : > { %v2428_v56 = vadd.f32 %v2410_v30, %v2320_v6  ;;  %4126 = vset.pattern.permute.xlu1 %v6962_v19  ;;  %3713 = vmatmul.msk.f32.gmra.mxu0 %vm1323_vm0, %v1314_v57  ;;  %v1173_v6 = vadd.f32 %v1155_v3, %v1065_v12  ;;  %v4181_v57 = vld [vmem:[%s4368_s25 + $0x168] sm:$0xff]  ;;  %v2010_v14 = vadd.f32 %v1992_v0, %v1902_v60 }
 0x2c6   : > { %1950 = vperm.xlu1 %4126, %v4180_v33   ;;  %v1316_v4 = vmax.f32 %v1298_v49, 0.0  ;;  %v7066_v12 = vld [vmem:[#allocation5_spill] sm:$0xff]  ;;  %v1886_v3 = vmul.f32 %v7067_v5, %v4797_v37 }
 0x2c7   : > { %v2536_v52 = vadd.f32 %v2518_v26, %v2428_v56  ;;  %v2028_v47 = vadd.f32 %v5464_v54, %v2010_v14 }
 0x2c8   : > { %v2566_v36 = vpop.permute.xlu2 %2565 }
 0x2c9   : > { %v2644_v63 = vadd.f32 %v2626_v41, %v2536_v52  ;;  %v1263_v41 = vmul.f32 %v7065_v51, %v4806_v17  ;;  %v2046_v7 = vmax.f32 %v2028_v47, 0.0  ;;  %v2627_v9 = vmul.f32 %v2566_v36, %v4806_v17  ;;  %v3785_v51 = vld [vmem:[%s4368_s25 + $0x200] sm:$0xff] }
 0x2ca   : > { %v5731_v11 = vpop.f32.mrf.mxu1 }
 0x2cb   : > { %v1927_v59 = vpop.permute.xlu1 %1926  ;;  %v2662_v23 = vadd.f32 %v5464_v54, %v2644_v63  ;;  %v1281_v42 = vadd.f32 %v1263_v41, %v1173_v6  ;;  %v2411_v63 = vmul.f32 %v5667_v40, %v4784_v13 }
 0x2cc   : > { %v1991_v30 = vmul.f32 %v1927_v59, %v4806_v17  ;;  %4129 = vset.pattern.permute.xlu2 %v6867_v62  ;;  %v1688_v59 = vmul.f32 %v7066_v12, %v4793_v38 }
 0x2cd   : > { %2275 = vperm.xlu2 %4129, %v5263_v43   ;;  %3714 = vmatmul.msk.f32.gmra.mxu0 %vm1323_vm0, %v1315_v22  ;;  %v2680_v8 = vmax.f32 %v2662_v23, 0.0  ;;  %v1299_v35 = vadd.f32 %v5464_v54, %v1281_v42 }
 0x2ce   : > { %v2009_v26 = vadd.f32 %v1991_v30, %v5423_v16  ;;  %4128 = vset.pattern.permute.xlu1 %v6898_v2  ;;  %v1796_v23 = vadd.f32 %v1778_v50, %v1688_v59 }
 0x2cf   : > { %1846 = vperm.xlu1 %4128, %v4181_v57   ;;  %3799 = vmatmul.msk.f32.gmra.mxu3 %vm1323_vm0, %v2680_v8  ;;  %v1317_v22 = vmax.f32 %v1299_v35, 0.0  ;;  %v4182_v8 = vld [vmem:[%s4368_s25 + $0x170] sm:$0xff] }
 0x2d0   : > { %v1935_v32 = vpop.permute.xlu2 %1934  ;;  %v2027_v56 = vadd.f32 %v5464_v54, %v2009_v26  ;;  %v1904_v6 = vadd.f32 %v1886_v3, %v1796_v23 }
 0x2d1   : > { %v1993_v52 = vmul.f32 %v1935_v32, %v4806_v17 }
 0x2d2   : > { %v5722_v16 = vpop.f32.mrf.mxu0  ;;  %v2045_v33 = vmax.f32 %v2027_v56, 0.0 }
 0x2d3   : > { %v2011_v27 = vadd.f32 %v1993_v52, %v5448_v24 }
 0x2d4   : > { %3759 = vmatmul.msk.f32.gmra.mxu2 %vm1323_vm0, %v2045_v33  ;;  %v2246_v53 = vpop.permute.xlu1 %2245 }
 0x2d5   : > { %4131 = vset.pattern.permute.xlu2 %v6962_v19  ;;  %3715 = vmatmul.msk.f32.gmra.mxu0 %vm1323_vm0, %v1316_v4  ;;  %v2321_v45 = vmul.f32 %v2246_v53, %v4793_v38  ;;  %v2029_v30 = vadd.f32 %v5464_v54, %v2011_v27  ;;  %v2251_v53 = vpop.permute.xlu0 %2250 }
 0x2d6   : > { %1954 = vperm.xlu2 %4131, %v4181_v57   ;;  %v5756_v57 = vpop.f32.mrf.mxu1  ;;  %v2322_v52 = vmul.f32 %v2251_v53, %v4793_v38 }
 0x2d7   : > { %4130 = vset.pattern.permute.xlu1 %v6879_v58  ;;  %v2429_v40 = vadd.f32 %v2411_v63, %v2321_v45  ;;  %v2047_v0 = vmax.f32 %v2029_v30, 0.0 }
 0x2d8   : > { %2373 = vperm.xlu1 %4130, %v5263_v43   ;;  %v2570_v29 = vpop.permute.xlu2 %2569 }
 0x2d9   : > { %v2628_v45 = vmul.f32 %v2570_v29, %v4806_v17 }
 0x2da   : > { %v5740_v34 = vpop.f32.mrf.mxu0 }
 0x2dc   : > { %3760 = vmatmul.msk.f32.gmra.mxu2 %vm1323_vm0, %v2046_v7 }
 0x2dd   : > { %v2458_v39 = vpop.permute.xlu1 %2457  ;;  %3716 = vmatmul.msk.f32.gmra.mxu0 %vm1323_vm0, %v1317_v22 }
 0x2de   : > { %v2519_v24 = vmul.f32 %v2458_v39, %v4797_v37  ;;  %4133 = vset.pattern.permute.xlu2 %v6898_v2  ;;  %v1532_v47 = vpop.f32.mrf.mxu1 }
 0x2df   : > { %1850 = vperm.xlu2 %4133, %v4182_v8   ;;  %v2256_v8 = vpop.permute.xlu0 %2255 }
 0x2e0   : > { %v2537_v60 = vadd.f32 %v2519_v24, %v2429_v40  ;;  %4132 = vset.pattern.permute.xlu1 %v6962_v19  ;;  %v1939_v26 = vpop.permute.xlu2 %1938 }
 0x2e1   : > { %v1994_v36 = vmul.f32 %v1939_v26, %v4806_v17  ;;  %2589 = vperm.xlu1 %4132, %v5263_v43  }
 0x2e2   : > { %v2645_v49 = vadd.f32 %v2627_v9, %v2537_v60  ;;  %v5758_v1 = vpop.f32.mrf.mxu0  ;;  %v4183_v60 = vld [vmem:[%s4368_s25 + $0x208] sm:$0xff] }
 0x2e3   : > { %v2012_v32 = vadd.f32 %v1994_v36, %v1904_v6  ;;  %v2323_v6 = vmul.f32 %v2256_v8, %v4793_v38  ;;  %v4184_v36 = vld [vmem:[%s4368_s25 + $0x178] sm:$0xff] }
 0x2e4   : > { %3761 = vmatmul.msk.f32.gmra.mxu2 %vm1323_vm0, %v2047_v0  ;;  %v2663_v56 = vadd.f32 %v5464_v54, %v2645_v49 }
 0x2e5   : > { %v2030_v33 = vadd.f32 %v5464_v54, %v2012_v32  ;;  %v1690_v32 = vmul.f32 %v5441_v46, %v4793_v38 }
 0x2e6   : > { %v2354_v41 = vpop.permute.xlu1 %2353  ;;  %v2681_v14 = vmax.f32 %v2663_v56, 0.0  ;;  %v1535_v40 = vpop.f32.mrf.mxu1 }
 0x2e7   : > { %4135 = vset.pattern.permute.xlu2 %v6879_v58  ;;  %v2048_v42 = vmax.f32 %v2030_v33, 0.0  ;;  %v2412_v35 = vmul.f32 %v2354_v41, %v4784_v13  ;;  %v7068_v33 = vld [vmem:[#allocation35_spill] sm:$0xff] }
 0x2e8   : > { %2377 = vperm.xlu2 %4135, %v3785_v51   ;;  %3800 = vmatmul.msk.f32.gmra.mxu3 %vm1323_vm0, %v2681_v14  ;;  %v5798_v14 = vld [vmem:[%s4368_s25 + $0x220] sm:$0xff] }
 0x2e9   : > { %4134 = vset.pattern.permute.xlu1 %v6867_v62  ;;  %v5767_v43 = vpop.permute.xlu2 %2260  ;;  %v2430_v63 = vadd.f32 %v2412_v35, %v2322_v52  ;;  %2501 = vperm.xlu0 %4143, %v5798_v14  }
 0x2ea   : > { %2280 = vperm.xlu1 %4134, %v3785_v51   ;;  %v5769_v4 = vpop.f32.mrf.mxu0 }
 0x2ec   : > { %3762 = vmatmul.msk.f32.gmra.mxu2 %vm1323_vm0, %v2048_v42  ;;  %v2521_v42 = vmul.f32 %v7068_v33, %v4797_v37  ;;  %v2890_v33 = vld [vmem:[%s6819_s5 + $0x38] sm:$0xff] }
 0x2ed   : > { %2944 = vmatpush.msrb.mxu1 %v2890_v33 }
 0x2ee   : > { %v1538_v41 = vpop.f32.mrf.mxu1 }
 0x2ef   : > { %v2462_v50 = vpop.permute.xlu1 %2461 }
 0x2f0   : > { %v2520_v27 = vmul.f32 %v2462_v50, %v4797_v37  ;;  %4138 = vset.pattern.permute.xlu2 %v6962_v19 }
 0x2f1   : > { %2593 = vperm.xlu2 %4138, %v3785_v51   ;;  %4155 = vset.pattern.permute.xlu0 %v6962_v19 }
 0x2f2   : > { %v2538_v7 = vadd.f32 %v2520_v27, %v2430_v63  ;;  %4137 = vset.pattern.permute.xlu1 %v6898_v2  ;;  %v1943_v12 = vpop.permute.xlu2 %1942  ;;  %v1407_v59 = vpop.f32.mrf.mxu0 }
 0x2f3   : > { %v1995_v22 = vmul.f32 %v1943_v12, %v4806_v17  ;;  %2485 = vperm.xlu1 %4137, %v3785_v51   ;;  %v5779_v23 = vadd.f32 %v1532_v47, %v1407_v59  ;;  %v1780_v51 = vmul.f32 %v5365_v48, %v4784_v13 }
 0x2f4   : > { %v2646_v39 = vadd.f32 %v2628_v45, %v2538_v7 }
 0x2f5   : > { %v2013_v9 = vadd.f32 %v1995_v22, %v5587_v18  ;;  %v1798_v52 = vadd.f32 %v1780_v51, %v1690_v32 }
 0x2f6   : > { %v2664_v24 = vadd.f32 %v5464_v54, %v2646_v39 }
 0x2f7   : > { %v2031_v29 = vadd.f32 %v5464_v54, %v2013_v9  ;;  %v5813_v9 = vld [vmem:[%s4368_s25 + $0x218] sm:$0xff] }
 0x2f8   : > { %v2682_v30 = vmax.f32 %v2664_v24, 0.0  ;;  %2605 = vperm.xlu0 %4155, %v5813_v9  }
 0x2f9   : > { %v2358_v5 = vpop.permute.xlu1 %2357  ;;  %4139 = vset.pattern.permute.xlu2 %v6867_v62  ;;  %v2049_v3 = vmax.f32 %v2031_v29, 0.0 }
 0x2fa   : > { %2285 = vperm.xlu2 %4139, %v4183_v60   ;;  %3801 = vmatmul.msk.f32.gmra.mxu3 %vm1323_vm0, %v2682_v30  ;;  %v1410_v26 = vpop.f32.mrf.mxu0  ;;  %v2413_v18 = vmul.f32 %v2358_v5, %v4784_v13  ;;  %v4185_v30 = vld [vmem:[%s4368_s25 + $0x180] sm:$0xff] }
 0x2fb   : > { %1854 = vperm.xlu1 %4137, %v4184_v36   ;;  %v1839_v49 = vpop.permute.xlu2 %1838  ;;  %v5790_v0 = vadd.f32 %v1535_v40, %v1410_v26  ;;  %3763 = vmatmul.msk.f32.gmra.mxu2 %vm1323_vm0, %v2049_v3  ;;  %v1541_v40 = vpop.f32.mrf.mxu1 }
 0x2fc   : > { %v2431_v56 = vadd.f32 %v2413_v18, %v2323_v6  ;;  %v1888_v53 = vmul.f32 %v1839_v49, %v4797_v37  ;;  %v2324_v6 = vmul.f32 %v5767_v43, %v4793_v38  ;;  %v7069_v49 = vld [vmem:[#allocation37_spill] sm:$0xff] }
 0x2fd   : > { %v2522_v32 = vmul.f32 %v7069_v49, %v4797_v37 }
 0x2fe   : > { %v2539_v35 = vadd.f32 %v2521_v42, %v2431_v56  ;;  %v1906_v27 = vadd.f32 %v1888_v53, %v1798_v52  ;;  %v2889_v42 = vld [vmem:[%s6819_s5 + $0x30] sm:$0xff] }
 0x2ff   : > { %2945 = vmatpush.msrb.mxu1 %v2889_v42  ;;  %v4188_v42 = vld [vmem:[%s4368_s25 + $0x188] sm:$0xff] }
 0x302   : > { %v2574_v47 = vpop.permute.xlu1 %2573  ;;  %4142 = vset.pattern.permute.xlu2 %v6898_v2  ;;  %v1413_v46 = vpop.f32.mrf.mxu0 }
 0x303   : > { %v2629_v50 = vmul.f32 %v2574_v47, %v4806_v17  ;;  %4141 = vset.pattern.permute.xlu1 %v6962_v19  ;;  %2489 = vperm.xlu2 %4142, %v4183_v60   ;;  %v5807_v48 = vadd.f32 %v1538_v41, %v1413_v46  ;;  %v4187_v41 = vld [vmem:[%s4368_s25 + $0x210] sm:$0xff]  ;;  %v2888_v47 = vld [vmem:[%s6819_s5 + $0x28] sm:$0xff] }
 0x304   : > { %1962 = vperm.xlu1 %4141, %v4184_v36   ;;  %v1947_v63 = vpop.permute.xlu2 %1946  ;;  %v5826_v36 = vld [vmem:[%s4368_s25 + $0x198] sm:$0xff]  ;;  %2946 = vmatpush.msrb.mxu1 %v2888_v47  ;;  %v1781_v47 = vmul.f32 %v5275_v31, %v4784_v13 }
 0x305   : > { %v2647_v45 = vadd.f32 %v2629_v50, %v2539_v35  ;;  %v1996_v7 = vmul.f32 %v1947_v63, %v4806_v17  ;;  %1978 = vperm.xlu0 %4155, %v5826_v36   ;;  %v2887_v35 = vld [vmem:[%s6819_s5 + $0x20] sm:$0xff]  ;;  %v2886_v63 = vld [vmem:[%s6819_s5 + $0x18] sm:$0xff] }
 0x306   : > { %2947 = vmatpush.msrb.mxu1 %v2887_v35  ;;  %v7070_v35 = vld [vmem:[#allocation74_spill] sm:$0xff] }
 0x307   : > { %v2014_v12 = vadd.f32 %v1996_v7, %v1906_v27  ;;  %v2665_v59 = vadd.f32 %v5464_v54, %v2647_v45  ;;  %v2266_v27 = vpop.permute.xlu0 %2265  ;;  %v2885_v7 = vld [vmem:[%s6819_s5 + $0x10] sm:$0xff] }
 0x308   : > { %2948 = vmatpush.msrb.mxu1 %v2886_v63 }
 0x309   : > { %v2683_v22 = vmax.f32 %v2665_v59, 0.0  ;;  %v2032_v39 = vadd.f32 %v5464_v54, %v2014_v12  ;;  %v2884_v12 = vld [vmem:[%s6819_s5 + $0x8] sm:$0xff] }
 0x30a   : > { %v1416_v24 = vpop.f32.mrf.mxu0  ;;  %2949 = vmatpush.msrb.mxu1 %v2885_v7 }
 0x30b   : > { %3802 = vmatmul.msk.f32.gmra.mxu3 %vm1323_vm0, %v2683_v22  ;;  %v2362_v29 = vpop.permute.xlu1 %2361  ;;  %1858 = vperm.xlu2 %4142, %v4185_v30   ;;  %v5819_v5 = vadd.f32 %v1541_v40, %v1416_v24  ;;  %v2050_v3 = vmax.f32 %v2032_v39, 0.0  ;;  %v2883_v22 = vld [vmem:[%s6819_s5] sm:$0xff]  ;;  %v2325_v39 = vmul.f32 %v2266_v27, %v4793_v38  ;;  %v7071_v27 = vld [vmem:[#allocation30_spill] sm:$0xff] }
 0x30c   : > { %2597 = vperm.xlu1 %4141, %v4183_v60   ;;  %v2582_v8 = vpop.permute.xlu2 %2581  ;;  %v2414_v26 = vmul.f32 %v2362_v29, %v4784_v13  ;;  %2950 = vmatpush.msrb.mxu1 %v2884_v12  ;;  %v3820_v12 = vld [vmem:[%s6819_s5 + $0x68] sm:$0xff] }
 0x30d   : > { %3764 = vmatmul.msk.f32.gmra.mxu2 %vm1323_vm0, %v2050_v3  ;;  %4163 = vset.pattern.permute.xlu0 %v6879_v58 }
 0x30e   : > { %v2432_v18 = vadd.f32 %v2414_v26, %v2324_v6  ;;  %2951 = vmatpush.msrb.mxu1 %v2883_v22  ;;  %v5874_v26 = vpop.f32.mrf.mxu2  ;;  %v2631_v6 = vmul.f32 %v2582_v8, %v4806_v17  ;;  %v3819_v22 = vld [vmem:[%s6819_s5 + $0x60] sm:$0xff] }
 0x30f   : > { %v5872_v3 = vpop.permute.xlu0 %2290 }
 0x310   : > { %v2540_v56 = vadd.f32 %v2522_v32, %v2432_v18 }
 0x313   : > { %4145 = vset.pattern.permute.xlu2 %v6962_v19 }
 0x314   : > { %4144 = vset.pattern.permute.xlu1 %v6879_v58  ;;  %v2578_v60 = vpop.permute.xlu1 %2577  ;;  %1966 = vperm.xlu2 %4145, %v4185_v30  }
 0x315   : > { %v2630_v51 = vmul.f32 %v2578_v60, %v4806_v17  ;;  %2385 = vperm.xlu1 %4144, %v4187_v41   ;;  %v2370_v43 = vpop.permute.xlu2 %2369 }
 0x316   : > { %v2416_v60 = vmul.f32 %v2370_v43, %v4784_v13 }
 0x317   : > { %v2648_v53 = vadd.f32 %v2630_v51, %v2540_v56  ;;  %v3822_v56 = vld [vmem:[%s6819_s5 + $0x78] sm:$0xff] }
 0x318   : > { %2915 = vmatpush.msrb.mxu0 %v3822_v56 }
 0x319   : > { %v2666_v52 = vadd.f32 %v5464_v54, %v2648_v53 }
 0x31b   : > { %v2684_v46 = vmax.f32 %v2666_v52, 0.0  ;;  %v5888_v52 = vpop.f32.mrf.mxu2 }
 0x31c   : > { %2601 = vperm.xlu2 %4145, %v4187_v41  }
 0x31d   : > { %4146 = vset.pattern.permute.xlu1 %v6898_v2  ;;  %3803 = vmatmul.msk.f32.gmra.mxu3 %vm1323_vm0, %v2684_v46  ;;  %v2366_v50 = vpop.permute.xlu1 %2365  ;;  %v3821_v46 = vld [vmem:[%s6819_s5 + $0x70] sm:$0xff] }
 0x31e   : > { %2493 = vperm.xlu1 %4146, %v4187_v41   ;;  %v2478_v45 = vpop.permute.xlu2 %2477  ;;  %v2415_v59 = vmul.f32 %v2366_v50, %v4784_v13  ;;  %v2632_v50 = vmul.f32 %v7070_v35, %v4806_v17  ;;  %2916 = vmatpush.msrb.mxu0 %v3821_v46  ;;  %v3816_v46 = vld [vmem:[%s6819_s5 + $0x48] sm:$0xff] }
 0x31f   : > { %v2524_v8 = vmul.f32 %v2478_v45, %v4797_v37  ;;  %v1691_v45 = vmul.f32 %v7071_v27, %v4793_v38  ;;  %v7073_v35 = vld [vmem:[#allocation101_spill] sm:$0xff] }
 0x320   : > { %v2433_v24 = vadd.f32 %v2415_v59, %v2325_v39  ;;  %2917 = vmatpush.msrb.mxu0 %v3820_v12 }
 0x321   : > { %v1799_v59 = vadd.f32 %v1781_v47, %v1691_v45 }
 0x322   : > { %2918 = vmatpush.msrb.mxu0 %v3819_v22 }
 0x324   : > { %4148 = vset.pattern.permute.xlu2 %v6879_v58 }
 0x325   : > { %2389 = vperm.xlu2 %4148, %v5813_v9  }
 0x326   : > { %4147 = vset.pattern.permute.xlu1 %v6867_v62  ;;  %v2474_v40 = vpop.permute.xlu1 %2473 }
 0x327   : > { %v2523_v29 = vmul.f32 %v2474_v40, %v4797_v37  ;;  %2295 = vperm.xlu1 %4147, %v5813_v9   ;;  %v5870_v30 = vpop.permute.xlu2 %2275 }
 0x329   : > { %v2541_v18 = vadd.f32 %v2523_v29, %v2433_v24 }
 0x32b   : > { %v2649_v49 = vadd.f32 %v2631_v6, %v2541_v18  ;;  %v4189_v18 = vld [vmem:[%s4368_s25 + $0x190] sm:$0xff] }
 0x32d   : > { %4150 = vset.pattern.permute.xlu2 %v6898_v2  ;;  %v2667_v32 = vadd.f32 %v5464_v54, %v2649_v49 }
 0x32e   : > { %2497 = vperm.xlu2 %4150, %v5813_v9   ;;  %v1843_v9 = vpop.permute.xlu0 %1842 }
 0x32f   : > { %4149 = vset.pattern.permute.xlu1 %v6962_v19  ;;  %v2271_v51 = vpop.permute.xlu1 %2270  ;;  %v2685_v41 = vmax.f32 %v2667_v32, 0.0  ;;  %v1889_v7 = vmul.f32 %v1843_v9, %v4797_v37  ;;  %v3818_v32 = vld [vmem:[%s6819_s5 + $0x58] sm:$0xff] }
 0x330   : > { %v2326_v33 = vmul.f32 %v2271_v51, %v4793_v38  ;;  %1970 = vperm.xlu1 %4149, %v4188_v42   ;;  %v1955_v53 = vpop.permute.xlu2 %1954  ;;  %2919 = vmatpush.msrb.mxu0 %v3818_v32 }
 0x331   : > { %3804 = vmatmul.msk.f32.gmra.mxu3 %vm1323_vm0, %v2685_v41  ;;  %v1907_v24 = vadd.f32 %v1889_v7, %v1799_v59  ;;  %v1998_v22 = vmul.f32 %v1955_v53, %v4806_v17 }
 0x332   : > { %v2434_v43 = vadd.f32 %v2416_v60, %v2326_v33  ;;  %v1521_v60 = vadd.f32 %v5681_v15, %v5722_v16  ;;  %v7072_v33 = vld [vmem:[#allocation77_spill] sm:$0xff]  ;;  %v5929_v15 = vld [vmem:[%s6818_s4] ss:$0 sm:$0xff] }
 0x333   : > { %v1999_v42 = vmul.f32 %v7072_v33, %v4806_v17 }
 0x334   : > { %v2542_v63 = vadd.f32 %v2524_v8, %v2434_v43  ;;  %v3817_v8 = vld [vmem:[%s6819_s5 + $0x50] sm:$0xff] }
 0x335   : > { %v2137_v29 = vpop.f32.mrf.mxu2  ;;  %2920 = vmatpush.msrb.mxu0 %v3817_v8 }
 0x336   : > { %4152 = vset.pattern.permute.xlu2 %v6867_v62  ;;  %v2650_v31 = vadd.f32 %v2632_v50, %v2542_v63  ;;  %v2191_v9 = vadd.f32 %v2137_v29, %v1521_v60  ;;  %v1782_v50 = vmul.f32 %v7073_v35, %v4784_v13  ;;  %v5952_v29 = vld [vmem:[%s4368_s25 + $0x230] sm:$0xff] }
 0x337   : > { %2300 = vperm.xlu2 %4152, %v5798_v14   ;;  %2921 = vmatpush.msrb.mxu0 %v3816_v46 }
 0x338   : > { %4151 = vset.pattern.permute.xlu1 %v6898_v2  ;;  %v1951_v39 = vpop.permute.xlu1 %1950  ;;  %v2668_v40 = vadd.f32 %v5464_v54, %v2650_v31  ;;  %2401 = vperm.xlu0 %4163, %v5952_v29  }
 0x339   : > { %v1997_v6 = vmul.f32 %v1951_v39, %v4806_v17  ;;  %1866 = vperm.xlu1 %4151, %v4189_v18   ;;  %v1851_v49 = vpop.permute.xlu2 %1850 }
 0x33a   : > { %v1891_v56 = vmul.f32 %v1851_v49, %v4797_v37  ;;  %v2686_v51 = vmax.f32 %v2668_v40, 0.0 }
 0x33b   : > { %v2015_v41 = vadd.f32 %v1997_v6, %v1907_v24  ;;  %v1524_v6 = vadd.f32 %v5710_v21, %v5740_v34 }
 0x33c   : > { %v1909_v43 = vadd.f32 %v1891_v56, %v5485_v61  ;;  %3805 = vmatmul.msk.f32.gmra.mxu3 %vm1323_vm0, %v2686_v51  ;;  %v7074_v61 = vld [vmem:[#allocation116_spill] sm:$0xff] }
 0x33d   : > { %v2772_v16 = vpop.f32.mrf.mxu3  ;;  %v2033_v47 = vadd.f32 %v5464_v54, %v2015_v41  ;;  %v1692_v63 = vmul.f32 %v7074_v61, %v4793_v38  ;;  %v3815_v54 = vld [vmem:[%s6819_s5 + $0x40] sm:$0xff] }
 0x33e   : > { %v2017_v27 = vadd.f32 %v1999_v42, %v1909_v43  ;;  %v2826_v45 = vadd.f32 %v2772_v16, %v2191_v9  ;;  %2922 = vmatpush.msrb.mxu0 %v3815_v54  ;;  %v5962_v51 = vld [vmem:[%s6816_s2] ss:$0 sm:$0xff]  ;;  %v2327_v43 = vmul.f32 %v5870_v30, %v4793_v38  ;;  %v2482_v16 = vpop.permute.xlu0 %2481 }
 0x33f   : > { %4154 = vset.pattern.permute.xlu2 %v6962_v19  ;;  %v2051_v7 = vmax.f32 %v2033_v47, 0.0  ;;  %v1800_v59 = vadd.f32 %v1782_v50, %v1692_v63  ;;  %v3790_v47 = vld [vmem:[%s4368_s25 + $0x228] sm:$0xff]  ;;  %v2525_v46 = vmul.f32 %v2482_v16, %v4797_v37 }
 0x340   : > { %v2847_v12 = vadd.f32 %v5929_v15, %v2826_v45  ;;  %1974 = vperm.xlu2 %4154, %v4189_v18   ;;  %4166 = vset.pattern.permute.xlu0 %v6867_v62 }
 0x341   : > { %4153 = vset.pattern.permute.xlu1 %v6879_v58  ;;  %3765 = vmatmul.msk.f32.gmra.mxu2 %vm1323_vm0, %v2051_v7  ;;  %v1847_v31 = vpop.permute.xlu1 %1846 }
 0x342   : > { %v2865_v39 = vmax.f32 %v2847_v12, 0.0  ;;  %v1890_v40 = vmul.f32 %v1847_v31, %v4797_v37  ;;  %2393 = vperm.xlu1 %4153, %v5798_v14   ;;  %v5949_v24 = vpop.permute.xlu2 %2377 }
 0x344   : > { %v1908_v18 = vadd.f32 %v1890_v40, %v1800_v59  ;;  %3825 = vmatmul.msk.f32.vlgmr.msrb.gmra.mxu1 %vm2900_vm1, %v2865_v39 }
 0x345   : > { %v2140_v49 = vpop.f32.mrf.mxu2  ;;  %v2775_v60 = vpop.f32.mrf.mxu3 }
 0x346   : > { %v2016_v32 = vadd.f32 %v1998_v22, %v1908_v18  ;;  %v2192_v53 = vadd.f32 %v2140_v49, %v1524_v6  ;;  %v5992_v6 = vld [vmem:[%s4368_s25 + $0x238] sm:$0xff]  ;;  %v2418_v49 = vmul.f32 %v5949_v24, %v4784_v13  ;;  %v1530_v24 = vadd.f32 %v5756_v57, %v5769_v4 }
 0x347   : > { %2315 = vperm.xlu0 %4166, %v5992_v6  }
 0x348   : > { %v2827_v56 = vadd.f32 %v2775_v60, %v2192_v53  ;;  %4157 = vset.pattern.permute.xlu2 %v6898_v2  ;;  %v2034_v41 = vadd.f32 %v5962_v51, %v2016_v32  ;;  %v4191_v53 = vld [vmem:[%s4368_s25 + $0x1a0] sm:$0xff] }
 0x349   : > { %1870 = vperm.xlu2 %4157, %v5826_v36   ;;  %v2035_v36 = vadd.f32 %v5962_v51, %v2017_v27  ;;  %v1527_v27 = vadd.f32 %v5731_v11, %v5758_v1 }
 0x34a   : > { %v2848_v21 = vadd.f32 %v5929_v15, %v2827_v56  ;;  %4156 = vset.pattern.permute.xlu1 %v6962_v19  ;;  %v2374_v34 = vpop.permute.xlu1 %2373  ;;  %v2052_v8 = vmax.f32 %v2034_v41, 0.0 }
 0x34b   : > { %2609 = vperm.xlu1 %4156, %v5798_v14   ;;  %v2594_v33 = vpop.permute.xlu2 %2593  ;;  %v2417_v9 = vmul.f32 %v2374_v34, %v4784_v13  ;;  %v2053_v35 = vmax.f32 %v2035_v36, 0.0 }
 0x34c   : > { %v2866_v42 = vmax.f32 %v2848_v21, 0.0  ;;  %3766 = vmatmul.msk.f32.gmra.mxu2 %vm1323_vm0, %v2052_v8  ;;  %v2634_v41 = vmul.f32 %v2594_v33, %v4806_v17 }
 0x34d   : > { %v2435_v14 = vadd.f32 %v2417_v9, %v2327_v43 }
 0x34e   : > { %3826 = vmatmul.msk.f32.gmra.mxu1 %vm2900_vm1, %v2866_v42 }
 0x34f   : > { %v2543_v61 = vadd.f32 %v2525_v46, %v2435_v14  ;;  %4170 = vset.pattern.permute.xlu0 %v6962_v19 }
 0x351   : > { %4159 = vset.pattern.permute.xlu2 %v6879_v58 }
 0x352   : > { %2397 = vperm.xlu2 %4159, %v3790_v47   ;;  %v2778_v31 = vpop.f32.mrf.mxu3 }
 0x353   : > { %4158 = vset.pattern.permute.xlu1 %v6867_v62  ;;  %v2590_v50 = vpop.permute.xlu1 %2589 }
 0x354   : > { %v2633_v63 = vmul.f32 %v2590_v50, %v4806_v17  ;;  %2305 = vperm.xlu1 %4158, %v3790_v47   ;;  %3767 = vmatmul.msk.f32.gmra.mxu2 %vm1323_vm0, %v2053_v35  ;;  %v5982_v30 = vpop.permute.xlu2 %2285  ;;  %v1784_v50 = vmul.f32 %v5304_v10, %v4784_v13 }
 0x356   : > { %v2651_v45 = vadd.f32 %v2633_v63, %v2543_v61  ;;  %v7075_v61 = vld [vmem:[#allocation6_spill] sm:$0xff] }
 0x357   : > { %v2143_v7 = vpop.f32.mrf.mxu2  ;;  %v1694_v63 = vmul.f32 %v7075_v61, %v4793_v38 }
 0x358   : > { %v2193_v54 = vadd.f32 %v2143_v7, %v1527_v27  ;;  %v2669_v12 = vadd.f32 %v5962_v51, %v2651_v45  ;;  %v7076_v45 = vld [vmem:[#allocation103_spill] sm:$0xff] }
 0x359   : > { %v1785_v7 = vmul.f32 %v7076_v45, %v4784_v13 }
 0x35a   : > { %v2828_v59 = vadd.f32 %v2778_v31, %v2193_v54  ;;  %4161 = vset.pattern.permute.xlu2 %v6962_v19  ;;  %v2687_v22 = vmax.f32 %v2669_v12, 0.0  ;;  %v7077_v54 = vld [vmem:[#allocation117_spill] sm:$0xff]  ;;  %v1802_v31 = vadd.f32 %v1784_v50, %v1694_v63 }
 0x35b   : > { %2613 = vperm.xlu2 %4161, %v3790_v47   ;;  %v1695_v12 = vmul.f32 %v7077_v54, %v4793_v38 }
 0x35c   : > { %v2849_v39 = vadd.f32 %v5929_v15, %v2828_v59  ;;  %4160 = vset.pattern.permute.xlu1 %v6898_v2  ;;  %3806 = vmatmul.msk.f32.gmra.mxu3 %vm1323_vm0, %v2687_v22  ;;  %v2281_v11 = vpop.permute.xlu1 %2280 }
 0x35d   : > { %2505 = vperm.xlu1 %4160, %v3790_v47   ;;  %v2490_v1 = vpop.permute.xlu2 %2489  ;;  %v2328_v32 = vmul.f32 %v2281_v11, %v4793_v38 }
 0x35e   : > { %v2867_v40 = vmax.f32 %v2849_v39, 0.0 }
 0x35f   : > { %v2146_v18 = vpop.f32.mrf.mxu2  ;;  %v2436_v21 = vadd.f32 %v2418_v49, %v2328_v32 }
 0x360   : > { %3823 = vmatmul.msk.f32.vlgmr.msrb.gmra.mxu0 %vm2900_vm1, %v2867_v40  ;;  %v2194_v9 = vadd.f32 %v2146_v18, %v1530_v24  ;;  %v1803_v40 = vadd.f32 %v1785_v7, %v1695_v12  ;;  %v2329_v18 = vmul.f32 %v5982_v30, %v4793_v38 }
 0x363   : > { %4162 = vset.pattern.permute.xlu2 %v6867_v62 }
 0x364   : > { %2310 = vperm.xlu2 %4162, %v5952_v29  }
 0x365   : > { %1874 = vperm.xlu1 %4160, %v4191_v53   ;;  %v2486_v60 = vpop.permute.xlu1 %2485  ;;  %v1859_v56 = vpop.permute.xlu2 %1858 }
 0x366   : > { %v2526_v34 = vmul.f32 %v2486_v60, %v4797_v37  ;;  %v1893_v22 = vmul.f32 %v1859_v56, %v4797_v37 }
 0x367   : > { %v2149_v8 = vpop.f32.mrf.mxu2 }
 0x368   : > { %v2544_v42 = vadd.f32 %v2526_v34, %v2436_v21  ;;  %v2195_v62 = vadd.f32 %v2149_v8, %v5779_v23 }
 0x36a   : > { %v2652_v43 = vadd.f32 %v2634_v41, %v2544_v42  ;;  %v2527_v41 = vmul.f32 %v2490_v1, %v4797_v37 }
 0x36b   : > { %v2781_v36 = vpop.f32.mrf.mxu3 }
 0x36c   : > { %v2829_v16 = vadd.f32 %v2781_v36, %v2194_v9  ;;  %4165 = vset.pattern.permute.xlu2 %v6898_v2  ;;  %v2670_v33 = vadd.f32 %v5962_v51, %v2652_v43 }
 0x36d   : > { %4164 = vset.pattern.permute.xlu1 %v6962_v19  ;;  %v1855_v47 = vpop.permute.xlu1 %1854  ;;  %2509 = vperm.xlu2 %4165, %v5952_v29  }
 0x36e   : > { %v2850_v46 = vadd.f32 %v5929_v15, %v2829_v16  ;;  %1982 = vperm.xlu1 %4164, %v4191_v53   ;;  %v1967_v57 = vpop.permute.xlu2 %1966  ;;  %v2688_v4 = vmax.f32 %v2670_v33, 0.0  ;;  %v1892_v27 = vmul.f32 %v1855_v47, %v4797_v37  ;;  %v7078_v53 = vld [vmem:[#allocation112_spill] sm:$0xff] }
 0x36f   : > { %v2152_v23 = vpop.f32.mrf.mxu2  ;;  %v2001_v49 = vmul.f32 %v1967_v57, %v4806_v17  ;;  %v2419_v60 = vmul.f32 %v7078_v53, %v4784_v13 }
 0x370   : > { %v2868_v14 = vmax.f32 %v2850_v46, 0.0  ;;  %v2196_v35 = vadd.f32 %v2152_v23, %v5790_v0  ;;  %3807 = vmatmul.msk.f32.gmra.mxu3 %vm1323_vm0, %v2688_v4  ;;  %v4192_v0 = vld [vmem:[%s4368_s25 + $0x1a8] sm:$0xff]  ;;  %v1910_v39 = vadd.f32 %v1892_v27, %v1802_v31  ;;  %v1863_v46 = vpop.permute.xlu0 %1862 }
 0x371   : > { %v2437_v34 = vadd.f32 %v2419_v60, %v2329_v18 }
 0x372   : > { %3824 = vmatmul.msk.f32.gmra.mxu0 %vm2900_vm1, %v2868_v14  ;;  %v2330_v14 = vmul.f32 %v5872_v3, %v4793_v38 }
 0x373   : > { %v2545_v43 = vadd.f32 %v2527_v41, %v2437_v34  ;;  %v3853_v41 = vld [vmem:[%s6819_s5 + $0x130] sm:$0xff] }
 0x375   : > { %1878 = vperm.xlu2 %4165, %v4192_v0  }
 0x376   : > { %2617 = vperm.xlu1 %4164, %v5952_v29   ;;  %v1963_v59 = vpop.permute.xlu1 %1962  ;;  %v2602_v10 = vpop.permute.xlu2 %2601  ;;  %v1911_v29 = vadd.f32 %v1893_v22, %v1803_v40 }
 0x377   : > { %v2000_v11 = vmul.f32 %v1963_v59, %v4806_v17  ;;  %v2636_v54 = vmul.f32 %v2602_v10, %v4806_v17 }
 0x378   : > { %v2019_v56 = vadd.f32 %v2001_v49, %v1911_v29  ;;  %v6056_v61 = vpop.permute.xlu0 %2501  ;;  %v3854_v49 = vld [vmem:[%s6819_s5 + $0x138] sm:$0xff] }
 0x379   : > { %v2018_v32 = vadd.f32 %v2000_v11, %v1910_v39  ;;  %3062 = vmatpush.msra.mxu0 %v3854_v49 }
 0x37a   : > { %v2037_v33 = vadd.f32 %v5962_v51, %v2019_v56 }
 0x37b   : > { %v2036_v21 = vadd.f32 %v5962_v51, %v2018_v32  ;;  %v1894_v32 = vmul.f32 %v1863_v46, %v4797_v37  ;;  %3063 = vmatpush.msra.mxu0 %v3853_v41 }
 0x37d   : > { %4168 = vset.pattern.permute.xlu2 %v6962_v19  ;;  %v2784_v8 = vpop.f32.mrf.mxu3  ;;  %v2054_v24 = vmax.f32 %v2036_v21, 0.0  ;;  %v3852_v21 = vld [vmem:[%s6819_s5 + $0x128] sm:$0xff] }
 0x37e   : > { %4167 = vset.pattern.permute.xlu1 %v6879_v58  ;;  %v6038_v30 = vadd.f32 %v2784_v8, %v2195_v62  ;;  %v2598_v42 = vpop.permute.xlu1 %2597  ;;  %1986 = vperm.xlu2 %4168, %v4192_v0   ;;  %v2155_v9 = vpop.f32.mrf.mxu2  ;;  %v2055_v62 = vmax.f32 %v2037_v33, 0.0  ;;  %v1912_v8 = vadd.f32 %v1894_v32, %v5526_v28  ;;  %v1787_v28 = vmul.f32 %v5334_v44, %v4784_v13 }
 0x37f   : > { %v2635_v36 = vmul.f32 %v2598_v42, %v4806_v17  ;;  %2405 = vperm.xlu1 %4167, %v5992_v6   ;;  %v2197_v1 = vadd.f32 %v2155_v9, %v5807_v48  ;;  %3768 = vmatmul.msk.f32.gmra.mxu2 %vm1323_vm0, %v2054_v24  ;;  %v2390_v16 = vpop.permute.xlu2 %2389  ;;  %v3851_v9 = vld [vmem:[%s6819_s5 + $0x120] sm:$0xff] }
 0x380   : > { %v2606_v22 = vpop.permute.xlu0 %2605  ;;  %3064 = vmatpush.msra.mxu0 %v3852_v21 }
 0x381   : > { %v2653_v19 = vadd.f32 %v2635_v36, %v2545_v43  ;;  %v2637_v18 = vmul.f32 %v2606_v22, %v4806_v17 }
 0x382   : > { %3065 = vmatpush.msra.mxu0 %v3851_v9 }
 0x383   : > { %v2671_v58 = vadd.f32 %v5962_v51, %v2653_v19  ;;  %v3849_v19 = vld [vmem:[%s6819_s5 + $0x110] sm:$0xff] }
 0x385   : > { %v2689_v47 = vmax.f32 %v2671_v58, 0.0  ;;  %v7079_v58 = vld [vmem:[#allocation105_spill] sm:$0xff] }
 0x386   : > { %2621 = vperm.xlu2 %4168, %v5992_v6  }
 0x387   : > { %4169 = vset.pattern.permute.xlu1 %v6898_v2  ;;  %3769 = vmatmul.msk.f32.gmra.mxu2 %vm1323_vm0, %v2055_v62  ;;  %v2386_v57 = vpop.permute.xlu1 %2385  ;;  %v1788_v62 = vmul.f32 %v7079_v58, %v4784_v13 }
 0x388   : > { %3808 = vmatmul.msk.f32.gmra.mxu3 %vm1323_vm0, %v2689_v47  ;;  %2513 = vperm.xlu1 %4169, %v5992_v6   ;;  %v2498_v48 = vpop.permute.xlu2 %2497  ;;  %v2420_v4 = vmul.f32 %v2386_v57, %v4784_v13  ;;  %v7080_v47 = vld [vmem:[#allocation17_spill] sm:$0xff]  ;;  %v1697_v57 = vmul.f32 %v5240_v55, %v4793_v38  ;;  %v1979_v55 = vpop.permute.xlu0 %1978 }
 0x389   : > { %v2529_v39 = vmul.f32 %v2498_v48, %v4797_v37  ;;  %v1698_v46 = vmul.f32 %v7080_v47, %v4793_v38  ;;  %v3848_v48 = vld [vmem:[%s6819_s5 + $0x108] sm:$0xff]  ;;  %v3864_v47 = vld [vmem:[%s6819_s5 + $0x178] sm:$0xff] }
 0x38a   : > { %v2438_v27 = vadd.f32 %v2420_v4, %v2330_v14  ;;  %v3847_v4 = vld [vmem:[%s6819_s5 + $0x100] sm:$0xff]  ;;  %3102 = vmatpush.msra.mxu1 %v3864_v47 }
 0x38e   : > { %v2787_v23 = vpop.f32.mrf.mxu3 }
 0x38f   : > { %v6054_v50 = vadd.f32 %v2787_v23, %v2196_v35  ;;  %v2421_v35 = vmul.f32 %v2390_v16, %v4784_v13  ;;  %v1805_v23 = vadd.f32 %v1787_v28, %v1697_v57  ;;  %v3832_v57 = vld [vmem:[%s6819_s5 + $0xa8] sm:$0xff] }
 0x390   : > { %v2494_v63 = vpop.permute.xlu1 %2493  ;;  %v2158_v2 = vpop.f32.mrf.mxu2 }
 0x391   : > { %v2528_v45 = vmul.f32 %v2494_v63, %v4797_v37  ;;  %v6060_v7 = vadd.f32 %v2158_v2, %v5819_v5  ;;  %v6062_v6 = vpop.permute.xlu2 %2300 }
 0x393   : > { %v2546_v12 = vadd.f32 %v2528_v45, %v2438_v27  ;;  %v1806_v27 = vadd.f32 %v1788_v62, %v1698_v46  ;;  %v3863_v46 = vld [vmem:[%s6819_s5 + $0x170] sm:$0xff] }
 0x394   : > { %3103 = vmatpush.msra.mxu1 %v3863_v46 }
 0x395   : > { %v2654_v31 = vadd.f32 %v2636_v54, %v2546_v12 }
 0x397   : > { %v2672_v3 = vadd.f32 %v5962_v51, %v2654_v31  ;;  %v2004_v31 = vmul.f32 %v1979_v55, %v4806_v17 }
 0x399   : > { %v2296_v0 = vpop.permute.xlu1 %2295  ;;  %v2690_v59 = vmax.f32 %v2672_v3, 0.0 }
 0x39a   : > { %v2331_v11 = vmul.f32 %v2296_v0, %v4793_v38  ;;  %v1975_v40 = vpop.permute.xlu2 %1974 }
 0x39b   : > { %3809 = vmatmul.msk.f32.gmra.mxu3 %vm1323_vm0, %v2690_v59  ;;  %v2003_v14 = vmul.f32 %v1975_v40, %v4806_v17 }
 0x39c   : > { %v2439_v5 = vadd.f32 %v2421_v35, %v2331_v11  ;;  %v3834_v11 = vld [vmem:[%s6819_s5 + $0xb8] sm:$0xff] }
 0x39d   : > { %2982 = vmatpush.msra.mxu2 %v3834_v11 }
 0x39e   : > { %v2547_v10 = vadd.f32 %v2529_v39, %v2439_v5  ;;  %v3844_v5 = vld [vmem:[%s6819_s5 + $0xf8] sm:$0xff] }
 0x39f   : > { %3022 = vmatpush.msrb.mxu3 %v3844_v5  ;;  %v3858_v5 = vld [vmem:[%s6819_s5 + $0x148] sm:$0xff] }
 0x3a0   : > { %v2655_v53 = vadd.f32 %v2637_v18, %v2547_v10  ;;  %v2790_v60 = vpop.f32.mrf.mxu3  ;;  %v2332_v10 = vmul.f32 %v6062_v6, %v4793_v38 }
 0x3a1   : > { %v6078_v29 = vadd.f32 %v2790_v60, %v2197_v1  ;;  %v3850_v1 = vld [vmem:[%s6819_s5 + $0x118] sm:$0xff]  ;;  %v2530_v60 = vmul.f32 %v6056_v61, %v4797_v37  ;;  %v3833_v61 = vld [vmem:[%s6819_s5 + $0xb0] sm:$0xff] }
 0x3a2   : > { %v1971_v34 = vpop.permute.xlu1 %1970  ;;  %v2673_v56 = vadd.f32 %v5962_v51, %v2655_v53  ;;  %3066 = vmatpush.msra.mxu0 %v3850_v1  ;;  %v3843_v1 = vld [vmem:[%s6819_s5 + $0xf0] sm:$0xff]  ;;  %2983 = vmatpush.msra.mxu2 %v3833_v61 }
 0x3a3   : > { %v2002_v24 = vmul.f32 %v1971_v34, %v4806_v17  ;;  %v1871_v36 = vpop.permute.xlu2 %1870  ;;  %3023 = vmatpush.msrb.mxu3 %v3843_v1 }
 0x3a4   : > { %v2691_v42 = vmax.f32 %v2673_v56, 0.0  ;;  %3067 = vmatpush.msra.mxu0 %v3849_v19  ;;  %v1896_v63 = vmul.f32 %v1871_v36, %v4797_v37  ;;  %v1419_v56 = vpop.f32.mrf.mxu0  ;;  %2984 = vmatpush.msra.mxu2 %v3832_v57  ;;  %v3840_v57 = vld [vmem:[%s6819_s5 + $0xd8] sm:$0xff] }
 0x3a5   : > { %v2020_v43 = vadd.f32 %v2002_v24, %v1912_v8  ;;  %v1544_v24 = vpop.f32.mrf.mxu1 }
 0x3a6   : > { %3810 = vmatmul.msk.f32.gmra.mxu3 %vm1323_vm0, %v2691_v42  ;;  %3068 = vmatpush.msra.mxu0 %v3848_v48  ;;  %v1914_v12 = vadd.f32 %v1896_v63, %v1806_v27  ;;  %v1545_v9 = vadd.f32 %v1544_v24, %v1419_v56  ;;  %v3831_v27 = vld [vmem:[%s6819_s5 + $0xa0] sm:$0xff] }
 0x3a7   : > { %v2038_v16 = vadd.f32 %v5962_v51, %v2020_v43  ;;  %2985 = vmatpush.msra.mxu2 %v3831_v27  ;;  %v3837_v27 = vld [vmem:[%s6819_s5 + $0xc0] sm:$0xff] }
 0x3a8   : > { %3069 = vmatpush.msra.mxu0 %v3847_v4  ;;  %v2022_v0 = vadd.f32 %v2004_v31, %v1914_v12  ;;  %v3860_v31 = vld [vmem:[%s6819_s5 + $0x158] sm:$0xff] }
 0x3a9   : > { %v2056_v33 = vmax.f32 %v2038_v16, 0.0 }
 0x3aa   : > { %v2040_v32 = vadd.f32 %v5962_v51, %v2022_v0  ;;  %v3859_v0 = vld [vmem:[%s6819_s5 + $0x150] sm:$0xff] }
 0x3ab   : > { %3770 = vmatmul.msk.f32.gmra.mxu2 %vm1323_vm0, %v2056_v33  ;;  %v1867_v44 = vpop.permute.xlu1 %1866 }
 0x3ac   : > { %v1895_v2 = vmul.f32 %v1867_v44, %v4797_v37  ;;  %v2398_v54 = vpop.permute.xlu2 %2397  ;;  %v2058_v41 = vmax.f32 %v2040_v32, 0.0  ;;  %v1422_v32 = vpop.f32.mrf.mxu0 }
 0x3ad   : > { %v2423_v48 = vmul.f32 %v2398_v54, %v4784_v13  ;;  %v3830_v54 = vld [vmem:[%s6819_s5 + $0x98] sm:$0xff] }
 0x3ae   : > { %v1913_v45 = vadd.f32 %v1895_v2, %v1805_v23  ;;  %v3862_v23 = vld [vmem:[%s6819_s5 + $0x168] sm:$0xff]  ;;  %2986 = vmatpush.msra.mxu2 %v3830_v54 }
 0x3af   : > { %3104 = vmatpush.msra.mxu1 %v3862_v23 }
 0x3b0   : > { %v2021_v3 = vadd.f32 %v2003_v14, %v1913_v45  ;;  %v3861_v45 = vld [vmem:[%s6819_s5 + $0x160] sm:$0xff] }
 0x3b1   : > { %3105 = vmatpush.msra.mxu1 %v3861_v45 }
 0x3b2   : > { %v2039_v35 = vadd.f32 %v5962_v51, %v2021_v3 }
 0x3b3   : > { %3106 = vmatpush.msra.mxu1 %v3860_v31 }
 0x3b4   : > { %v2793_v59 = vpop.f32.mrf.mxu3  ;;  %v2394_v22 = vpop.permute.xlu1 %2393  ;;  %v2057_v39 = vmax.f32 %v2039_v35, 0.0  ;;  %v3829_v35 = vld [vmem:[%s6819_s5 + $0x90] sm:$0xff] }
 0x3b5   : > { %v6124_v40 = vadd.f32 %v2793_v59, %v6060_v7  ;;  %v2422_v18 = vmul.f32 %v2394_v22, %v4784_v13  ;;  %v2614_v49 = vpop.permute.xlu2 %2613  ;;  %2987 = vmatpush.msra.mxu2 %v3829_v35  ;;  %3107 = vmatpush.msra.mxu1 %v3859_v0  ;;  %v1425_v45 = vpop.f32.mrf.mxu0 }
 0x3b6   : > { %3771 = vmatmul.msk.f32.gmra.mxu2 %vm1323_vm0, %v2057_v39  ;;  %v2639_v63 = vmul.f32 %v2614_v49, %v4806_v17  ;;  %v3828_v39 = vld [vmem:[%s6819_s5 + $0x88] sm:$0xff]  ;;  %v3827_v49 = vld [vmem:[%s6819_s5 + $0x80] sm:$0xff] }
 0x3b7   : > { %v2440_v53 = vadd.f32 %v2422_v18, %v2332_v10  ;;  %2988 = vmatpush.msra.mxu2 %v3828_v39  ;;  %v3842_v10 = vld [vmem:[%s6819_s5 + $0xe8] sm:$0xff]  ;;  %3108 = vmatpush.msra.mxu1 %v3858_v5 }
 0x3b8   : > { %3024 = vmatpush.msrb.mxu3 %v3842_v10 }
 0x3b9   : > { %v2548_v7 = vadd.f32 %v2530_v60, %v2440_v53  ;;  %2989 = vmatpush.msra.mxu2 %v3827_v49  ;;  %v3857_v53 = vld [vmem:[%s6819_s5 + $0x140] sm:$0xff]  ;;  %v1547_v60 = vpop.f32.mrf.mxu1 }
 0x3ba   : > { %3109 = vmatpush.msra.mxu1 %v3857_v53  ;;  %v3873_v53 = vld [vmem:[%s6819_s5 + $0x1b0] sm:$0xff] }
 0x3bd   : > { %v2610_v21 = vpop.permute.xlu1 %2609 }
 0x3be   : > { %v2638_v34 = vmul.f32 %v2610_v21, %v4806_v17  ;;  %3772 = vmatmul.msk.f32.gmra.mxu2 %vm1323_vm0, %v2058_v41  ;;  %v6135_v42 = vpop.permute.xlu2 %2310  ;;  %v1548_v21 = vadd.f32 %v1547_v60, %v1422_v32  ;;  %v3874_v32 = vld [vmem:[%s6819_s5 + $0x1b8] sm:$0xff] }
 0x3bf   : > { %v2796_v28 = vpop.f32.mrf.mxu3  ;;  %3142 = vmatpush.msrb.mxu2 %v3874_v32 }
 0x3c0   : > { %v2656_v8 = vadd.f32 %v2638_v34, %v2548_v7  ;;  %v2402_v34 = vpop.permute.xlu0 %2401 }
 0x3c1   : > { %3143 = vmatpush.msrb.mxu2 %v3873_v53  ;;  %v3894_v53 = vld [vmem:[%s6819_s5 + $0x238] sm:$0xff] }
 0x3c2   : > { %v2674_v6 = vadd.f32 %v5962_v51, %v2656_v8  ;;  %3222 = vmatpush.msrb.mxu0 %v3894_v53  ;;  %v3908_v53 = vld [vmem:[%s6821_s7 + $0xd8] sm:$0xff] }
 0x3c4   : > { %v2161_v43 = vpop.f32.mrf.mxu2  ;;  %v2692_v36 = vmax.f32 %v2674_v6, 0.0  ;;  %v2424_v6 = vmul.f32 %v2402_v34, %v4784_v13 }
 0x3c5   : > { %v2199_v16 = vadd.f32 %v2161_v43, %v1545_v9 }
 0x3c6   : > { %3811 = vmatmul.msk.f32.gmra.mxu3 %vm1323_vm0, %v2692_v36  ;;  %v2306_v19 = vpop.permute.xlu1 %2305  ;;  %v2334_v36 = vmul.f32 %v6135_v42, %v4793_v38 }
 0x3c7   : > { %v2834_v33 = vadd.f32 %v2796_v28, %v2199_v16  ;;  %v2333_v44 = vmul.f32 %v2306_v19, %v4793_v38  ;;  %v2510_v4 = vpop.permute.xlu2 %2509 }
 0x3c8   : > { %v2532_v47 = vmul.f32 %v2510_v4, %v4797_v37  ;;  %v2442_v46 = vadd.f32 %v2424_v6, %v2334_v36  ;;  %v2316_v39 = vpop.permute.xlu0 %2315 }
 0x3c9   : > { %v2855_v58 = vadd.f32 %v5929_v15, %v2834_v33  ;;  %v2441_v2 = vadd.f32 %v2423_v48, %v2333_v44  ;;  %v3839_v48 = vld [vmem:[%s6819_s5 + $0xd0] sm:$0xff]  ;;  %v2335_v49 = vmul.f32 %v2316_v39, %v4793_v38  ;;  %v3877_v39 = vld [vmem:[%s6819_s5 + $0x1c0] sm:$0xff] }
 0x3ca   : > { %v2550_v4 = vadd.f32 %v2532_v47, %v2442_v46 }
 0x3cb   : > { %v2873_v62 = vmax.f32 %v2855_v58, 0.0  ;;  %v3841_v58 = vld [vmem:[%s6819_s5 + $0xe0] sm:$0xff] }
 0x3cc   : > { %3025 = vmatpush.msrb.mxu3 %v3841_v58 }
 0x3cd   : > { %3855 = vmatmul.msk.f32.vlgmr.msra.gmra.mxu0 %vm2900_vm1, %v2873_v62 }
 0x3ce   : > { %3026 = vmatpush.msrb.mxu3 %v3840_v57 }
 0x3cf   : > { %v2506_v14 = vpop.permute.xlu1 %2505  ;;  %v1879_v59 = vpop.permute.xlu2 %1878 }
 0x3d0   : > { %v2531_v55 = vmul.f32 %v2506_v14, %v4797_v37  ;;  %v2164_v41 = vpop.f32.mrf.mxu2  ;;  %v1898_v61 = vmul.f32 %v1879_v59, %v4797_v37  ;;  %3027 = vmatpush.msrb.mxu3 %v3839_v48 }
 0x3d1   : > { %v2200_v56 = vadd.f32 %v2164_v41, %v1548_v21 }
 0x3d2   : > { %v2549_v12 = vadd.f32 %v2531_v55, %v2441_v2  ;;  %v1916_v42 = vadd.f32 %v1898_v61, %v5377_v25  ;;  %v3869_v61 = vld [vmem:[%s6819_s5 + $0x190] sm:$0xff] }
 0x3d4   : > { %v2657_v3 = vadd.f32 %v2639_v63, %v2549_v12  ;;  %v3838_v63 = vld [vmem:[%s6819_s5 + $0xc8] sm:$0xff]  ;;  %v1550_v12 = vpop.f32.mrf.mxu1 }
 0x3d5   : > { %3028 = vmatpush.msrb.mxu3 %v3838_v63  ;;  %v1551_v0 = vadd.f32 %v1550_v12, %v1425_v45  ;;  %v3882_v45 = vld [vmem:[%s6819_s5 + $0x1e8] sm:$0xff]  ;;  %v3880_v12 = vld [vmem:[%s6819_s5 + $0x1d8] sm:$0xff] }
 0x3d6   : > { %v2675_v22 = vadd.f32 %v5962_v51, %v2657_v3 }
 0x3d7   : > { %v1875_v11 = vpop.permute.xlu1 %1874  ;;  %3029 = vmatpush.msrb.mxu3 %v3837_v27 }
 0x3d8   : > { %v2693_v18 = vmax.f32 %v2675_v22, 0.0  ;;  %v1897_v7 = vmul.f32 %v1875_v11, %v4797_v37  ;;  %v1987_v24 = vpop.permute.xlu2 %1986  ;;  %v2167_v31 = vpop.f32.mrf.mxu2  ;;  %v2851_v11 = vadd.f32 %v5929_v15, %v6038_v30  ;;  %v3872_v30 = vld [vmem:[%s6819_s5 + $0x1a8] sm:$0xff] }
 0x3d9   : > { %v2006_v19 = vmul.f32 %v1987_v24, %v4806_v17  ;;  %v2201_v22 = vadd.f32 %v2167_v31, %v1551_v0  ;;  %3144 = vmatpush.msrb.mxu2 %v3872_v30 }
 0x3da   : > { %3812 = vmatmul.msk.f32.gmra.mxu3 %vm1323_vm0, %v2693_v18  ;;  %v1915_v1 = vadd.f32 %v1897_v7, %v5563_v20  ;;  %v2869_v41 = vmax.f32 %v2851_v11, 0.0  ;;  %v3871_v7 = vld [vmem:[%s6819_s5 + $0x1a0] sm:$0xff] }
 0x3db   : > { %v2024_v44 = vadd.f32 %v2006_v19, %v1916_v42  ;;  %3145 = vmatpush.msrb.mxu2 %v3871_v7  ;;  %v2853_v19 = vadd.f32 %v5929_v15, %v6078_v29 }
 0x3dd   : > { %v2042_v55 = vadd.f32 %v5962_v51, %v2024_v44 }
 0x3df   : > { %v2799_v8 = vpop.f32.mrf.mxu3  ;;  %v2060_v3 = vmax.f32 %v2042_v55, 0.0  ;;  %v3884_v55 = vld [vmem:[%s6819_s5 + $0x1f8] sm:$0xff] }
 0x3e0   : > { %v2835_v9 = vadd.f32 %v2799_v8, %v2200_v56  ;;  %v1983_v43 = vpop.permute.xlu1 %1982  ;;  %v2852_v56 = vadd.f32 %v5929_v15, %v6054_v50  ;;  %3182 = vmatpush.msra.mxu3 %v3884_v55  ;;  %v3912_v55 = vld [vmem:[%s6821_s7 + $0xf8] sm:$0xff] }
 0x3e1   : > { %v2005_v16 = vmul.f32 %v1983_v43, %v4806_v17 }
 0x3e2   : > { %v2856_v28 = vadd.f32 %v5929_v15, %v2835_v9  ;;  %v3870_v9 = vld [vmem:[%s6819_s5 + $0x198] sm:$0xff]  ;;  %v2870_v43 = vmax.f32 %v2852_v56, 0.0  ;;  %v3892_v56 = vld [vmem:[%s6819_s5 + $0x228] sm:$0xff] }
 0x3e3   : > { %v2023_v33 = vadd.f32 %v2005_v16, %v1915_v1  ;;  %3146 = vmatpush.msrb.mxu2 %v3870_v9  ;;  %v3867_v1 = vld [vmem:[%s6819_s5 + $0x180] sm:$0xff]  ;;  %v1428_v16 = vpop.f32.mrf.mxu0  ;;  %v3889_v9 = vld [vmem:[%s6819_s5 + $0x210] sm:$0xff] }
 0x3e4   : > { %v2874_v62 = vmax.f32 %v2856_v28, 0.0  ;;  %v1553_v28 = vpop.f32.mrf.mxu1 }
 0x3e5   : > { %v2041_v20 = vadd.f32 %v5962_v51, %v2023_v33  ;;  %3147 = vmatpush.msrb.mxu2 %v3869_v61  ;;  %v1554_v33 = vadd.f32 %v1553_v28, %v1428_v16 }
 0x3e6   : > { %3856 = vmatmul.msk.f32.gmra.mxu0 %vm2900_vm1, %v2874_v62  ;;  %v2871_v62 = vmax.f32 %v2853_v19, 0.0 }
 0x3e7   : > { %v2059_v23 = vmax.f32 %v2041_v20, 0.0  ;;  %v2854_v20 = vadd.f32 %v5929_v15, %v6124_v40  ;;  %v3883_v40 = vld [vmem:[%s6819_s5 + $0x1f0] sm:$0xff] }
 0x3e8   : > { %v2618_v14 = vpop.permute.xlu1 %2617  ;;  %3183 = vmatpush.msra.mxu3 %v3883_v40  ;;  %v3928_v40 = vld [vmem:[%s6821_s7 + $0x178] sm:$0xff] }
 0x3e9   : > { %v2640_v25 = vmul.f32 %v2618_v14, %v4806_v17  ;;  %3773 = vmatmul.msk.f32.gmra.mxu2 %vm1323_vm0, %v2059_v23  ;;  %v2872_v48 = vmax.f32 %v2854_v20, 0.0  ;;  %v4193_v20 = vld [vmem:[%s6818_s4] ss:$0 sm:$0xff] }
 0x3ea   : > { %3184 = vmatpush.msra.mxu3 %v3882_v45  ;;  %v3911_v45 = vld [vmem:[%s6821_s7 + $0xf0] sm:$0xff] }
 0x3eb   : > { %v2658_v2 = vadd.f32 %v2640_v25, %v2550_v4  ;;  %v1431_v29 = vpop.f32.mrf.mxu0 }
 0x3ec   : > { %v1556_v44 = vpop.f32.mrf.mxu1 }
 0x3ed   : > { %v2676_v54 = vadd.f32 %v5962_v51, %v2658_v2  ;;  %v1557_v14 = vadd.f32 %v1556_v44, %v1431_v29 }
 0x3ef   : > { %v2694_v35 = vmax.f32 %v2676_v54, 0.0  ;;  %v3881_v54 = vld [vmem:[%s6819_s5 + $0x1e0] sm:$0xff] }
 0x3f0   : > { %3185 = vmatpush.msra.mxu3 %v3881_v54  ;;  %v3927_v54 = vld [vmem:[%s6821_s7 + $0x170] sm:$0xff] }
 0x3f1   : > { %3774 = vmatmul.msk.f32.gmra.mxu2 %vm1323_vm0, %v2060_v3  ;;  %3813 = vmatmul.msk.f32.gmra.mxu3 %vm1323_vm0, %v2694_v35  ;;  %v2406_v59 = vpop.permute.xlu1 %2405  ;;  %v3879_v3 = vld [vmem:[%s6819_s5 + $0x1d0] sm:$0xff] }
 0x3f2   : > { %v2425_v10 = vmul.f32 %v2406_v59, %v4784_v13  ;;  %v2622_v13 = vpop.permute.xlu2 %2621  ;;  %3186 = vmatpush.msra.mxu3 %v3880_v12  ;;  %v3878_v59 = vld [vmem:[%s6819_s5 + $0x1c8] sm:$0xff]  ;;  %v3259_v12 = vld [vmem:[%s6821_s7 + $0x60] sm:$0xff] }
 0x3f3   : > { %v2802_v5 = vpop.f32.mrf.mxu3  ;;  %v2641_v24 = vmul.f32 %v2622_v13, %v4806_v17  ;;  %v3868_v17 = vld [vmem:[%s6819_s5 + $0x188] sm:$0xff]  ;;  %v1434_v31 = vpop.f32.mrf.mxu0 }
 0x3f4   : > { %v2836_v18 = vadd.f32 %v2802_v5, %v2201_v22  ;;  %v2443_v38 = vadd.f32 %v2425_v10, %v2335_v49  ;;  %3148 = vmatpush.msrb.mxu2 %v3868_v17  ;;  %v1559_v35 = vpop.f32.mrf.mxu1  ;;  %3187 = vmatpush.msra.mxu3 %v3879_v3  ;;  %v3887_v17 = vld [vmem:[%s6819_s5 + $0x200] sm:$0xff]  ;;  %v3910_v3 = vld [vmem:[%s6821_s7 + $0xe8] sm:$0xff] }
 0x3f5   : > { %v1560_v0 = vadd.f32 %v1559_v35, %v1434_v31  ;;  %v3943_v31 = vld [vmem:[%s6821_s7 + $0x1f0] sm:$0xff]  ;;  %v3926_v35 = vld [vmem:[%s6821_s7 + $0x168] sm:$0xff] }
 0x3f6   : > { %v2857_v60 = vadd.f32 %v5929_v15, %v2836_v18  ;;  %3149 = vmatpush.msrb.mxu2 %v3867_v1  ;;  %3188 = vmatpush.msra.mxu3 %v3878_v59  ;;  %v3258_v59 = vld [vmem:[%s6821_s7 + $0x58] sm:$0xff] }
 0x3f8   : > { %v2875_v21 = vmax.f32 %v2857_v60, 0.0  ;;  %3189 = vmatpush.msra.mxu3 %v3877_v39  ;;  %v3925_v39 = vld [vmem:[%s6821_s7 + $0x160] sm:$0xff] }
 0x3f9   : > { %3835 = vmatmul.msk.f32.vlgmr.msra.gmra.mxu2 %vm2900_vm1, %v2869_v41 }
 0x3fa   : > { %3865 = vmatmul.msk.f32.vlgmr.msra.gmra.mxu1 %vm2900_vm1, %v2875_v21  ;;  %v2514_v34 = vpop.permute.xlu1 %2513  ;;  %3304 = vmatpush.msra.mxu2 %v3912_v55  ;;  %v3913_v55 = vld [vmem:[%s6821_s7 + $0x100] sm:$0xff] }
 0x3fb   : > { %v2533_v8 = vmul.f32 %v2514_v34, %v4797_v37  ;;  %v1437_v32 = vpop.f32.mrf.mxu0  ;;  %v3893_v34 = vld [vmem:[%s6819_s5 + $0x230] sm:$0xff] }
 0x3fc   : > { %v1562_v60 = vpop.f32.mrf.mxu1  ;;  %3223 = vmatpush.msrb.mxu0 %v3893_v34  ;;  %3305 = vmatpush.msra.mxu2 %v3911_v45  ;;  %v3906_v34 = vld [vmem:[%s6821_s7 + $0xc8] sm:$0xff]  ;;  %v3976_v45 = vld [vmem:[%s6821_s7 + $0x2f8] sm:$0xff] }
 0x3fd   : > { %v2551_v6 = vadd.f32 %v2533_v8, %v2443_v38  ;;  %v1563_v30 = vadd.f32 %v1562_v60, %v1437_v32  ;;  %v3253_v32 = vld [vmem:[%s6821_s7 + $0x30] sm:$0xff]  ;;  %v3924_v60 = vld [vmem:[%s6821_s7 + $0x158] sm:$0xff] }
 0x3fe   : > { %3224 = vmatpush.msrb.mxu0 %v3892_v56  ;;  %3306 = vmatpush.msra.mxu2 %v3910_v3  ;;  %v3922_v56 = vld [vmem:[%s6821_s7 + $0x148] sm:$0xff]  ;;  %v3975_v3 = vld [vmem:[%s6821_s7 + $0x2f0] sm:$0xff] }
 0x3ff   : > { %v2659_v36 = vadd.f32 %v2641_v24, %v2551_v6  ;;  %v3891_v24 = vld [vmem:[%s6819_s5 + $0x220] sm:$0xff]  ;;  %v3890_v6 = vld [vmem:[%s6819_s5 + $0x218] sm:$0xff] }
 0x400   : > { %3225 = vmatpush.msrb.mxu0 %v3891_v24  ;;  %v3250_v24 = vld [vmem:[%s6821_s7 + $0x18] sm:$0xff] }
 0x401   : > { %3836 = vmatmul.msk.f32.gmra.mxu2 %vm2900_vm1, %v2870_v43  ;;  %v2677_v50 = vadd.f32 %v5962_v51, %v2659_v36  ;;  %v3888_v36 = vld [vmem:[%s6819_s5 + $0x208] sm:$0xff] }
 0x402   : > { %v2170_v51 = vpop.f32.mrf.mxu2  ;;  %3226 = vmatpush.msrb.mxu0 %v3890_v6  ;;  %v3905_v6 = vld [vmem:[%s6821_s7 + $0xc0] sm:$0xff] }
 0x403   : > { %v2695_v37 = vmax.f32 %v2677_v50, 0.0  ;;  %v2202_v58 = vadd.f32 %v2170_v51, %v1554_v33  ;;  %v1440_v43 = vpop.f32.mrf.mxu0 }
 0x404   : > { %3227 = vmatpush.msrb.mxu0 %v3889_v9  ;;  %v1565_v61 = vpop.f32.mrf.mxu1  ;;  %v3921_v9 = vld [vmem:[%s6821_s7 + $0x140] sm:$0xff] }
 0x405   : > { %3814 = vmatmul.msk.f32.gmra.mxu3 %vm1323_vm0, %v2695_v37  ;;  %v1566_v37 = vadd.f32 %v1565_v61, %v1440_v43  ;;  %v3937_v43 = vld [vmem:[%s6821_s7 + $0x1c0] sm:$0xff]  ;;  %v3904_v61 = vld [vmem:[%s6821_s7 + $0xb8] sm:$0xff] }
 0x406   : > { %3228 = vmatpush.msrb.mxu0 %v3888_v36  ;;  %v3249_v36 = vld [vmem:[%s6821_s7 + $0x10] sm:$0xff] }
 0x408   : > { %3229 = vmatpush.msrb.mxu0 %v3887_v17  ;;  %v3936_v17 = vld [vmem:[%s6821_s7 + $0x1b8] sm:$0xff] }
 0x40a   : > { %v2173_v23 = vpop.f32.mrf.mxu2 }
 0x40b   : > { %v2805_v47 = vpop.f32.mrf.mxu3  ;;  %v2203_v4 = vadd.f32 %v2173_v23, %v1557_v14  ;;  %v1443_v33 = vpop.f32.mrf.mxu0 }
 0x40c   : > { %v2837_v42 = vadd.f32 %v2805_v47, %v2202_v58 }
 0x40d   : > { %3845 = vmatmul.msk.f32.vlgmr.msrb.gmra.mxu3 %vm2900_vm1, %v2871_v62  ;;  %v1569_v62 = vadd.f32 %v5874_v26, %v1443_v33  ;;  %v3918_v33 = vld [vmem:[%s6821_s7 + $0x128] sm:$0xff] }
 0x40e   : > { %v2858_v46 = vadd.f32 %v5929_v15, %v2837_v42  ;;  %3344 = vmatpush.msrb.mxu3 %v3928_v40  ;;  %v3929_v40 = vld [vmem:[%s6821_s7 + $0x180] sm:$0xff] }
 0x410   : > { %v2876_v57 = vmax.f32 %v2858_v46, 0.0  ;;  %3345 = vmatpush.msrb.mxu3 %v3927_v54  ;;  %v3992_v54 = vld [vmem:[%s6821_s7 + $0x378] sm:$0xff] }
 0x412   : > { %3866 = vmatmul.msk.f32.gmra.mxu1 %vm2900_vm1, %v2876_v57  ;;  %3346 = vmatpush.msrb.mxu3 %v3926_v35  ;;  %v3991_v35 = vld [vmem:[%s6821_s7 + $0x370] sm:$0xff] }
 0x413   : > { %v1446_v29 = vpop.f32.mrf.mxu0 }
 0x414   : > { %v1572_v44 = vadd.f32 %v5888_v52, %v1446_v29  ;;  %v3260_v52 = vld [vmem:[%s6821_s7 + $0x68] sm:$0xff]  ;;  %3347 = vmatpush.msrb.mxu3 %v3925_v39  ;;  %v3932_v29 = vld [vmem:[%s6821_s7 + $0x198] sm:$0xff] }
 0x415   : > { %3846 = vmatmul.msk.f32.gmra.mxu3 %vm2900_vm1, %v2872_v48  ;;  %v3990_v39 = vld [vmem:[%s6821_s7 + $0x368] sm:$0xff] }
 0x416   : > { %3348 = vmatpush.msrb.mxu3 %v3924_v60  ;;  %v3988_v60 = vld [vmem:[%s6821_s7 + $0x358] sm:$0xff] }
 0x41e   : > { %v2808_v25 = vpop.f32.mrf.mxu3 }
 0x41f   : > { %v2838_v63 = vadd.f32 %v2808_v25, %v2203_v4 }
 0x421   : > { %v2859_v2 = vadd.f32 %v5929_v15, %v2838_v63  ;;  %v3262_v63 = vld [vmem:[%s6821_s7 + $0x78] sm:$0xff] }
 0x422   : > { %3263 = vmatpush.msrb.mxu1 %v3262_v63  ;;  %v3930_v63 = vld [vmem:[%s6821_s7 + $0x188] sm:$0xff] }
 0x423   : > { %v2877_v27 = vmax.f32 %v2859_v2, 0.0  ;;  %v3261_v2 = vld [vmem:[%s6821_s7 + $0x70] sm:$0xff] }
 0x424   : > { %3264 = vmatpush.msrb.mxu1 %v3261_v2  ;;  %v3956_v2 = vld [vmem:[%s6821_s7 + $0x258] sm:$0xff] }
 0x425   : > { %3875 = vmatmul.msk.f32.vlgmr.msrb.gmra.mxu2 %vm2900_vm1, %v2877_v27  ;;  %v3944_v27 = vld [vmem:[%s6821_s7 + $0x1f8] sm:$0xff] }
 0x426   : > { %3384 = vmatpush.msra.mxu0 %v3944_v27  ;;  %3265 = vmatpush.msrb.mxu1 %v3260_v52  ;;  %v3897_v52 = vld [vmem:[%s6821_s7 + $0x80] sm:$0xff]  ;;  %v3955_v27 = vld [vmem:[%s6821_s7 + $0x250] sm:$0xff] }
 0x428   : > { %3385 = vmatpush.msra.mxu0 %v3943_v31  ;;  %3266 = vmatpush.msrb.mxu1 %v3259_v12  ;;  %v4008_v12 = vld [vmem:[%s6821_s7 + $0x3f8] sm:$0xff]  ;;  %v3954_v31 = vld [vmem:[%s6821_s7 + $0x248] sm:$0xff] }
 0x429   : > { %v2811_v5 = vpop.f32.mrf.mxu3 }
 0x42a   : > { %3267 = vmatpush.msrb.mxu1 %v3258_v59  ;;  %v3953_v59 = vld [vmem:[%s6821_s7 + $0x240] sm:$0xff] }
 0x42e   : > { %v2176_v22 = vpop.f32.mrf.mxu2 }
 0x42f   : > { %v2204_v11 = vadd.f32 %v2176_v22, %v1560_v0  ;;  %v3942_v0 = vld [vmem:[%s6821_s7 + $0x1e8] sm:$0xff]  ;;  %v3909_v22 = vld [vmem:[%s6821_s7 + $0xe0] sm:$0xff] }
 0x430   : > { %3386 = vmatpush.msra.mxu0 %v3942_v0  ;;  %3307 = vmatpush.msra.mxu2 %v3909_v22  ;;  %v4007_v0 = vld [vmem:[%s6821_s7 + $0x3f0] sm:$0xff]  ;;  %v3974_v22 = vld [vmem:[%s6821_s7 + $0x2e8] sm:$0xff] }
 0x431   : > { %v2839_v18 = vadd.f32 %v2811_v5, %v2204_v11  ;;  %v3941_v11 = vld [vmem:[%s6821_s7 + $0x1e0] sm:$0xff]  ;;  %v3257_v5 = vld [vmem:[%s6821_s7 + $0x50] sm:$0xff] }
 0x432   : > { %3387 = vmatpush.msra.mxu0 %v3941_v11  ;;  %3268 = vmatpush.msrb.mxu1 %v3257_v5  ;;  %v4006_v11 = vld [vmem:[%s6821_s7 + $0x3e8] sm:$0xff]  ;;  %v3952_v5 = vld [vmem:[%s6821_s7 + $0x238] sm:$0xff] }
 0x433   : > { %v2860_v10 = vadd.f32 %v5929_v15, %v2839_v18  ;;  %v3256_v18 = vld [vmem:[%s6821_s7 + $0x48] sm:$0xff]  ;;  %3308 = vmatpush.msra.mxu2 %v3908_v53  ;;  %v3972_v53 = vld [vmem:[%s6821_s7 + $0x2d8] sm:$0xff] }
 0x434   : > { %3269 = vmatpush.msrb.mxu1 %v3256_v18  ;;  %v3973_v18 = vld [vmem:[%s6821_s7 + $0x2e0] sm:$0xff] }
 0x435   : > { %v2878_v49 = vmax.f32 %v2860_v10, 0.0  ;;  %v3255_v10 = vld [vmem:[%s6821_s7 + $0x40] sm:$0xff] }
 0x436   : > { %3270 = vmatpush.msrb.mxu1 %v3255_v10  ;;  %v3989_v10 = vld [vmem:[%s6821_s7 + $0x360] sm:$0xff] }
 0x437   : > { %3876 = vmatmul.msk.f32.gmra.mxu2 %vm2900_vm1, %v2878_v49  ;;  %v3254_v49 = vld [vmem:[%s6821_s7 + $0x38] sm:$0xff] }
 0x438   : > { %3271 = vmatpush.msrb.mxu1 %v3254_v49  ;;  %v4005_v49 = vld [vmem:[%s6821_s7 + $0x3e0] sm:$0xff] }
 0x439   : > { %v2179_v41 = vpop.f32.mrf.mxu2 }
 0x43a   : > { %v2205_v21 = vadd.f32 %v2179_v41, %v1563_v30  ;;  %3272 = vmatpush.msrb.mxu1 %v3253_v32  ;;  %v3940_v41 = vld [vmem:[%s6821_s7 + $0x1d8] sm:$0xff]  ;;  %v3252_v30 = vld [vmem:[%s6821_s7 + $0x28] sm:$0xff]  ;;  %v3951_v32 = vld [vmem:[%s6821_s7 + $0x230] sm:$0xff] }
 0x43b   : > { %3388 = vmatpush.msra.mxu0 %v3940_v41  ;;  %v4004_v41 = vld [vmem:[%s6821_s7 + $0x3d8] sm:$0xff] }
 0x43c   : > { %3273 = vmatpush.msrb.mxu1 %v3252_v30  ;;  %v3950_v30 = vld [vmem:[%s6821_s7 + $0x228] sm:$0xff] }
 0x441   : > { %v2182_v50 = vpop.f32.mrf.mxu2 }
 0x442   : > { %v2206_v1 = vadd.f32 %v2182_v50, %v1566_v37  ;;  %v3920_v50 = vld [vmem:[%s6821_s7 + $0x138] sm:$0xff]  ;;  %v3248_v37 = vld [vmem:[%s6821_s7 + $0x8] sm:$0xff] }
 0x449   : > { %v2814_v13 = vpop.f32.mrf.mxu3 }
 0x44a   : > { %v2840_v38 = vadd.f32 %v2814_v13, %v2205_v21  ;;  %v3907_v21 = vld [vmem:[%s6821_s7 + $0xd0] sm:$0xff] }
 0x44b   : > { %v3923_v13 = vld [vmem:[%s6821_s7 + $0x150] sm:$0xff]  ;;  %3309 = vmatpush.msra.mxu2 %v3907_v21 }
 0x44c   : > { %v2861_v7 = vadd.f32 %v5929_v15, %v2840_v38  ;;  %v3939_v38 = vld [vmem:[%s6821_s7 + $0x1d0] sm:$0xff]  ;;  %3349 = vmatpush.msrb.mxu3 %v3923_v13 }
 0x44d   : > { %3389 = vmatpush.msra.mxu0 %v3939_v38  ;;  %3310 = vmatpush.msra.mxu2 %v3906_v34  ;;  %v3971_v21 = vld [vmem:[%s6821_s7 + $0x2d0] sm:$0xff]  ;;  %v3970_v34 = vld [vmem:[%s6821_s7 + $0x2c8] sm:$0xff] }
 0x44e   : > { %v2879_v8 = vmax.f32 %v2861_v7, 0.0  ;;  %v3251_v7 = vld [vmem:[%s6821_s7 + $0x20] sm:$0xff]  ;;  %3350 = vmatpush.msrb.mxu3 %v3922_v56  ;;  %v3987_v13 = vld [vmem:[%s6821_s7 + $0x350] sm:$0xff]  ;;  %v3986_v56 = vld [vmem:[%s6821_s7 + $0x348] sm:$0xff] }
 0x44f   : > { %3274 = vmatpush.msrb.mxu1 %v3251_v7  ;;  %3311 = vmatpush.msra.mxu2 %v3905_v6  ;;  %v4003_v38 = vld [vmem:[%s6821_s7 + $0x3d0] sm:$0xff]  ;;  %v3949_v7 = vld [vmem:[%s6821_s7 + $0x220] sm:$0xff]  ;;  %v3948_v6 = vld [vmem:[%s6821_s7 + $0x218] sm:$0xff] }
 0x450   : > { %3885 = vmatmul.msk.f32.vlgmr.msra.gmra.mxu3 %vm2900_vm1, %v2879_v8  ;;  %v3938_v8 = vld [vmem:[%s6821_s7 + $0x1c8] sm:$0xff] }
 0x451   : > { %3390 = vmatpush.msra.mxu0 %v3938_v8  ;;  %3275 = vmatpush.msrb.mxu1 %v3250_v24  ;;  %v4002_v8 = vld [vmem:[%s6821_s7 + $0x3c8] sm:$0xff]  ;;  %v2924_v24 = vpop.f32.mrf.mxu0 }
 0x452   : > { %3351 = vmatpush.msrb.mxu3 %v3921_v9  ;;  %3312 = vmatpush.msra.mxu2 %v3904_v61  ;;  %v3969_v9 = vld [vmem:[%s6821_s7 + $0x2c0] sm:$0xff]  ;;  %v3947_v61 = vld [vmem:[%s6821_s7 + $0x210] sm:$0xff] }
 0x453   : > { %3391 = vmatpush.msra.mxu0 %v3937_v43  ;;  %3276 = vmatpush.msrb.mxu1 %v3249_v36  ;;  %v3985_v43 = vld [vmem:[%s6821_s7 + $0x340] sm:$0xff] }
 0x454   : > { %3352 = vmatpush.msrb.mxu3 %v3920_v50  ;;  %v4001_v36 = vld [vmem:[%s6821_s7 + $0x3c0] sm:$0xff]  ;;  %v3968_v50 = vld [vmem:[%s6821_s7 + $0x2b8] sm:$0xff] }
 0x455   : > { %3392 = vmatpush.msra.mxu0 %v3936_v17  ;;  %3277 = vmatpush.msrb.mxu1 %v3248_v37  ;;  %v3984_v17 = vld [vmem:[%s6821_s7 + $0x338] sm:$0xff] }
 0x456   : > { %v4000_v37 = vld [vmem:[%s6821_s7 + $0x3b8] sm:$0xff] }
 0x45d   : > { %v2817_v16 = vpop.f32.mrf.mxu3 }
 0x45e   : > { %v2841_v28 = vadd.f32 %v2817_v16, %v2206_v1  ;;  %v3903_v1 = vld [vmem:[%s6821_s7 + $0xb0] sm:$0xff] }
 0x45f   : > { %v3919_v16 = vld [vmem:[%s6821_s7 + $0x130] sm:$0xff]  ;;  %3313 = vmatpush.msra.mxu2 %v3903_v1  ;;  %v3946_v1 = vld [vmem:[%s6821_s7 + $0x208] sm:$0xff] }
 0x460   : > { %v2862_v19 = vadd.f32 %v5929_v15, %v2841_v28  ;;  %v3935_v28 = vld [vmem:[%s6821_s7 + $0x1b0] sm:$0xff]  ;;  %3353 = vmatpush.msrb.mxu3 %v3919_v16 }
 0x461   : > { %3393 = vmatpush.msra.mxu0 %v3935_v28  ;;  %v3967_v16 = vld [vmem:[%s6821_s7 + $0x2b0] sm:$0xff] }
 0x462   : > { %v2880_v51 = vmax.f32 %v2862_v19, 0.0  ;;  %v3247_v19 = vld [vmem:[%s6821_s7] sm:$0xff]  ;;  %3354 = vmatpush.msrb.mxu3 %v3918_v33  ;;  %v3983_v28 = vld [vmem:[%s6821_s7 + $0x330] sm:$0xff]  ;;  %v3966_v33 = vld [vmem:[%s6821_s7 + $0x2a8] sm:$0xff] }
 0x463   : > { %3278 = vmatpush.msrb.mxu1 %v3247_v19  ;;  %v3999_v19 = vld [vmem:[%s6821_s7 + $0x3b0] sm:$0xff] }
 0x464   : > { %3886 = vmatmul.msk.f32.gmra.mxu3 %vm2900_vm1, %v2880_v51  ;;  %v3902_v51 = vld [vmem:[%s6821_s7 + $0xa8] sm:$0xff] }
 0x465   : > { %3314 = vmatpush.msra.mxu2 %v3902_v51  ;;  %v3945_v51 = vld [vmem:[%s6821_s7 + $0x200] sm:$0xff] }
 0x46c   : > { %v2185_v58 = vpop.f32.mrf.mxu2 }
 0x46d   : > { %v2207_v47 = vadd.f32 %v2185_v58, %v1569_v62  ;;  %v3934_v58 = vld [vmem:[%s6821_s7 + $0x1a8] sm:$0xff]  ;;  %v3960_v62 = vld [vmem:[%s6821_s7 + $0x278] sm:$0xff] }
 0x46e   : > { %3394 = vmatpush.msra.mxu0 %v3934_v58  ;;  %3424 = vmatpush.msra.mxu1 %v3960_v62  ;;  %v3982_v58 = vld [vmem:[%s6821_s7 + $0x328] sm:$0xff] }
 0x46f   : > { %v3998_v62 = vld [vmem:[%s6821_s7 + $0x3a8] sm:$0xff] }
 0x474   : > { %v2820_v42 = vpop.f32.mrf.mxu3  ;;  %v2188_v15 = vpop.f32.mrf.mxu2 }
 0x475   : > { %v2842_v46 = vadd.f32 %v2820_v42, %v2207_v47  ;;  %v2208_v23 = vadd.f32 %v2188_v15, %v1572_v44  ;;  %v3901_v47 = vld [vmem:[%s6821_s7 + $0xa0] sm:$0xff]  ;;  %v3958_v15 = vld [vmem:[%s6821_s7 + $0x268] sm:$0xff]  ;;  %v3899_v44 = vld [vmem:[%s6821_s7 + $0x90] sm:$0xff] }
 0x476   : > { %v3917_v42 = vld [vmem:[%s6821_s7 + $0x120] sm:$0xff]  ;;  %3315 = vmatpush.msra.mxu2 %v3901_v47  ;;  %v6680_v47 = vpop.f32.mrf.mxu0 }
 0x477   : > { %v2863_v57 = vadd.f32 %v4193_v20, %v2842_v46  ;;  %v3933_v46 = vld [vmem:[%s6821_s7 + $0x1a0] sm:$0xff]  ;;  %3355 = vmatpush.msrb.mxu3 %v3917_v42 }
 0x478   : > { %3395 = vmatpush.msra.mxu0 %v3933_v46  ;;  %v3965_v46 = vld [vmem:[%s6821_s7 + $0x2a0] sm:$0xff] }
 0x479   : > { %v2881_v48 = vmax.f32 %v2863_v57, 0.0  ;;  %v3900_v57 = vld [vmem:[%s6821_s7 + $0x98] sm:$0xff] }
 0x47a   : > { %3316 = vmatpush.msra.mxu2 %v3900_v57  ;;  %3396 = vmatpush.msra.mxu0 %v3932_v29  ;;  %v3997_v57 = vld [vmem:[%s6821_s7 + $0x3a0] sm:$0xff] }
 0x47b   : > { %3895 = vmatmul.msk.f32.vlgmr.msrb.gmra.mxu0 %vm2900_vm1, %v2881_v48  ;;  %v3916_v48 = vld [vmem:[%s6821_s7 + $0x118] sm:$0xff] }
 0x47c   : > { %3356 = vmatpush.msrb.mxu3 %v3916_v48  ;;  %3317 = vmatpush.msra.mxu2 %v3899_v44  ;;  %v2991_v42 = vpop.f32.mrf.mxu2  ;;  %v2953_v48 = vpop.f32.mrf.mxu1  ;;  %v3980_v44 = vld [vmem:[%s6821_s7 + $0x318] sm:$0xff] }
 0x488   : > { %v2823_v14 = vpop.f32.mrf.mxu3 }
 0x489   : > { %v2843_v4 = vadd.f32 %v2823_v14, %v2208_v23  ;;  %v3915_v23 = vld [vmem:[%s6821_s7 + $0x110] sm:$0xff] }
 0x48a   : > { %v3931_v14 = vld [vmem:[%s6821_s7 + $0x190] sm:$0xff]  ;;  %3357 = vmatpush.msrb.mxu3 %v3915_v23  ;;  %v3996_v23 = vld [vmem:[%s6821_s7 + $0x398] sm:$0xff] }
 0x48b   : > { %v2864_v25 = vadd.f32 %v4193_v20, %v2843_v4  ;;  %v3959_v20 = vld [vmem:[%s6821_s7 + $0x270] sm:$0xff]  ;;  %v3957_v4 = vld [vmem:[%s6821_s7 + $0x260] sm:$0xff]  ;;  %3397 = vmatpush.msra.mxu0 %v3931_v14 }
 0x48c   : > { %3425 = vmatpush.msra.mxu1 %v3959_v20  ;;  %v3981_v20 = vld [vmem:[%s6821_s7 + $0x320] sm:$0xff]  ;;  %v3963_v14 = vld [vmem:[%s6821_s7 + $0x290] sm:$0xff] }
 0x48d   : > { %v2882_v26 = vmax.f32 %v2864_v25, 0.0  ;;  %v3898_v25 = vld [vmem:[%s6821_s7 + $0x88] sm:$0xff]  ;;  %3398 = vmatpush.msra.mxu0 %v3930_v63 }
 0x48e   : > { %3426 = vmatpush.msra.mxu1 %v3958_v15  ;;  %3318 = vmatpush.msra.mxu2 %v3898_v25  ;;  %v3964_v15 = vld [vmem:[%s6821_s7 + $0x298] sm:$0xff]  ;;  %v3995_v25 = vld [vmem:[%s6821_s7 + $0x390] sm:$0xff]  ;;  %v3978_v63 = vld [vmem:[%s6821_s7 + $0x308] sm:$0xff] }
 0x48f   : > { %3896 = vmatmul.msk.f32.gmra.mxu0 %vm2900_vm1, %v2882_v26  ;;  %v3914_v26 = vld [vmem:[%s6821_s7 + $0x108] sm:$0xff] }
 0x490   : > { %3427 = vmatpush.msra.mxu1 %v3957_v4  ;;  %3358 = vmatpush.msrb.mxu3 %v3914_v26  ;;  %v3031_v29 = vpop.f32.mrf.mxu3  ;;  %v3979_v4 = vld [vmem:[%s6821_s7 + $0x310] sm:$0xff]  ;;  %v3962_v26 = vld [vmem:[%s6821_s7 + $0x288] sm:$0xff] }
 0x491   : > { %3319 = vmatpush.msra.mxu2 %v3897_v52  ;;  %3399 = vmatpush.msra.mxu0 %v3929_v40  ;;  %v2954_v52 = vadd.f32 %v2953_v48, %v2924_v24  ;;  %v3961_v40 = vld [vmem:[%s6821_s7 + $0x280] sm:$0xff] }
 0x492   : > { %3428 = vmatpush.msra.mxu1 %v3956_v2  ;;  %3359 = vmatpush.msrb.mxu3 %v3913_v55  ;;  %v3994_v2 = vld [vmem:[%s6821_s7 + $0x388] sm:$0xff]  ;;  %v3071_v55 = vpop.f32.mrf.mxu0 }
 0x493   : > { %3464 = vmatpush.msrb.mxu2 %v3976_v45  ;;  %3544 = vmatpush.msrb.mxu0 %v4008_v12  ;;  %v3993_v45 = vld [vmem:[%s6821_s7 + $0x380] sm:$0xff]  ;;  %v2956_v12 = vpop.f32.mrf.mxu1 }
 0x494   : > { %3429 = vmatpush.msra.mxu1 %v3955_v27  ;;  %3504 = vmatpush.msra.mxu3 %v3992_v54  ;;  %v3977_v27 = vld [vmem:[%s6821_s7 + $0x300] sm:$0xff]  ;;  %v2997_v54 = vadd.f32 %v2991_v42, %v2954_v52  ;;  %v4014_v42 = vld [vmem:[%s6821_s7 + $0x428] sm:$0xff] }
 0x495   : > { %3465 = vmatpush.msrb.mxu2 %v3975_v3  ;;  %3545 = vmatpush.msrb.mxu0 %v4007_v0 }
 0x496   : > { %3430 = vmatpush.msra.mxu1 %v3954_v31  ;;  %3505 = vmatpush.msra.mxu3 %v3991_v35  ;;  %v2994_v31 = vpop.f32.mrf.mxu2  ;;  %v3037_v3 = vadd.f32 %v3031_v29, %v2997_v54  ;;  %v4012_v29 = vld [vmem:[%s6821_s7 + $0x418] sm:$0xff] }
 0x497   : > { %3466 = vmatpush.msrb.mxu2 %v3974_v22  ;;  %3546 = vmatpush.msrb.mxu0 %v4006_v11 }
 0x498   : > { %3431 = vmatpush.msra.mxu1 %v3953_v59  ;;  %3506 = vmatpush.msra.mxu3 %v3990_v39  ;;  %v3034_v35 = vpop.f32.mrf.mxu3  ;;  %v3077_v0 = vadd.f32 %v3071_v55, %v3037_v3 }
 0x499   : > { %3467 = vmatpush.msrb.mxu2 %v3973_v18  ;;  %3547 = vmatpush.msrb.mxu0 %v4005_v49  ;;  %v4173_v49 = vld [vmem:[%s6820_s6] ss:$0 sm:$0xff] }
 0x49a   : > { %3432 = vmatpush.msra.mxu1 %v3952_v5  ;;  %3507 = vmatpush.msra.mxu3 %v3989_v10  ;;  %v3074_v59 = vpop.f32.mrf.mxu0 }
 0x49b   : > { %3468 = vmatpush.msrb.mxu2 %v3972_v53  ;;  %3548 = vmatpush.msrb.mxu0 %v4004_v41  ;;  %v3111_v22 = vpop.f32.mrf.mxu1 }
 0x49c   : > { %3433 = vmatpush.msra.mxu1 %v3951_v32  ;;  %3508 = vmatpush.msra.mxu3 %v3988_v60  ;;  %v3117_v11 = vadd.f32 %v3111_v22, %v3077_v0 }
 0x49d   : > { %3469 = vmatpush.msrb.mxu2 %v3971_v21  ;;  %3549 = vmatpush.msrb.mxu0 %v4003_v38 }
 0x49e   : > { %3434 = vmatpush.msra.mxu1 %v3950_v30  ;;  %3509 = vmatpush.msra.mxu3 %v3987_v13  ;;  %v4024_v30 = vld [vmem:[%s6821_s7 + $0x478] sm:$0xff] }
 0x49f   : > { %3470 = vmatpush.msrb.mxu2 %v3970_v34  ;;  %3550 = vmatpush.msrb.mxu0 %v4002_v8  ;;  %v4022_v34 = vld [vmem:[%s6821_s7 + $0x468] sm:$0xff]  ;;  %v4021_v8 = vld [vmem:[%s6821_s7 + $0x460] sm:$0xff] }
 0x4a0   : > { %3435 = vmatpush.msra.mxu1 %v3949_v7  ;;  %3510 = vmatpush.msra.mxu3 %v3986_v56  ;;  %v4023_v7 = vld [vmem:[%s6821_s7 + $0x470] sm:$0xff]  ;;  %v2957_v56 = vadd.f32 %v2956_v12, %v6680_v47 }
 0x4a1   : > { %3471 = vmatpush.msrb.mxu2 %v3969_v9  ;;  %3551 = vmatpush.msrb.mxu0 %v4001_v36  ;;  %v4020_v9 = vld [vmem:[%s6821_s7 + $0x458] sm:$0xff] }
 0x4a2   : > { %3436 = vmatpush.msra.mxu1 %v3948_v6  ;;  %3511 = vmatpush.msra.mxu3 %v3985_v43  ;;  %v2998_v24 = vadd.f32 %v2994_v31, %v2957_v56 }
 0x4a3   : > { %3472 = vmatpush.msrb.mxu2 %v3968_v50  ;;  %3552 = vmatpush.msrb.mxu0 %v4000_v37  ;;  %v4019_v50 = vld [vmem:[%s6821_s7 + $0x450] sm:$0xff]  ;;  %v4018_v37 = vld [vmem:[%s6821_s7 + $0x448] sm:$0xff] }
 0x4a4   : > { %3437 = vmatpush.msra.mxu1 %v3947_v61  ;;  %3512 = vmatpush.msra.mxu3 %v3984_v17  ;;  %v3038_v43 = vadd.f32 %v3034_v35, %v2998_v24 }
 0x4a5   : > { %3473 = vmatpush.msrb.mxu2 %v3967_v16  ;;  %3553 = vmatpush.msrb.mxu0 %v3999_v19  ;;  %v4017_v16 = vld [vmem:[%s6821_s7 + $0x440] sm:$0xff]  ;;  %v3114_v19 = vpop.f32.mrf.mxu1 }
 0x4a6   : > { %3438 = vmatpush.msra.mxu1 %v3946_v1  ;;  %3513 = vmatpush.msra.mxu3 %v3983_v28  ;;  %v3078_v1 = vadd.f32 %v3074_v59, %v3038_v43  ;;  %v4016_v28 = vld [vmem:[%s6821_s7 + $0x438] sm:$0xff] }
 0x4a7   : > { %3474 = vmatpush.msrb.mxu2 %v3966_v33  ;;  %3554 = vmatpush.msrb.mxu0 %v3998_v62 }
 0x4a8   : > { %3439 = vmatpush.msra.mxu1 %v3945_v51  ;;  %3514 = vmatpush.msra.mxu3 %v3982_v58  ;;  %v3151_v39 = vpop.f32.mrf.mxu2  ;;  %v3118_v33 = vadd.f32 %v3114_v19, %v3078_v1  ;;  %v4015_v58 = vld [vmem:[%s6821_s7 + $0x430] sm:$0xff] }
 0x4a9   : > { %3475 = vmatpush.msrb.mxu2 %v3965_v46  ;;  %3555 = vmatpush.msrb.mxu0 %v3997_v57  ;;  %v3157_v18 = vadd.f32 %v3151_v39, %v3117_v11  ;;  %v4013_v57 = vld [vmem:[%s6821_s7 + $0x420] sm:$0xff] }
 0x4aa   : > { %3515 = vmatpush.msra.mxu3 %v3981_v20 }
 0x4ab   : > { %3476 = vmatpush.msrb.mxu2 %v3964_v15  ;;  %3556 = vmatpush.msrb.mxu0 %v3996_v23  ;;  %v4011_v15 = vld [vmem:[%s6821_s7 + $0x410] sm:$0xff]  ;;  %v4010_v23 = vld [vmem:[%s6821_s7 + $0x408] sm:$0xff] }
 0x4ac   : > { %3516 = vmatpush.msra.mxu3 %v3980_v44 }
 0x4ad   : > { %3477 = vmatpush.msrb.mxu2 %v3963_v14  ;;  %3557 = vmatpush.msrb.mxu0 %v3995_v25  ;;  %v4009_v14 = vld [vmem:[%s6821_s7 + $0x400] sm:$0xff] }
 0x4ae   : > { %3517 = vmatpush.msra.mxu3 %v3979_v4  ;;  %v3246_v25 = vld [vmem:[%s6822_s8] sm:$0x1] }
 0x4af   : > { %3478 = vmatpush.msrb.mxu2 %v3962_v26  ;;  %3558 = vmatpush.msrb.mxu0 %v3994_v2 }
 0x4b0   : > { %3518 = vmatpush.msra.mxu3 %v3978_v63 }
 0x4b1   : > { %3479 = vmatpush.msrb.mxu2 %v3961_v40  ;;  %3559 = vmatpush.msrb.mxu0 %v3993_v45 }
 0x4b2   : > { %3519 = vmatpush.msra.mxu3 %v3977_v27 }
 0x4ba   : > { %v3154_v51 = vpop.f32.mrf.mxu2 }
 0x4bb   : > { %v3158_v47 = vadd.f32 %v3154_v51, %v3118_v33 }
 0x4d3   : > { %v3191_v5 = vpop.f32.mrf.mxu3 }
 0x4d4   : > { %v3197_v10 = vadd.f32 %v3191_v5, %v3157_v18 }
 0x4e7   : > { %v3194_v62 = vpop.f32.mrf.mxu3 }
 0x4e8   : > { %v3198_v20 = vadd.f32 %v3194_v62, %v3158_v47 }
 0x4f8   : > { %v3231_v32 = vpop.f32.mrf.mxu0 }
 0x4f9   : > { %v3237_v53 = vadd.f32 %v3231_v32, %v3197_v10 }
 0x4fb   : > { %v3242_v60 = vadd.f32 %v4173_v49, %v3237_v53 }
 0x4fd   : > { %v3244_v41 = vmax.f32 %v3242_v60, 0.0 }
 0x4ff   : > { %3279 = vmatmul.f32.vlgmr.msrb.gmra.mxu1 %v3244_v41  ;;  %v3302_v21 = vrot.slane %v3244_v41, 1  ;;  %v3342_v13 = vrot.slane %v3244_v41, 2  ;;  %v3382_v38 = vrot.slane %v3244_v41, 3  ;;  %v3422_v6 = vrot.slane %v3244_v41, 4 }
 0x500   : > { %3582 = vmatpush.msrb.mxu1 %v4024_v30  ;;  %v3462_v36 = vrot.slane %v3244_v41, 5  ;;  %v3502_v61 = vrot.slane %v3244_v41, 6  ;;  %v3542_v17 = vrot.slane %v3244_v41, 7 }
 0x501   : > { %3320 = vmatmul.f32.vlgmr.msra.gmra.mxu2 %v3302_v21  ;;  %3360 = vmatmul.f32.vlgmr.msrb.gmra.mxu3 %v3342_v13 }
 0x502   : > { %3400 = vmatmul.f32.vlgmr.msra.gmra.mxu0 %v3382_v38  ;;  %3583 = vmatpush.msrb.mxu1 %v4023_v7 }
 0x504   : > { %3584 = vmatpush.msrb.mxu1 %v4022_v34 }
 0x506   : > { %3585 = vmatpush.msrb.mxu1 %v4021_v8 }
 0x507   : > { %3440 = vmatmul.f32.vlgmr.msra.gmra.mxu1 %v3422_v6 }
 0x508   : > { %3586 = vmatpush.msrb.mxu1 %v4020_v9 }
 0x509   : > { %3480 = vmatmul.f32.vlgmr.msrb.gmra.mxu2 %v3462_v36  ;;  %3520 = vmatmul.f32.vlgmr.msra.gmra.mxu3 %v3502_v61 }
 0x50a   : > { %3560 = vmatmul.f32.vlgmr.msrb.gmra.mxu0 %v3542_v17  ;;  %3587 = vmatpush.msrb.mxu1 %v4019_v50 }
 0x50c   : > { %3588 = vmatpush.msrb.mxu1 %v4018_v37  ;;  %v3234_v46 = vpop.f32.mrf.mxu0 }
 0x50d   : > { %v3238_v48 = vadd.f32 %v3234_v46, %v3198_v20 }
 0x50e   : > { %3589 = vmatpush.msrb.mxu1 %v4017_v16 }
 0x50f   : > { %v3243_v44 = vadd.f32 %v4173_v49, %v3238_v48 }
 0x510   : > { %3590 = vmatpush.msrb.mxu1 %v4016_v28 }
 0x511   : > { %v3245_v4 = vmax.f32 %v3243_v44, 0.0 }
 0x512   : > { %3591 = vmatpush.msrb.mxu1 %v4015_v58 }
 0x514   : > { %3592 = vmatpush.msrb.mxu1 %v4014_v42 }
 0x516   : > { %3593 = vmatpush.msrb.mxu1 %v4013_v57 }
 0x518   : > { %3594 = vmatpush.msrb.mxu1 %v4012_v29 }
 0x51a   : > { %3595 = vmatpush.msrb.mxu1 %v4011_v15 }
 0x51c   : > { %3596 = vmatpush.msrb.mxu1 %v4010_v23 }
 0x51e   : > { %3597 = vmatpush.msrb.mxu1 %v4009_v14 }
 0x51f   : > { %3598 = vmatmul.f32.vlgmr.msrb.gmra.mxu1 %v3245_v4 }
 0x57c   : > { %v3280_v26 = vpop.f32.mrf.mxu1 }
 0x57d   : > { %v3283_v63 = vadd.f32 %v3280_v26, %v3246_v25 }
 0x57f   : > { %v3401_v27 = vpop.f32.mrf.mxu0 }
 0x584   : > { %v3321_v2 = vpop.f32.mrf.mxu2  ;;  %v3361_v55 = vpop.f32.mrf.mxu3 }
 0x585   : > { %v3324_v52 = vadd.f32 %v3321_v2, %v3283_v63  ;;  %v3441_v54 = vpop.f32.mrf.mxu1 }
 0x587   : > { %v3364_v40 = vadd.f32 %v3361_v55, %v3324_v52  ;;  %v3561_v59 = vpop.f32.mrf.mxu0 }
 0x589   : > { %v3404_v45 = vadd.f32 %v3401_v27, %v3364_v40 }
 0x58b   : > { %v3444_v12 = vadd.f32 %v3441_v54, %v3404_v45 }
 0x58c   : > { %v3481_v31 = vpop.f32.mrf.mxu2  ;;  %v3521_v35 = vpop.f32.mrf.mxu3 }
 0x58d   : > { %v3484_v3 = vadd.f32 %v3481_v31, %v3444_v12 }
 0x58f   : > { %v3524_v0 = vadd.f32 %v3521_v35, %v3484_v3 }
 0x591   : > { %v3564_v22 = vadd.f32 %v3561_v59, %v3524_v0 }
 0x59c   : > { %v3599_v39 = vpop.f32.mrf.mxu1 }
 0x59d   : > { %v3602_v11 = vadd.f32 %v3599_v39, %v3564_v22 }
 0x59f   : > { %3603 = vst [vmem:[%s324_s23] sm:$0x1] %v3602_v11 }
 0x5a0   : > { %4221 = shalt.err (!%p4218_p3)
}
 0x5a1   : > { %4032 = dma.vmem_to_hbm [thread:$0]  (%p4350_p5), %s3616_s24, 16, %s3618_s26, %s3605_s27  }
 0x5a2 PF: > { %p4038_p4 = scmp.ge.s32.totalorder %s4256_s12, 2  ;;  %s3629_s17 = sand.u32 1, %s4244_s30  }
 0x5a3   : > { %s3630_s22 = scalar_lea.sflag [#allocation3], %s3629_s17 }
 0x5a4   : > { %p4035_p7 = pnand %p4038_p4, %p4354_p6 }
 0x5a6   : > { %p4036_p8 = pneg %p4035_p7 }
 0x5a8   : > { %4239 = dma.done.wait (%p4036_p8), %s3630_s22, 16  }
 0x5a9   : > { %4241 = vsyncadd (%p4036_p8), %s3630_s22, 4294967280  ;;  %p19_p9 = scmp.ge.s32.totalorder %s4337_s15, 4   ;;  %s7081_s30 = smov %s4248_s10 }
 0x5aa   : > { %s7082_s10 = smov %s4252_s11  ;;  %s7083_s11 = smov %s4348_s18 }
 0x5ab   : > { %s7084_s12 = smov %s4337_s15  ;;  %21 = sbr.rel (!%p19_p9) target bundleno = 3 (0x3), region = 113 }
 0x5b0   :  { %3635 = vsyncpa [#allocation3], 1 }
 0x5b1   :  { %3637 = vsyncpa [#allocation3 + $0x1], 1 }

</bundles_post_ra>
